<compile_context>
chip_gen: v5e
topology: v5e:2x2
jax: 0.10.0
libtpu: 0.0.40
codegen_flags: <defaults>
</compile_context>

<pallas_src>
import jax
import jax.numpy as jnp
from jax import lax
from jax.experimental import pallas as pl
from jax.experimental.pallas import tpu as pltpu


def ca_block(x, w1, bn_gamma, bn_beta, bn_mean, bn_var, wh, ww,
             eps=1e-5, use_bf16_matmul=False):
    """Coordinate-attention forward.

    x:  (N, C, H, W) float32
    w1: (Cr, C)   squeeze 1x1 conv weight (conv_1x1, bias=False)
    wh, ww: (C, Cr) excite 1x1 conv weights (F_h, F_w, bias=False)
    bn_*: (Cr,)   BatchNorm2d params / running stats (eval mode)
    """
    N, C, H, W = x.shape
    Cr = w1.shape[0]
    HW = H * W
    mm_dtype = jnp.bfloat16 if use_bf16_matmul else jnp.float32

    # ---- trace-time constant folding (once per call, not per grid step) ----
    inv_std = 1.0 / jnp.sqrt(bn_var + eps)
    scale = (bn_gamma * inv_std).astype(jnp.float32)                  # (Cr,)
    shift = (bn_beta - bn_mean * bn_gamma * inv_std).astype(jnp.float32)
    w1_scaled = (scale[:, None] * w1).astype(jnp.float32)             # BN folded
    shift2 = shift.reshape(Cr, 1)                                     # (Cr, 1)

    # Pooling matrix: pooled = x2 @ P;  P[:, :H] = mean over W, P[:, H:] = mean over H.
    eye_h = jnp.eye(H, dtype=jnp.float32)
    eye_w = jnp.eye(W, dtype=jnp.float32)
    sel_h = jnp.repeat(eye_h, W, axis=0)              # (HW, H), [i,h] = (i//W == h)
    sel_w = jnp.tile(eye_w, (H, 1))                   # (HW, W), [i,w] = (i%W == w)
    pool = jnp.concatenate([sel_h / W, sel_w / H], axis=1).astype(mm_dtype)
    e_h = sel_h.T.astype(mm_dtype)                    # (H, HW) expansion matrix
    e_w = sel_w.T.astype(mm_dtype)                    # (W, HW) expansion matrix

    x2 = x.reshape(N, C, HW)                          # free, contiguous reshape

    # ---- batch tiling: largest divisor of N with an x block under ~2 MiB ----
    bytes_per_batch = C * HW * 4
    B_t = 1
    for d in range(1, N + 1):
        if N % d == 0 and d * bytes_per_batch <= (2 << 20):
            B_t = d
    grid = (N // B_t,)

    # ---- lane-aligned gating chunks over HW (multiples of 128 when possible) ----
    if HW < 128:
        chunk = HW
    elif HW >= 1024:
        chunk = 512
    else:
        chunk = 128
    num_full = HW // chunk
    rem = HW - num_full * chunk

    def kernel(x_ref, pool_ref, w1_ref, shift_ref, wh_ref, ww_ref,
               eh_ref, ew_ref, o_ref):
        pool_c = pool_ref[...]
        w1_c = w1_ref[...]
        shift_c = shift_ref[...]
        wh_c = wh_ref[...]
        ww_c = ww_ref[...]

        for b in range(B_t):                          # static unroll over batch tile
            xv = x_ref[b]                             # (C, HW) f32
            xm = xv.astype(jnp.bfloat16) if use_bf16_matmul else xv

            # coordinate pooling as one MXU matmul (contraction dim = HW)
            pooled = jnp.dot(xm, pool_c,
                             preferred_element_type=jnp.float32)      # (C, H+W)
            # fused squeeze conv (BN scale pre-folded) + BN shift + ReLU
            t = jnp.maximum(
                jnp.dot(w1_c, pooled,
                        preferred_element_type=jnp.float32) + shift_c, 0.0)
            # excite convs + sigmoid
            s_h = jax.nn.sigmoid(jnp.dot(wh_c, t[:, :H],
                                         preferred_element_type=jnp.float32))  # (C, H)
            s_w = jax.nn.sigmoid(jnp.dot(ww_c, t[:, H:],
                                         preferred_element_type=jnp.float32))  # (C, W)
            if use_bf16_matmul:
                s_h = s_h.astype(jnp.bfloat16)
                s_w = s_w.astype(jnp.bfloat16)

            # Chunked gate expansion + gating: the gate is built and consumed
            # per lane chunk; no full (C, HW) temporary is ever materialized.
            def gate_store(off, size, b=b, s_h=s_h, s_w=s_w):
                g = (jnp.dot(s_h, eh_ref[:, pl.ds(off, size)],
                             preferred_element_type=jnp.float32) *
                     jnp.dot(s_w, ew_ref[:, pl.ds(off, size)],
                             preferred_element_type=jnp.float32))      # (C, size)
                o_ref[b, :, pl.ds(off, size)] = x_ref[b, :, pl.ds(off, size)] * g

            if num_full > 0:
                def body(i, carry, gate_store=gate_store):
                    off = pl.multiple_of(i * chunk, chunk)
                    gate_store(off, chunk)
                    return carry
                lax.fori_loop(0, num_full, body, 0)
            if rem > 0:
                gate_store(num_full * chunk, rem)      # static remainder slice

    # ---- VMEM budget: in/out blocks (double-buffered) + constants + temps ----
    csize = 2 if use_bf16_matmul else 4
    block_bytes = B_t * C * HW * 4
    const_bytes = 2 * HW * (H + W) * csize + (Cr * C + Cr + 2 * C * Cr) * 4
    temp_bytes = C * (H + W) * 8 + 3 * C * chunk * 4
    need = 4 * block_bytes + 2 * const_bytes + temp_bytes + (4 << 20)
    try:
        vmem_cap = pltpu.get_tpu_info().vmem_capacity_bytes
    except Exception:
        vmem_cap = 64 << 20                           # conservative (v7x physical)
    vmem_limit = int(min(max(need, 16 << 20), vmem_cap - (8 << 20)))

    x_spec = pl.BlockSpec((B_t, C, HW), lambda n: (n, 0, 0))

    def build(single_buffer_consts):
        def cspec(shape):
            idx = lambda n, _s=shape: (0,) * len(_s)
            if single_buffer_consts:
                # Constant block index across the grid -> single-buffer to save VMEM.
                return pl.BlockSpec(shape, idx, pipeline_mode=pl.Buffered(1))
            return pl.BlockSpec(shape, idx)
        return pl.pallas_call(
            kernel,
            out_shape=jax.ShapeDtypeStruct((N, C, HW), jnp.float32),
            grid_spec=pltpu.PrefetchScalarGridSpec(
                num_scalar_prefetch=0,
                grid=grid,
                in_specs=[x_spec,
                          cspec((HW, H + W)),
                          cspec((Cr, C)),
                          cspec((Cr, 1)),
                          cspec((C, Cr)),
                          cspec((C, Cr)),
                          cspec((H, HW)),
                          cspec((W, HW))],
                out_specs=x_spec),
            compiler_params=pltpu.CompilerParams(
                dimension_semantics=("parallel",),
                vmem_limit_bytes=vmem_limit))

    args = (x2, pool, w1_scaled, shift2, wh, ww, e_h, e_w)
    try:
        out2 = jax.block_until_ready(build(True)(*args))
    except Exception:
        # Installed JAX rejects pipeline_mode / Buffered(1): use default specs.
        out2 = jax.block_until_ready(build(False)(*args))
    return out2.reshape(N, C, H, W)


def ca_block_ref(x, w1, bn_gamma, bn_beta, bn_mean, bn_var, wh, ww, eps=1e-5):
    """Pure-JAX reference mirroring the PyTorch forward (eval-mode BN)."""
    x_h = jnp.mean(x, axis=3)                         # (N, C, H)
    x_w = jnp.mean(x, axis=2)                         # (N, C, W)
    cat = jnp.concatenate([x_h, x_w], axis=2)         # (N, C, H+W)
    y = jnp.einsum("rc,nct->nrt", w1, cat)            # (N, Cr, H+W)
    inv_std = 1.0 / jnp.sqrt(bn_var + eps)
    y = (y - bn_mean[None, :, None]) * inv_std[None, :, None]
    y = y * bn_gamma[None, :, None] + bn_beta[None, :, None]
    y = jnp.maximum(y, 0.0)
    H = x.shape[2]
    t_h, t_w = y[:, :, :H], y[:, :, H:]
    s_h = jax.nn.sigmoid(jnp.einsum("cr,nrh->nch", wh, t_h))   # (N, C, H)
    s_w = jax.nn.sigmoid(jnp.einsum("cr,nrw->ncw", ww, t_w))   # (N, C, W)
    return x * s_h[:, :, :, None] * s_w[:, :, None, :]


if __name__ == "__main__":
    def run_case(N, C, H, W, reduction, use_bf16, atol, rtol):
        Cr = C // reduction
        key = jax.random.PRNGKey(0)
        kx, k1, kh, kw, kg, kb, km, kv = jax.random.split(key, 8)

        x = jax.random.normal(kx, (N, C, H, W), dtype=jnp.float32)
        # conv_1x1 (Cr,C,1,1)->(Cr,C); F_h/F_w (C,Cr,1,1)->(C,Cr)
        w1 = jax.random.normal(k1, (Cr, C), dtype=jnp.float32) * 0.1
        wh = jax.random.normal(kh, (C, Cr), dtype=jnp.float32) * 0.1
        ww = jax.random.normal(kw, (C, Cr), dtype=jnp.float32) * 0.1
        # BatchNorm2d params / running stats (deterministic, non-trivial)
        bn_gamma = 1.0 + 0.1 * jax.random.normal(kg, (Cr,), dtype=jnp.float32)
        bn_beta = 0.1 * jax.random.normal(kb, (Cr,), dtype=jnp.float32)
        bn_mean = 0.1 * jax.random.normal(km, (Cr,), dtype=jnp.float32)
        bn_var = jnp.abs(jax.random.normal(kv, (Cr,), dtype=jnp.float32)) + 0.5

        out = jax.block_until_ready(
            ca_block(x, w1, bn_gamma, bn_beta, bn_mean, bn_var, wh, ww,
                     use_bf16_matmul=use_bf16))
        ref = ca_block_ref(x, w1, bn_gamma, bn_beta, bn_mean, bn_var, wh, ww)
        assert out.shape == x.shape
        err = float(jnp.max(jnp.abs(out - ref)))
        assert jnp.allclose(out, ref, atol=atol, rtol=rtol), \
            (N, C, H, W, use_bf16, err)

    # 1) canonical small shape: batch tile B_t=2, two full 128-lane chunks.
    run_case(2, 64, 16, 16, 16, False, 2e-5, 2e-5)
    # 2) odd spatial dims (HW=135): exercises the non-128-aligned remainder path.
    run_case(1, 32, 9, 15, 16, False, 1e-4, 1e-4)
    # 3) bf16 MXU-operand path (looser accuracy budget).
    run_case(2, 64, 16, 16, 16, True, 5e-2, 5e-2)

    print("KERNEL_OK")
</pallas_src>

<mosaic_0001>
module attributes {stable_mosaic.version = 11 : i64} {
  func.func @kernel(%arg0: i32, %arg1: memref<2x64x256xf32, #tpu.memory_space<vmem>>, %arg2: memref<256x32xf32, #tpu.memory_space<vmem>>, %arg3: memref<4x64xf32, #tpu.memory_space<vmem>>, %arg4: memref<4x1xf32, #tpu.memory_space<vmem>>, %arg5: memref<64x4xf32, #tpu.memory_space<vmem>>, %arg6: memref<64x4xf32, #tpu.memory_space<vmem>>, %arg7: memref<16x256xf32, #tpu.memory_space<vmem>>, %arg8: memref<16x256xf32, #tpu.memory_space<vmem>>, %arg9: memref<2x64x256xf32, #tpu.memory_space<vmem>>) attributes {dimension_semantics = [#tpu.dimension_semantics<parallel>], iteration_bounds = array<i64: 1>, scalar_prefetch = 0 : i64, scratch_operands = 0 : i64, tpu.core_type = #tpu.core_type<tc>, window_params = [{transform_indices = @transform_0, window_bounds = array<i64: 2, 64, 256>}, {pipeline_mode = #tpu.pipeline_mode<synchronous>, transform_indices = @transform_1, window_bounds = array<i64: 256, 32>}, {pipeline_mode = #tpu.pipeline_mode<synchronous>, transform_indices = @transform_2, window_bounds = array<i64: 4, 64>}, {pipeline_mode = #tpu.pipeline_mode<synchronous>, transform_indices = @transform_3, window_bounds = array<i64: 4, 1>}, {pipeline_mode = #tpu.pipeline_mode<synchronous>, transform_indices = @transform_4, window_bounds = array<i64: 64, 4>}, {pipeline_mode = #tpu.pipeline_mode<synchronous>, transform_indices = @transform_5, window_bounds = array<i64: 64, 4>}, {pipeline_mode = #tpu.pipeline_mode<synchronous>, transform_indices = @transform_6, window_bounds = array<i64: 16, 256>}, {pipeline_mode = #tpu.pipeline_mode<synchronous>, transform_indices = @transform_7, window_bounds = array<i64: 16, 256>}, {transform_indices = @transform_8, window_bounds = array<i64: 2, 64, 256>}]} {
    %c0 = arith.constant 0 : index
    %c0_0 = arith.constant 0 : index
    %0 = vector.load %arg2[%c0, %c0_0] : memref<256x32xf32, #tpu.memory_space<vmem>>, vector<256x32xf32>
    %c0_1 = arith.constant 0 : index
    %c0_2 = arith.constant 0 : index
    %1 = vector.load %arg3[%c0_1, %c0_2] : memref<4x64xf32, #tpu.memory_space<vmem>>, vector<4x64xf32>
    %c0_3 = arith.constant 0 : index
    %c0_4 = arith.constant 0 : index
    %2 = vector.load %arg4[%c0_3, %c0_4] : memref<4x1xf32, #tpu.memory_space<vmem>>, vector<4x1xf32>
    %c0_5 = arith.constant 0 : index
    %c0_6 = arith.constant 0 : index
    %3 = vector.load %arg5[%c0_5, %c0_6] : memref<64x4xf32, #tpu.memory_space<vmem>>, vector<64x4xf32>
    %c0_7 = arith.constant 0 : index
    %c0_8 = arith.constant 0 : index
    %4 = vector.load %arg6[%c0_7, %c0_8] : memref<64x4xf32, #tpu.memory_space<vmem>>, vector<64x4xf32>
    %c0_9 = arith.constant 0 : index
    %c0_10 = arith.constant 0 : index
    %c0_11 = arith.constant 0 : index
    %5 = vector.load %arg1[%c0_9, %c0_10, %c0_11] : memref<2x64x256xf32, #tpu.memory_space<vmem>>, vector<1x64x256xf32>
    %6 = vector.shape_cast %5 : vector<1x64x256xf32> to vector<64x256xf32>
    %cst = arith.constant dense<0.000000e+00> : vector<64x32xf32>
    %7 = tpu.matmul %6, %0, %cst {dimension_numbers = #tpu.dot_dimension_numbers<[1], [0], [0], [1], [0, 0, 1, 1], [], []>} : vector<64x256xf32>, vector<256x32xf32>, vector<64x32xf32> -> vector<64x32xf32>
    %cst_12 = arith.constant dense<0.000000e+00> : vector<4x32xf32>
    %8 = tpu.matmul %1, %7, %cst_12 {dimension_numbers = #tpu.dot_dimension_numbers<[1], [0], [0], [1], [0, 0, 1, 1], [], []>} : vector<4x64xf32>, vector<64x32xf32>, vector<4x32xf32> -> vector<4x32xf32>
    %9 = vector.broadcast %2 : vector<4x1xf32> to vector<4x32xf32>
    %10 = arith.addf %8, %9 : vector<4x32xf32>
    %cst_13 = arith.constant 0.000000e+00 : f32
    %11 = vector.broadcast %cst_13 : f32 to vector<4x32xf32>
    %12 = arith.maximumf %10, %11 : vector<4x32xf32>
    %13 = vector.extract_strided_slice %12 {offsets = [0, 0], sizes = [4, 16], strides = [1, 1]} : vector<4x32xf32> to vector<4x16xf32>
    %cst_14 = arith.constant dense<0.000000e+00> : vector<64x16xf32>
    %14 = tpu.matmul %3, %13, %cst_14 {dimension_numbers = #tpu.dot_dimension_numbers<[1], [0], [0], [1], [0, 0, 1, 1], [], []>} : vector<64x4xf32>, vector<4x16xf32>, vector<64x16xf32> -> vector<64x16xf32>
    %15 = arith.negf %14 : vector<64x16xf32>
    %16 = math.exp %15 : vector<64x16xf32>
    %cst_15 = arith.constant 1.000000e+00 : f32
    %17 = vector.broadcast %cst_15 : f32 to vector<64x16xf32>
    %18 = arith.addf %17, %16 : vector<64x16xf32>
    %19 = arith.divf %17, %18 : vector<64x16xf32>
    %20 = vector.extract_strided_slice %12 {offsets = [0, 16], sizes = [4, 16], strides = [1, 1]} : vector<4x32xf32> to vector<4x16xf32>
    %cst_16 = arith.constant dense<0.000000e+00> : vector<64x16xf32>
    %21 = tpu.matmul %4, %20, %cst_16 {dimension_numbers = #tpu.dot_dimension_numbers<[1], [0], [0], [1], [0, 0, 1, 1], [], []>} : vector<64x4xf32>, vector<4x16xf32>, vector<64x16xf32> -> vector<64x16xf32>
    %22 = arith.negf %21 : vector<64x16xf32>
    %23 = math.exp %22 : vector<64x16xf32>
    %cst_17 = arith.constant 1.000000e+00 : f32
    %24 = vector.broadcast %cst_17 : f32 to vector<64x16xf32>
    %25 = arith.addf %24, %23 : vector<64x16xf32>
    %26 = arith.divf %24, %25 : vector<64x16xf32>
    %c0_i32 = arith.constant 0 : i32
    %c2_i32 = arith.constant 2 : i32
    %27 = arith.addi %c0_i32, %c2_i32 : i32
    %c1_i32 = arith.constant 1 : i32
    scf.for %arg10 = %c0_i32 to %27 step %c1_i32  : i32 {
      %c128_i32 = arith.constant 128 : i32
      %51 = arith.muli %arg10, %c128_i32 : i32
      %52 = tpu.assume_multiple %51, 128 : i32
      %c0_32 = arith.constant 0 : index
      %53 = arith.index_cast %52 : i32 to index
      %54 = vector.load %arg7[%c0_32, %53] : memref<16x256xf32, #tpu.memory_space<vmem>>, vector<16x128xf32>
      %cst_33 = arith.constant dense<0.000000e+00> : vector<64x128xf32>
      %55 = tpu.matmul %19, %54, %cst_33 {dimension_numbers = #tpu.dot_dimension_numbers<[1], [0], [0], [1], [0, 0, 1, 1], [], []>} : vector<64x16xf32>, vector<16x128xf32>, vector<64x128xf32> -> vector<64x128xf32>
      %c0_34 = arith.constant 0 : index
      %56 = arith.index_cast %52 : i32 to index
      %57 = vector.load %arg8[%c0_34, %56] : memref<16x256xf32, #tpu.memory_space<vmem>>, vector<16x128xf32>
      %cst_35 = arith.constant dense<0.000000e+00> : vector<64x128xf32>
      %58 = tpu.matmul %26, %57, %cst_35 {dimension_numbers = #tpu.dot_dimension_numbers<[1], [0], [0], [1], [0, 0, 1, 1], [], []>} : vector<64x16xf32>, vector<16x128xf32>, vector<64x128xf32> -> vector<64x128xf32>
      %59 = arith.mulf %55, %58 : vector<64x128xf32>
      %c0_36 = arith.constant 0 : index
      %c0_37 = arith.constant 0 : index
      %60 = arith.index_cast %52 : i32 to index
      %61 = vector.load %arg1[%c0_36, %c0_37, %60] : memref<2x64x256xf32, #tpu.memory_space<vmem>>, vector<1x64x128xf32>
      %62 = vector.shape_cast %61 : vector<1x64x128xf32> to vector<64x128xf32>
      %63 = arith.mulf %62, %59 : vector<64x128xf32>
      %c0_38 = arith.constant 0 : index
      %c0_39 = arith.constant 0 : index
      %64 = arith.index_cast %52 : i32 to index
      %65 = vector.load %arg9[%c0_38, %c0_39, %64] : memref<2x64x256xf32, #tpu.memory_space<vmem>>, vector<1x64x128xf32>
      %66 = vector.shape_cast %65 : vector<1x64x128xf32> to vector<64x128xf32>
      %67 = vector.shape_cast %63 : vector<64x128xf32> to vector<1x64x128xf32>
      tpu.vector_store %arg9[%c0_38, %c0_39, %64], %67 {strides = array<i32>} : memref<2x64x256xf32, #tpu.memory_space<vmem>>, vector<1x64x128xf32>,
    }
    %c2_i32_18 = arith.constant 2 : i32
    %c1 = arith.constant 1 : index
    %c0_19 = arith.constant 0 : index
    %c0_20 = arith.constant 0 : index
    %28 = vector.load %arg1[%c1, %c0_19, %c0_20] : memref<2x64x256xf32, #tpu.memory_space<vmem>>, vector<1x64x256xf32>
    %29 = vector.shape_cast %28 : vector<1x64x256xf32> to vector<64x256xf32>
    %cst_21 = arith.constant dense<0.000000e+00> : vector<64x32xf32>
    %30 = tpu.matmul %29, %0, %cst_21 {dimension_numbers = #tpu.dot_dimension_numbers<[1], [0], [0], [1], [0, 0, 1, 1], [], []>} : vector<64x256xf32>, vector<256x32xf32>, vector<64x32xf32> -> vector<64x32xf32>
    %cst_22 = arith.constant dense<0.000000e+00> : vector<4x32xf32>
    %31 = tpu.matmul %1, %30, %cst_22 {dimension_numbers = #tpu.dot_dimension_numbers<[1], [0], [0], [1], [0, 0, 1, 1], [], []>} : vector<4x64xf32>, vector<64x32xf32>, vector<4x32xf32> -> vector<4x32xf32>
    %32 = vector.broadcast %2 : vector<4x1xf32> to vector<4x32xf32>
    %33 = arith.addf %31, %32 : vector<4x32xf32>
    %cst_23 = arith.constant 0.000000e+00 : f32
    %34 = vector.broadcast %cst_23 : f32 to vector<4x32xf32>
    %35 = arith.maximumf %33, %34 : vector<4x32xf32>
    %36 = vector.extract_strided_slice %35 {offsets = [0, 0], sizes = [4, 16], strides = [1, 1]} : vector<4x32xf32> to vector<4x16xf32>
    %cst_24 = arith.constant dense<0.000000e+00> : vector<64x16xf32>
    %37 = tpu.matmul %3, %36, %cst_24 {dimension_numbers = #tpu.dot_dimension_numbers<[1], [0], [0], [1], [0, 0, 1, 1], [], []>} : vector<64x4xf32>, vector<4x16xf32>, vector<64x16xf32> -> vector<64x16xf32>
    %38 = arith.negf %37 : vector<64x16xf32>
    %39 = math.exp %38 : vector<64x16xf32>
    %cst_25 = arith.constant 1.000000e+00 : f32
    %40 = vector.broadcast %cst_25 : f32 to vector<64x16xf32>
    %41 = arith.addf %40, %39 : vector<64x16xf32>
    %42 = arith.divf %40, %41 : vector<64x16xf32>
    %43 = vector.extract_strided_slice %35 {offsets = [0, 16], sizes = [4, 16], strides = [1, 1]} : vector<4x32xf32> to vector<4x16xf32>
    %cst_26 = arith.constant dense<0.000000e+00> : vector<64x16xf32>
    %44 = tpu.matmul %4, %43, %cst_26 {dimension_numbers = #tpu.dot_dimension_numbers<[1], [0], [0], [1], [0, 0, 1, 1], [], []>} : vector<64x4xf32>, vector<4x16xf32>, vector<64x16xf32> -> vector<64x16xf32>
    %45 = arith.negf %44 : vector<64x16xf32>
    %46 = math.exp %45 : vector<64x16xf32>
    %cst_27 = arith.constant 1.000000e+00 : f32
    %47 = vector.broadcast %cst_27 : f32 to vector<64x16xf32>
    %48 = arith.addf %47, %46 : vector<64x16xf32>
    %49 = arith.divf %47, %48 : vector<64x16xf32>
    %c0_i32_28 = arith.constant 0 : i32
    %c2_i32_29 = arith.constant 2 : i32
    %50 = arith.addi %c0_i32_28, %c2_i32_29 : i32
    %c1_i32_30 = arith.constant 1 : i32
    scf.for %arg10 = %c0_i32_28 to %50 step %c1_i32_30  : i32 {
      %c128_i32 = arith.constant 128 : i32
      %51 = arith.muli %arg10, %c128_i32 : i32
      %52 = tpu.assume_multiple %51, 128 : i32
      %c0_32 = arith.constant 0 : index
      %53 = arith.index_cast %52 : i32 to index
      %54 = vector.load %arg7[%c0_32, %53] : memref<16x256xf32, #tpu.memory_space<vmem>>, vector<16x128xf32>
      %cst_33 = arith.constant dense<0.000000e+00> : vector<64x128xf32>
      %55 = tpu.matmul %42, %54, %cst_33 {dimension_numbers = #tpu.dot_dimension_numbers<[1], [0], [0], [1], [0, 0, 1, 1], [], []>} : vector<64x16xf32>, vector<16x128xf32>, vector<64x128xf32> -> vector<64x128xf32>
      %c0_34 = arith.constant 0 : index
      %56 = arith.index_cast %52 : i32 to index
      %57 = vector.load %arg8[%c0_34, %56] : memref<16x256xf32, #tpu.memory_space<vmem>>, vector<16x128xf32>
      %cst_35 = arith.constant dense<0.000000e+00> : vector<64x128xf32>
      %58 = tpu.matmul %49, %57, %cst_35 {dimension_numbers = #tpu.dot_dimension_numbers<[1], [0], [0], [1], [0, 0, 1, 1], [], []>} : vector<64x16xf32>, vector<16x128xf32>, vector<64x128xf32> -> vector<64x128xf32>
      %59 = arith.mulf %55, %58 : vector<64x128xf32>
      %c1_36 = arith.constant 1 : index
      %c0_37 = arith.constant 0 : index
      %60 = arith.index_cast %52 : i32 to index
      %61 = vector.load %arg1[%c1_36, %c0_37, %60] : memref<2x64x256xf32, #tpu.memory_space<vmem>>, vector<1x64x128xf32>
      %62 = vector.shape_cast %61 : vector<1x64x128xf32> to vector<64x128xf32>
      %63 = arith.mulf %62, %59 : vector<64x128xf32>
      %c1_38 = arith.constant 1 : index
      %c0_39 = arith.constant 0 : index
      %64 = arith.index_cast %52 : i32 to index
      %65 = vector.load %arg9[%c1_38, %c0_39, %64] : memref<2x64x256xf32, #tpu.memory_space<vmem>>, vector<1x64x128xf32>
      %66 = vector.shape_cast %65 : vector<1x64x128xf32> to vector<64x128xf32>
      %67 = vector.shape_cast %63 : vector<64x128xf32> to vector<1x64x128xf32>
      tpu.vector_store %arg9[%c1_38, %c0_39, %64], %67 {strides = array<i32>} : memref<2x64x256xf32, #tpu.memory_space<vmem>>, vector<1x64x128xf32>,
    }
    %c2_i32_31 = arith.constant 2 : i32
    return
  }
  func.func @transform_0(%arg0: i32) -> (i32, i32, i32) {
    %c0_i32 = arith.constant 0 : i32
    %c0_i32_0 = arith.constant 0 : i32
    %c0_i32_1 = arith.constant 0 : i32
    return %arg0, %c0_i32, %c0_i32_0 : i32, i32, i32
  }
  func.func @transform_1(%arg0: i32) -> (i32, i32) {
    %c0_i32 = arith.constant 0 : i32
    %c0_i32_0 = arith.constant 0 : i32
    %c0_i32_1 = arith.constant 0 : i32
    return %c0_i32, %c0_i32_0 : i32, i32
  }
  func.func @transform_2(%arg0: i32) -> (i32, i32) {
    %c0_i32 = arith.constant 0 : i32
    %c0_i32_0 = arith.constant 0 : i32
    %c0_i32_1 = arith.constant 0 : i32
    return %c0_i32, %c0_i32_0 : i32, i32
  }
  func.func @transform_3(%arg0: i32) -> (i32, i32) {
    %c0_i32 = arith.constant 0 : i32
    %c0_i32_0 = arith.constant 0 : i32
    %c0_i32_1 = arith.constant 0 : i32
    return %c0_i32, %c0_i32_0 : i32, i32
  }
  func.func @transform_4(%arg0: i32) -> (i32, i32) {
    %c0_i32 = arith.constant 0 : i32
    %c0_i32_0 = arith.constant 0 : i32
    %c0_i32_1 = arith.constant 0 : i32
    return %c0_i32, %c0_i32_0 : i32, i32
  }
  func.func @transform_5(%arg0: i32) -> (i32, i32) {
    %c0_i32 = arith.constant 0 : i32
    %c0_i32_0 = arith.constant 0 : i32
    %c0_i32_1 = arith.constant 0 : i32
    return %c0_i32, %c0_i32_0 : i32, i32
  }
  func.func @transform_6(%arg0: i32) -> (i32, i32) {
    %c0_i32 = arith.constant 0 : i32
    %c0_i32_0 = arith.constant 0 : i32
    %c0_i32_1 = arith.constant 0 : i32
    return %c0_i32, %c0_i32_0 : i32, i32
  }
  func.func @transform_7(%arg0: i32) -> (i32, i32) {
    %c0_i32 = arith.constant 0 : i32
    %c0_i32_0 = arith.constant 0 : i32
    %c0_i32_1 = arith.constant 0 : i32
    return %c0_i32, %c0_i32_0 : i32, i32
  }
  func.func @transform_8(%arg0: i32) -> (i32, i32, i32) {
    %c0_i32 = arith.constant 0 : i32
    %c0_i32_0 = arith.constant 0 : i32
    %c0_i32_1 = arith.constant 0 : i32
    return %arg0, %c0_i32, %c0_i32_0 : i32, i32, i32
  }
}

module attributes {stable_mosaic.version = 11 : i64} {
  func.func @kernel(%arg0: i32, %arg1: memref<2x64x256xf32, #tpu.memory_space<vmem>>, %arg2: memref<256x32xf32, #tpu.memory_space<vmem>>, %arg3: memref<4x64xf32, #tpu.memory_space<vmem>>, %arg4: memref<4x1xf32, #tpu.memory_space<vmem>>, %arg5: memref<64x4xf32, #tpu.memory_space<vmem>>, %arg6: memref<64x4xf32, #tpu.memory_space<vmem>>, %arg7: memref<16x256xf32, #tpu.memory_space<vmem>>, %arg8: memref<16x256xf32, #tpu.memory_space<vmem>>, %arg9: memref<2x64x256xf32, #tpu.memory_space<vmem>>) attributes {dimension_semantics = [#tpu.dimension_semantics<parallel>], iteration_bounds = array<i64: 1>, scalar_prefetch = 0 : i64, scratch_operands = 0 : i64, tpu.core_type = #tpu.core_type<tc>, window_params = [{transform_indices = @transform_0, window_bounds = array<i64: 2, 64, 256>}, {pipeline_mode = #tpu.pipeline_mode<synchronous>, transform_indices = @transform_1, window_bounds = array<i64: 256, 32>}, {pipeline_mode = #tpu.pipeline_mode<synchronous>, transform_indices = @transform_2, window_bounds = array<i64: 4, 64>}, {pipeline_mode = #tpu.pipeline_mode<synchronous>, transform_indices = @transform_3, window_bounds = array<i64: 4, 1>}, {pipeline_mode = #tpu.pipeline_mode<synchronous>, transform_indices = @transform_4, window_bounds = array<i64: 64, 4>}, {pipeline_mode = #tpu.pipeline_mode<synchronous>, transform_indices = @transform_5, window_bounds = array<i64: 64, 4>}, {pipeline_mode = #tpu.pipeline_mode<synchronous>, transform_indices = @transform_6, window_bounds = array<i64: 16, 256>}, {pipeline_mode = #tpu.pipeline_mode<synchronous>, transform_indices = @transform_7, window_bounds = array<i64: 16, 256>}, {transform_indices = @transform_8, window_bounds = array<i64: 2, 64, 256>}]} {
    %c0 = arith.constant 0 : index
    %c0_0 = arith.constant 0 : index
    %0 = vector.load %arg2[%c0, %c0_0] : memref<256x32xf32, #tpu.memory_space<vmem>>, vector<256x32xf32>
    %c0_1 = arith.constant 0 : index
    %c0_2 = arith.constant 0 : index
    %1 = vector.load %arg3[%c0_1, %c0_2] : memref<4x64xf32, #tpu.memory_space<vmem>>, vector<4x64xf32>
    %c0_3 = arith.constant 0 : index
    %c0_4 = arith.constant 0 : index
    %2 = vector.load %arg4[%c0_3, %c0_4] : memref<4x1xf32, #tpu.memory_space<vmem>>, vector<4x1xf32>
    %c0_5 = arith.constant 0 : index
    %c0_6 = arith.constant 0 : index
    %3 = vector.load %arg5[%c0_5, %c0_6] : memref<64x4xf32, #tpu.memory_space<vmem>>, vector<64x4xf32>
    %c0_7 = arith.constant 0 : index
    %c0_8 = arith.constant 0 : index
    %4 = vector.load %arg6[%c0_7, %c0_8] : memref<64x4xf32, #tpu.memory_space<vmem>>, vector<64x4xf32>
    %c0_9 = arith.constant 0 : index
    %c0_10 = arith.constant 0 : index
    %c0_11 = arith.constant 0 : index
    %5 = vector.load %arg1[%c0_9, %c0_10, %c0_11] : memref<2x64x256xf32, #tpu.memory_space<vmem>>, vector<1x64x256xf32>
    %6 = vector.shape_cast %5 : vector<1x64x256xf32> to vector<64x256xf32>
    %cst = arith.constant dense<0.000000e+00> : vector<64x32xf32>
    %7 = tpu.matmul %6, %0, %cst {dimension_numbers = #tpu.dot_dimension_numbers<[1], [0], [0], [1], [0, 0, 1, 1], [], []>} : vector<64x256xf32>, vector<256x32xf32>, vector<64x32xf32> -> vector<64x32xf32>
    %cst_12 = arith.constant dense<0.000000e+00> : vector<4x32xf32>
    %8 = tpu.matmul %1, %7, %cst_12 {dimension_numbers = #tpu.dot_dimension_numbers<[1], [0], [0], [1], [0, 0, 1, 1], [], []>} : vector<4x64xf32>, vector<64x32xf32>, vector<4x32xf32> -> vector<4x32xf32>
    %9 = vector.broadcast %2 : vector<4x1xf32> to vector<4x32xf32>
    %10 = arith.addf %8, %9 : vector<4x32xf32>
    %cst_13 = arith.constant 0.000000e+00 : f32
    %11 = vector.broadcast %cst_13 : f32 to vector<4x32xf32>
    %12 = arith.maximumf %10, %11 : vector<4x32xf32>
    %13 = vector.extract_strided_slice %12 {offsets = [0, 0], sizes = [4, 16], strides = [1, 1]} : vector<4x32xf32> to vector<4x16xf32>
    %cst_14 = arith.constant dense<0.000000e+00> : vector<64x16xf32>
    %14 = tpu.matmul %3, %13, %cst_14 {dimension_numbers = #tpu.dot_dimension_numbers<[1], [0], [0], [1], [0, 0, 1, 1], [], []>} : vector<64x4xf32>, vector<4x16xf32>, vector<64x16xf32> -> vector<64x16xf32>
    %15 = arith.negf %14 : vector<64x16xf32>
    %16 = math.exp %15 : vector<64x16xf32>
    %cst_15 = arith.constant 1.000000e+00 : f32
    %17 = vector.broadcast %cst_15 : f32 to vector<64x16xf32>
    %18 = arith.addf %17, %16 : vector<64x16xf32>
    %19 = arith.divf %17, %18 : vector<64x16xf32>
    %20 = vector.extract_strided_slice %12 {offsets = [0, 16], sizes = [4, 16], strides = [1, 1]} : vector<4x32xf32> to vector<4x16xf32>
    %cst_16 = arith.constant dense<0.000000e+00> : vector<64x16xf32>
    %21 = tpu.matmul %4, %20, %cst_16 {dimension_numbers = #tpu.dot_dimension_numbers<[1], [0], [0], [1], [0, 0, 1, 1], [], []>} : vector<64x4xf32>, vector<4x16xf32>, vector<64x16xf32> -> vector<64x16xf32>
    %22 = arith.negf %21 : vector<64x16xf32>
    %23 = math.exp %22 : vector<64x16xf32>
    %cst_17 = arith.constant 1.000000e+00 : f32
    %24 = vector.broadcast %cst_17 : f32 to vector<64x16xf32>
    %25 = arith.addf %24, %23 : vector<64x16xf32>
    %26 = arith.divf %24, %25 : vector<64x16xf32>
    %c0_i32 = arith.constant 0 : i32
    %c2_i32 = arith.constant 2 : i32
    %27 = arith.addi %c0_i32, %c2_i32 : i32
    %c1_i32 = arith.constant 1 : i32
    scf.for %arg10 = %c0_i32 to %27 step %c1_i32  : i32 {
      %c128_i32 = arith.constant 128 : i32
      %51 = arith.muli %arg10, %c128_i32 : i32
      %52 = tpu.assume_multiple %51, 128 : i32
      %c0_32 = arith.constant 0 : index
      %53 = arith.index_cast %52 : i32 to index
      %54 = vector.load %arg7[%c0_32, %53] : memref<16x256xf32, #tpu.memory_space<vmem>>, vector<16x128xf32>
      %cst_33 = arith.constant dense<0.000000e+00> : vector<64x128xf32>
      %55 = tpu.matmul %19, %54, %cst_33 {dimension_numbers = #tpu.dot_dimension_numbers<[1], [0], [0], [1], [0, 0, 1, 1], [], []>} : vector<64x16xf32>, vector<16x128xf32>, vector<64x128xf32> -> vector<64x128xf32>
      %c0_34 = arith.constant 0 : index
      %56 = arith.index_cast %52 : i32 to index
      %57 = vector.load %arg8[%c0_34, %56] : memref<16x256xf32, #tpu.memory_space<vmem>>, vector<16x128xf32>
      %cst_35 = arith.constant dense<0.000000e+00> : vector<64x128xf32>
      %58 = tpu.matmul %26, %57, %cst_35 {dimension_numbers = #tpu.dot_dimension_numbers<[1], [0], [0], [1], [0, 0, 1, 1], [], []>} : vector<64x16xf32>, vector<16x128xf32>, vector<64x128xf32> -> vector<64x128xf32>
      %59 = arith.mulf %55, %58 : vector<64x128xf32>
      %c0_36 = arith.constant 0 : index
      %c0_37 = arith.constant 0 : index
      %60 = arith.index_cast %52 : i32 to index
      %61 = vector.load %arg1[%c0_36, %c0_37, %60] : memref<2x64x256xf32, #tpu.memory_space<vmem>>, vector<1x64x128xf32>
      %62 = vector.shape_cast %61 : vector<1x64x128xf32> to vector<64x128xf32>
      %63 = arith.mulf %62, %59 : vector<64x128xf32>
      %c0_38 = arith.constant 0 : index
      %c0_39 = arith.constant 0 : index
      %64 = arith.index_cast %52 : i32 to index
      %65 = vector.load %arg9[%c0_38, %c0_39, %64] : memref<2x64x256xf32, #tpu.memory_space<vmem>>, vector<1x64x128xf32>
      %66 = vector.shape_cast %65 : vector<1x64x128xf32> to vector<64x128xf32>
      %67 = vector.shape_cast %63 : vector<64x128xf32> to vector<1x64x128xf32>
      tpu.vector_store %arg9[%c0_38, %c0_39, %64], %67 {strides = array<i32>} : memref<2x64x256xf32, #tpu.memory_space<vmem>>, vector<1x64x128xf32>,
    }
    %c2_i32_18 = arith.constant 2 : i32
    %c1 = arith.constant 1 : index
    %c0_19 = arith.constant 0 : index
    %c0_20 = arith.constant 0 : index
    %28 = vector.load %arg1[%c1, %c0_19, %c0_20] : memref<2x64x256xf32, #tpu.memory_space<vmem>>, vector<1x64x256xf32>
    %29 = vector.shape_cast %28 : vector<1x64x256xf32> to vector<64x256xf32>
    %cst_21 = arith.constant dense<0.000000e+00> : vector<64x32xf32>
    %30 = tpu.matmul %29, %0, %cst_21 {dimension_numbers = #tpu.dot_dimension_numbers<[1], [0], [0], [1], [0, 0, 1, 1], [], []>} : vector<64x256xf32>, vector<256x32xf32>, vector<64x32xf32> -> vector<64x32xf32>
    %cst_22 = arith.constant dense<0.000000e+00> : vector<4x32xf32>
    %31 = tpu.matmul %1, %30, %cst_22 {dimension_numbers = #tpu.dot_dimension_numbers<[1], [0], [0], [1], [0, 0, 1, 1], [], []>} : vector<4x64xf32>, vector<64x32xf32>, vector<4x32xf32> -> vector<4x32xf32>
    %32 = vector.broadcast %2 : vector<4x1xf32> to vector<4x32xf32>
    %33 = arith.addf %31, %32 : vector<4x32xf32>
    %cst_23 = arith.constant 0.000000e+00 : f32
    %34 = vector.broadcast %cst_23 : f32 to vector<4x32xf32>
    %35 = arith.maximumf %33, %34 : vector<4x32xf32>
    %36 = vector.extract_strided_slice %35 {offsets = [0, 0], sizes = [4, 16], strides = [1, 1]} : vector<4x32xf32> to vector<4x16xf32>
    %cst_24 = arith.constant dense<0.000000e+00> : vector<64x16xf32>
    %37 = tpu.matmul %3, %36, %cst_24 {dimension_numbers = #tpu.dot_dimension_numbers<[1], [0], [0], [1], [0, 0, 1, 1], [], []>} : vector<64x4xf32>, vector<4x16xf32>, vector<64x16xf32> -> vector<64x16xf32>
    %38 = arith.negf %37 : vector<64x16xf32>
    %39 = math.exp %38 : vector<64x16xf32>
    %cst_25 = arith.constant 1.000000e+00 : f32
    %40 = vector.broadcast %cst_25 : f32 to vector<64x16xf32>
    %41 = arith.addf %40, %39 : vector<64x16xf32>
    %42 = arith.divf %40, %41 : vector<64x16xf32>
    %43 = vector.extract_strided_slice %35 {offsets = [0, 16], sizes = [4, 16], strides = [1, 1]} : vector<4x32xf32> to vector<4x16xf32>
    %cst_26 = arith.constant dense<0.000000e+00> : vector<64x16xf32>
    %44 = tpu.matmul %4, %43, %cst_26 {dimension_numbers = #tpu.dot_dimension_numbers<[1], [0], [0], [1], [0, 0, 1, 1], [], []>} : vector<64x4xf32>, vector<4x16xf32>, vector<64x16xf32> -> vector<64x16xf32>
    %45 = arith.negf %44 : vector<64x16xf32>
    %46 = math.exp %45 : vector<64x16xf32>
    %cst_27 = arith.constant 1.000000e+00 : f32
    %47 = vector.broadcast %cst_27 : f32 to vector<64x16xf32>
    %48 = arith.addf %47, %46 : vector<64x16xf32>
    %49 = arith.divf %47, %48 : vector<64x16xf32>
    %c0_i32_28 = arith.constant 0 : i32
    %c2_i32_29 = arith.constant 2 : i32
    %50 = arith.addi %c0_i32_28, %c2_i32_29 : i32
    %c1_i32_30 = arith.constant 1 : i32
    scf.for %arg10 = %c0_i32_28 to %50 step %c1_i32_30  : i32 {
      %c128_i32 = arith.constant 128 : i32
      %51 = arith.muli %arg10, %c128_i32 : i32
      %52 = tpu.assume_multiple %51, 128 : i32
      %c0_32 = arith.constant 0 : index
      %53 = arith.index_cast %52 : i32 to index
      %54 = vector.load %arg7[%c0_32, %53] : memref<16x256xf32, #tpu.memory_space<vmem>>, vector<16x128xf32>
      %cst_33 = arith.constant dense<0.000000e+00> : vector<64x128xf32>
      %55 = tpu.matmul %42, %54, %cst_33 {dimension_numbers = #tpu.dot_dimension_numbers<[1], [0], [0], [1], [0, 0, 1, 1], [], []>} : vector<64x16xf32>, vector<16x128xf32>, vector<64x128xf32> -> vector<64x128xf32>
      %c0_34 = arith.constant 0 : index
      %56 = arith.index_cast %52 : i32 to index
      %57 = vector.load %arg8[%c0_34, %56] : memref<16x256xf32, #tpu.memory_space<vmem>>, vector<16x128xf32>
      %cst_35 = arith.constant dense<0.000000e+00> : vector<64x128xf32>
      %58 = tpu.matmul %49, %57, %cst_35 {dimension_numbers = #tpu.dot_dimension_numbers<[1], [0], [0], [1], [0, 0, 1, 1], [], []>} : vector<64x16xf32>, vector<16x128xf32>, vector<64x128xf32> -> vector<64x128xf32>
      %59 = arith.mulf %55, %58 : vector<64x128xf32>
      %c1_36 = arith.constant 1 : index
      %c0_37 = arith.constant 0 : index
      %60 = arith.index_cast %52 : i32 to index
      %61 = vector.load %arg1[%c1_36, %c0_37, %60] : memref<2x64x256xf32, #tpu.memory_space<vmem>>, vector<1x64x128xf32>
      %62 = vector.shape_cast %61 : vector<1x64x128xf32> to vector<64x128xf32>
      %63 = arith.mulf %62, %59 : vector<64x128xf32>
      %c1_38 = arith.constant 1 : index
      %c0_39 = arith.constant 0 : index
      %64 = arith.index_cast %52 : i32 to index
      %65 = vector.load %arg9[%c1_38, %c0_39, %64] : memref<2x64x256xf32, #tpu.memory_space<vmem>>, vector<1x64x128xf32>
      %66 = vector.shape_cast %65 : vector<1x64x128xf32> to vector<64x128xf32>
      %67 = vector.shape_cast %63 : vector<64x128xf32> to vector<1x64x128xf32>
      tpu.vector_store %arg9[%c1_38, %c0_39, %64], %67 {strides = array<i32>} : memref<2x64x256xf32, #tpu.memory_space<vmem>>, vector<1x64x128xf32>,
    }
    %c2_i32_31 = arith.constant 2 : i32
    return
  }
  func.func @transform_0(%arg0: i32) -> (i32, i32, i32) {
    %c0_i32 = arith.constant 0 : i32
    %c0_i32_0 = arith.constant 0 : i32
    %c0_i32_1 = arith.constant 0 : i32
    return %arg0, %c0_i32, %c0_i32_0 : i32, i32, i32
  }
  func.func @transform_1(%arg0: i32) -> (i32, i32) {
    %c0_i32 = arith.constant 0 : i32
    %c0_i32_0 = arith.constant 0 : i32
    %c0_i32_1 = arith.constant 0 : i32
    return %c0_i32, %c0_i32_0 : i32, i32
  }
  func.func @transform_2(%arg0: i32) -> (i32, i32) {
    %c0_i32 = arith.constant 0 : i32
    %c0_i32_0 = arith.constant 0 : i32
    %c0_i32_1 = arith.constant 0 : i32
    return %c0_i32, %c0_i32_0 : i32, i32
  }
  func.func @transform_3(%arg0: i32) -> (i32, i32) {
    %c0_i32 = arith.constant 0 : i32
    %c0_i32_0 = arith.constant 0 : i32
    %c0_i32_1 = arith.constant 0 : i32
    return %c0_i32, %c0_i32_0 : i32, i32
  }
  func.func @transform_4(%arg0: i32) -> (i32, i32) {
    %c0_i32 = arith.constant 0 : i32
    %c0_i32_0 = arith.constant 0 : i32
    %c0_i32_1 = arith.constant 0 : i32
    return %c0_i32, %c0_i32_0 : i32, i32
  }
  func.func @transform_5(%arg0: i32) -> (i32, i32) {
    %c0_i32 = arith.constant 0 : i32
    %c0_i32_0 = arith.constant 0 : i32
    %c0_i32_1 = arith.constant 0 : i32
    return %c0_i32, %c0_i32_0 : i32, i32
  }
  func.func @transform_6(%arg0: i32) -> (i32, i32) {
    %c0_i32 = arith.constant 0 : i32
    %c0_i32_0 = arith.constant 0 : i32
    %c0_i32_1 = arith.constant 0 : i32
    return %c0_i32, %c0_i32_0 : i32, i32
  }
  func.func @transform_7(%arg0: i32) -> (i32, i32) {
    %c0_i32 = arith.constant 0 : i32
    %c0_i32_0 = arith.constant 0 : i32
    %c0_i32_1 = arith.constant 0 : i32
    return %c0_i32, %c0_i32_0 : i32, i32
  }
  func.func @transform_8(%arg0: i32) -> (i32, i32, i32) {
    %c0_i32 = arith.constant 0 : i32
    %c0_i32_0 = arith.constant 0 : i32
    %c0_i32_1 = arith.constant 0 : i32
    return %arg0, %c0_i32, %c0_i32_0 : i32, i32, i32
  }
}

</mosaic_0001>

<bundles_post_ra>
// kernel: tpu_custom_call.1
= control target key start
LH: loop header
LB: loop body
LE: loop exit
PB: predicated region body
PF: predicated region fallthrough
CT: control target
= control target key end

     0   :  { %13 = vsyncpa [#allocation3], 0  ;;  %v1923_v62 = vmov 0   ;;  %vm183_vm0 = vcmask 523264   ;;  %vm233_vm1 = vcmask 1043456   ;;  %vm208_vm2 = vcmask 31744   ;;  %s2776_s0 = inlined_call_operand.vmem [shape: f32[2,64,256], index: 0, kind: input, shape index: {}]   ;;  %s2777_s1 = inlined_call_operand.vmem [shape: f32[256,32], index: 1, kind: input, shape index: {}]   ;;  %s2778_s2 = inlined_call_operand.vmem [shape: f32[4,64], index: 2, kind: input, shape index: {}]   ;;  %s2779_s3 = inlined_call_operand.vmem [shape: f32[4,1], index: 3, kind: input, shape index: {}]   ;;  %s2780_s4 = inlined_call_operand.vmem [shape: f32[64,4], index: 4, kind: input, shape index: {}]   ;;  %s2781_s5 = inlined_call_operand.vmem [shape: f32[64,4], index: 5, kind: input, shape index: {}]   ;;  %s2782_s6 = inlined_call_operand.vmem [shape: f32[16,256], index: 6, kind: input, shape index: {}]   ;;  %s2783_s7 = inlined_call_operand.vmem [shape: f32[16,256], index: 7, kind: input, shape index: {}]   ;;  %s2784_s8 = inlined_call_operand.hbm [shape: f32[2,64,256], index: 8, kind: output, shape index: {}]  }
   0x1   :  { %v1976_v0 = vld [vmem:[%s2777_s1 + $0x78] sm:$0xff]  ;;  %v1988_v2 = vld [vmem:[%s2777_s1 + $0x70] sm:$0xff]  ;;  %v1998_v4 = vld [vmem:[%s2777_s1 + $0x68] sm:$0xff]  ;;  %1752 = vset.pattern.permute.xlu0 %v1923_v62 }
   0x2   :  { %v1981_v1 = vld [vmem:[%s2777_s1 + $0xf8] sm:$0xff]  ;;  %96 = vmatpush.msra.mxu0 %v1976_v0  ;;  %v1993_v3 = vld [vmem:[%s2777_s1 + $0xf0] sm:$0xff]  ;;  %v2003_v5 = vld [vmem:[%s2777_s1 + $0xe8] sm:$0xff] }
   0x3   :  { %137 = vmatpush.msra.mxu1 %v1981_v1  ;;  %v2010_v6 = vld [vmem:[%s2777_s1 + $0x60] sm:$0xff]  ;;  %v2022_v8 = vld [vmem:[%s2777_s1 + $0x58] sm:$0xff]  ;;  %v2034_v10 = vld [vmem:[%s2777_s1 + $0x50] sm:$0xff] }
   0x4   :  { %97 = vmatpush.msra.mxu0 %v1988_v2  ;;  %v2015_v7 = vld [vmem:[%s2777_s1 + $0xe0] sm:$0xff]  ;;  %v2027_v9 = vld [vmem:[%s2777_s1 + $0xd8] sm:$0xff]  ;;  %v2039_v11 = vld [vmem:[%s2777_s1 + $0xd0] sm:$0xff] }
   0x5   :  { %138 = vmatpush.msra.mxu1 %v1993_v3  ;;  %v2046_v12 = vld [vmem:[%s2777_s1 + $0x48] sm:$0xff]  ;;  %v2058_v14 = vld [vmem:[%s2777_s1 + $0x40] sm:$0xff]  ;;  %v2070_v16 = vld [vmem:[%s2777_s1 + $0x38] sm:$0xff] }
   0x6   :  { %98 = vmatpush.msra.mxu0 %v1998_v4  ;;  %v2051_v13 = vld [vmem:[%s2777_s1 + $0xc8] sm:$0xff]  ;;  %v2063_v15 = vld [vmem:[%s2777_s1 + $0xc0] sm:$0xff]  ;;  %v2075_v17 = vld [vmem:[%s2777_s1 + $0xb8] sm:$0xff] }
   0x7   :  { %139 = vmatpush.msra.mxu1 %v2003_v5  ;;  %v2082_v18 = vld [vmem:[%s2777_s1 + $0x30] sm:$0xff]  ;;  %v2094_v20 = vld [vmem:[%s2777_s1 + $0x28] sm:$0xff]  ;;  %v2106_v22 = vld [vmem:[%s2777_s1 + $0x20] sm:$0xff] }
   0x8   :  { %99 = vmatpush.msra.mxu0 %v2010_v6  ;;  %v2087_v19 = vld [vmem:[%s2777_s1 + $0xb0] sm:$0xff]  ;;  %v2099_v21 = vld [vmem:[%s2777_s1 + $0xa8] sm:$0xff]  ;;  %v2111_v23 = vld [vmem:[%s2777_s1 + $0xa0] sm:$0xff] }
   0x9   :  { %140 = vmatpush.msra.mxu1 %v2015_v7  ;;  %v2118_v24 = vld [vmem:[%s2777_s1 + $0x18] sm:$0xff]  ;;  %v2130_v26 = vld [vmem:[%s2777_s1 + $0x10] sm:$0xff]  ;;  %v2142_v28 = vld [vmem:[%s2777_s1 + $0x8] sm:$0xff] }
   0xa   :  { %100 = vmatpush.msra.mxu0 %v2022_v8  ;;  %v2123_v25 = vld [vmem:[%s2777_s1 + $0x98] sm:$0xff]  ;;  %v2135_v27 = vld [vmem:[%s2777_s1 + $0x90] sm:$0xff]  ;;  %v2147_v29 = vld [vmem:[%s2777_s1 + $0x88] sm:$0xff] }
   0xb   :  { %141 = vmatpush.msra.mxu1 %v2027_v9  ;;  %v2154_v30 = vld [vmem:[%s2777_s1] sm:$0xff]  ;;  %v81_v33 = vld [vmem:[%s2776_s0 + $0x8] sm:$0xff]  ;;  %v82_v34 = vld [vmem:[%s2776_s0 + $0x10] sm:$0xff] }
   0xc   :  { %101 = vmatpush.msra.mxu0 %v2034_v10  ;;  %v2159_v31 = vld [vmem:[%s2777_s1 + $0x80] sm:$0xff]  ;;  %v83_v35 = vld [vmem:[%s2776_s0 + $0x18] sm:$0xff]  ;;  %v85_v37 = vld [vmem:[%s2776_s0 + $0x28] sm:$0xff] }
   0xd   :  { %142 = vmatpush.msra.mxu1 %v2039_v11  ;;  %2804 = vst [vmem:[#allocation5_spill] sm:$0xff] %v2159_v31  ;;  %v80_v32 = vld [vmem:[%s2776_s0] sm:$0xff]  ;;  %v86_v38 = vld [vmem:[%s2776_s0 + $0x30] sm:$0xff]  ;;  %v87_v39 = vld [vmem:[%s2776_s0 + $0x38] sm:$0xff] }
   0xe   :  { %102 = vmatpush.msra.mxu0 %v2046_v12  ;;  %v84_v36 = vld [vmem:[%s2776_s0 + $0x20] sm:$0xff]  ;;  %v89_v41 = vld [vmem:[%s2776_s0 + $0x48] sm:$0xff]  ;;  %v90_v42 = vld [vmem:[%s2776_s0 + $0x50] sm:$0xff] }
   0xf   :  { %143 = vmatpush.msra.mxu1 %v2051_v13  ;;  %v88_v40 = vld [vmem:[%s2776_s0 + $0x40] sm:$0xff]  ;;  %v91_v43 = vld [vmem:[%s2776_s0 + $0x58] sm:$0xff]  ;;  %v93_v45 = vld [vmem:[%s2776_s0 + $0x68] sm:$0xff] }
  0x10   :  { %103 = vmatpush.msra.mxu0 %v2058_v14  ;;  %v92_v44 = vld [vmem:[%s2776_s0 + $0x60] sm:$0xff]  ;;  %v94_v46 = vld [vmem:[%s2776_s0 + $0x70] sm:$0xff]  ;;  %v95_v47 = vld [vmem:[%s2776_s0 + $0x78] sm:$0xff] }
  0x11   :  { %144 = vmatpush.msra.mxu1 %v2063_v15  ;;  %v63_v61 = vld [vmem:[%s2779_s3] sm:$0xf] }
  0x12   :  { %104 = vmatpush.msra.mxu0 %v2070_v16  ;;  %180 = vperm.xlu0 %1752, %v63_v61   ;;  %v2316_v62 = vld [vmem:[%s2781_s5 + $0x20] sm:$0xff] }
  0x13   :  { %145 = vmatpush.msra.mxu1 %v2075_v17  ;;  %2819 = vst [vmem:[#allocation20_spill] sm:$0xff] %v2316_v62 }
  0x14   :  { %105 = vmatpush.msra.mxu0 %v2082_v18 }
  0x15   :  { %146 = vmatpush.msra.mxu1 %v2087_v19 }
  0x16   :  { %106 = vmatpush.msra.mxu0 %v2094_v20 }
  0x17   :  { %147 = vmatpush.msra.mxu1 %v2099_v21 }
  0x18   :  { %107 = vmatpush.msra.mxu0 %v2106_v22 }
  0x19   :  { %148 = vmatpush.msra.mxu1 %v2111_v23 }
  0x1a   :  { %108 = vmatpush.msra.mxu0 %v2118_v24 }
  0x1b   :  { %149 = vmatpush.msra.mxu1 %v2123_v25 }
  0x1c   :  { %109 = vmatpush.msra.mxu0 %v2130_v26 }
  0x1d   :  { %150 = vmatpush.msra.mxu1 %v2135_v27 }
  0x1e   :  { %110 = vmatpush.msra.mxu0 %v2142_v28 }
  0x1f   :  { %151 = vmatpush.msra.mxu1 %v2147_v29 }
  0x20   :  { %111 = vmatpush.msra.mxu0 %v2154_v30 }
  0x21   :  { %152 = vmatpush.msra.mxu1 %v2159_v31  ;;  %112 = vmatmul.f32.vlgmr.msra.gmra.mxu0 %v80_v32 }
  0x22   :  { %153 = vmatmul.f32.vlgmr.msra.gmra.mxu1 %v81_v33 }
  0x29   :  { %115 = vmatmul.f32.gmra.mxu0 %v82_v34 }
  0x2a   :  { %156 = vmatmul.f32.gmra.mxu1 %v83_v35 }
  0x31   :  { %118 = vmatmul.f32.gmra.mxu0 %v84_v36 }
  0x32   :  { %159 = vmatmul.f32.gmra.mxu1 %v85_v37 }
  0x39   :  { %121 = vmatmul.f32.gmra.mxu0 %v86_v38 }
  0x3a   :  { %162 = vmatmul.f32.gmra.mxu1 %v87_v39 }
  0x41   :  { %124 = vmatmul.f32.gmra.mxu0 %v88_v40 }
  0x42   :  { %165 = vmatmul.f32.gmra.mxu1 %v89_v41 }
  0x49   :  { %127 = vmatmul.f32.gmra.mxu0 %v90_v42  ;;  %v2219_v42 = vld [vmem:[%s2778_s2] sm:$0xf]  ;;  %s1924_s2 = smov 112  }
  0x4a   :  { %168 = vmatmul.f32.gmra.mxu1 %v91_v43  ;;  %2805 = vst [vmem:[#allocation6_spill] sm:$0xff] %v2219_v42 }
  0x51   :  { %130 = vmatmul.f32.gmra.mxu0 %v92_v44 }
  0x52   :  { %171 = vmatmul.f32.gmra.mxu1 %v93_v45 }
  0x59   :  { %133 = vmatmul.f32.gmra.mxu0 %v94_v46 }
  0x5a   :  { %174 = vmatmul.f32.gmra.mxu1 %v95_v47  ;;  %v2229_v47 = vld [vmem:[%s2780_s4] sm:$0xff] }
  0x5b   :  { %2807 = vst [vmem:[#allocation8_spill] sm:$0xff] %v2229_v47 }
  0x84   :  { %v2223_v43 = vpop.permute.xlu0 %180 }
  0x85   :  { %2806 = vst [vmem:[#allocation7_spill] sm:$0xff] %v2223_v43 }
  0x9e   :  { %v113_v48 = vpop.f32.mrf.mxu0 }
  0x9f   :  { %v154_v49 = vpop.f32.mrf.mxu1 }
  0xa0   :  { %v155_v50 = vadd.f32 %v154_v49, %v113_v48  ;;  %v2238_v48 = vld [vmem:[%s2780_s4 + $0x8] sm:$0xff]  ;;  %v2245_v49 = vld [vmem:[%s2780_s4 + $0x10] sm:$0xff] }
  0xa1   :  { %2808 = vst [vmem:[#allocation9_spill] sm:$0xff] %v2238_v48 }
  0xa2   :  { %2809 = vst [vmem:[#allocation10_spill] sm:$0xff] %v2245_v49 }
  0xa6   :  { %v116_v51 = vpop.f32.mrf.mxu0 }
  0xa7   :  { %v157_v52 = vpop.f32.mrf.mxu1 }
  0xa8   :  { %v158_v41 = vadd.f32 %v157_v52, %v116_v51  ;;  %v2259_v51 = vld [vmem:[%s2780_s4 + $0x20] sm:$0xff]  ;;  %v2266_v52 = vld [vmem:[%s2780_s4 + $0x28] sm:$0xff] }
  0xa9   :  { %2811 = vst [vmem:[#allocation12_spill] sm:$0xff] %v2259_v51 }
  0xaa   :  { %2812 = vst [vmem:[#allocation13_spill] sm:$0xff] %v2266_v52 }
  0xae   :  { %v119_v53 = vpop.f32.mrf.mxu0 }
  0xaf   :  { %v160_v54 = vpop.f32.mrf.mxu1 }
  0xb0   :  { %v161_v40 = vadd.f32 %v160_v54, %v119_v53  ;;  %v2273_v53 = vld [vmem:[%s2781_s5] sm:$0xff] }
  0xb1   :  { %2813 = vst [vmem:[#allocation14_spill] sm:$0xff] %v2273_v53 }
  0xb6   :  { %v122_v55 = vpop.f32.mrf.mxu0 }
  0xb7   :  { %v163_v56 = vpop.f32.mrf.mxu1 }
  0xb8   :  { %v164_v39 = vadd.f32 %v163_v56, %v122_v55  ;;  %v2281_v55 = vld [vmem:[%s2780_s4 + $0x30] sm:$0xff]  ;;  %v2288_v56 = vld [vmem:[%s2781_s5 + $0x8] sm:$0xff] }
  0xb9   :  { %2814 = vst [vmem:[#allocation15_spill] sm:$0xff] %v2281_v55 }
  0xba   :  { %2815 = vst [vmem:[#allocation16_spill] sm:$0xff] %v2288_v56 }
  0xbe   :  { %v125_v57 = vpop.f32.mrf.mxu0 }
  0xbf   :  { %v166_v58 = vpop.f32.mrf.mxu1 }
  0xc0   :  { %v167_v38 = vadd.f32 %v166_v58, %v125_v57  ;;  %v2295_v57 = vld [vmem:[%s2780_s4 + $0x38] sm:$0xff]  ;;  %v2302_v58 = vld [vmem:[%s2781_s5 + $0x10] sm:$0xff] }
  0xc1   :  { %2816 = vst [vmem:[#allocation17_spill] sm:$0xff] %v2295_v57 }
  0xc2   :  { %2817 = vst [vmem:[#allocation18_spill] sm:$0xff] %v2302_v58 }
  0xc6   :  { %v128_v59 = vpop.f32.mrf.mxu0 }
  0xc7   :  { %v169_v60 = vpop.f32.mrf.mxu1 }
  0xc8   :  { %v170_v37 = vadd.f32 %v169_v60, %v128_v59  ;;  %v2309_v59 = vld [vmem:[%s2781_s5 + $0x18] sm:$0xff] }
  0xc9   :  { %2818 = vst [vmem:[#allocation19_spill] sm:$0xff] %v2309_v59 }
  0xce   :  { %v131_v63 = vpop.f32.mrf.mxu0 }
  0xcf   :  { %v172_v32 = vpop.f32.mrf.mxu1 }
  0xd0   :  { %v173_v36 = vadd.f32 %v172_v32, %v131_v63 }
  0xd6   :  { %v134_v33 = vpop.f32.mrf.mxu0 }
  0xd7   :  { %v175_v34 = vpop.f32.mrf.mxu1 }
  0xd8   :  { %v176_v35 = vadd.f32 %v175_v34, %v134_v33  ;;  %v2323_v33 = vld [vmem:[%s2781_s5 + $0x28] sm:$0xff] }
  0xd9   :  { %2820 = vst [vmem:[#allocation21_spill] sm:$0xff] %v2323_v33 }
  0xda   :  { %195 = vmatpush.msra.mxu2 %v176_v35 }
  0xdc   :  { %196 = vmatpush.msra.mxu2 %v173_v36 }
  0xde   :  { %197 = vmatpush.msra.mxu2 %v170_v37  ;;  %v2330_v37 = vld [vmem:[%s2781_s5 + $0x30] sm:$0xff] }
  0xdf   :  { %2821 = vst [vmem:[#allocation22_spill] sm:$0xff] %v2330_v37 }
  0xe0   :  { %198 = vmatpush.msra.mxu2 %v167_v38 }
  0xe2   :  { %199 = vmatpush.msra.mxu2 %v164_v39 }
  0xe4   :  { %200 = vmatpush.msra.mxu2 %v161_v40 }
  0xe6   :  { %201 = vmatpush.msra.mxu2 %v158_v41 }
  0xe8   :  { %202 = vmatpush.msra.mxu2 %v155_v50  ;;  %v2252_v50 = vld [vmem:[%s2780_s4 + $0x18] sm:$0xff] }
  0xe9   :  { %1579 = vmatmul.msk.f32.vlgmr.msra.gmra.mxu2 %vm183_vm0, %v2219_v42  ;;  %2810 = vst [vmem:[#allocation11_spill] sm:$0xff] %v2252_v50 }
 0x16c   :  { %v204_v44 = vpop.f32.mrf.mxu2 }
 0x16d   :  { %v205_v45 = vadd.f32 %v204_v44, %v2223_v43 }
 0x16f   :  { %v207_v46 = vmax.f32 %v205_v45, 0.0 }
 0x171   :  { %430 = vrot.lane.b32.xlu0 %v207_v46, %s1924_s2  ;;  %1580 = vmatpush.msk.msra.mxu3 %vm233_vm1, %v207_v46 }
 0x172   :  { %1581 = vmatmul.msk.f32.vlgmr.msra.gmra.mxu3 %vm208_vm2, %v2229_v47 }
 0x17a   :  { %1582 = vmatmul.msk.f32.gmra.mxu3 %vm208_vm2, %v2238_v48 }
 0x182   :  { %1583 = vmatmul.msk.f32.gmra.mxu3 %vm208_vm2, %v2245_v49 }
 0x18a   :  { %1584 = vmatmul.msk.f32.gmra.mxu3 %vm208_vm2, %v2252_v50 }
 0x192   :  { %1585 = vmatmul.msk.f32.gmra.mxu3 %vm208_vm2, %v2259_v51 }
 0x19a   :  { %1586 = vmatmul.msk.f32.gmra.mxu3 %vm208_vm2, %v2266_v52 }
 0x1a2   :  { %1587 = vmatmul.msk.f32.gmra.mxu3 %vm208_vm2, %v2281_v55 }
 0x1aa   :  { %1588 = vmatmul.msk.f32.gmra.mxu3 %vm208_vm2, %v2295_v57 }
 0x1e3   :  { %v431_v54 = vpop.permute.xlu0 %430 }
 0x1e4   :  { %1597 = vmatpush.msk.msrb.mxu2 %vm233_vm1, %v431_v54  ;;  %v2339_v54 = vld [vmem:[%s2781_s5 + $0x38] sm:$0xff]  ;;  %s2422_s5 = smov 0  }
 0x1e5   :  { %1598 = vmatmul.msk.f32.vlgmr.msrb.gmra.mxu2 %vm208_vm2, %v2273_v53  ;;  %2822 = vst [vmem:[#allocation23_spill] sm:$0xff] %v2339_v54 }
 0x1ed   :  { %1599 = vmatmul.msk.f32.gmra.mxu2 %vm208_vm2, %v2288_v56 }
 0x1f5   :  { %1600 = vmatmul.msk.f32.gmra.mxu2 %vm208_vm2, %v2302_v58  ;;  %v254_v60 = vpop.f32.mrf.mxu3 }
 0x1f6   :  { %v1589_v61 = vmul.f32 -1.442695, %v254_v60 }
 0x1f8   :  { %1753 = vpow2.f32 %v1589_v61 }
 0x1fd   :  { %1601 = vmatmul.msk.f32.gmra.mxu2 %vm208_vm2, %v2309_v59  ;;  %v257_v60 = vpop.f32.mrf.mxu3 }
 0x1fe   :  { %v1754_v63 = vpop.eup %1753  ;;  %v1590_v61 = vmul.f32 -1.442695, %v257_v60 }
 0x1ff   :  { %v302_v32 = vadd.f32 1.0, %v1754_v63 }
 0x201   :  { %1755 = vrcp.f32 %v302_v32  ;;  %v321_v36 = vand.u32 2147483648, %v302_v32  ;;  %vm315_vm3 = vweird.f32 %v302_v32  ;;  %v319_v39 = vand.u32 2147483647, %v302_v32 }
 0x202   :  { %1757 = vpow2.f32 %v1590_v61 }
 0x203   :  { %v322_v41 = vor.u32 1.1754944e-38, %v321_v36  ;;  %vm320_vm6 = vcmp.eq.f32.partialorder %v319_v39, 8.507059e+37 }
 0x205   :  { %1602 = vmatmul.msk.f32.gmra.mxu2 %vm208_vm2, %v2316_v62  ;;  %v260_v63 = vpop.f32.mrf.mxu3 }
 0x207   :  { %v1756_v34 = vpop.eup %1755 }
 0x208   :  { %v311_v35 = vmul.f32 %v1756_v34, %v302_v32  ;;  %vm316_vm4 = vweird.f32 %v1756_v34  ;;  %v1758_v32 = vpop.eup %1757 }
 0x209   :  { %vm317_vm5 = vmor %vm315_vm3, %vm316_vm4  ;;  %v303_v36 = vadd.f32 1.0, %v1758_v32 }
 0x20a   :  { %v312_v38 = vsub.f32 1.0, %v311_v35  ;;  %v1591_v35 = vmul.f32 -1.442695, %v260_v63 }
 0x20b   :  { %vm330_vm7 = vweird.f32 %v303_v36  ;;  %v334_v60 = vand.u32 2147483647, %v303_v36 }
 0x20c   :  { %v313_v40 = vmul.f32 %v1756_v34, %v312_v38  ;;  %1759 = vpow2.f32 %v1591_v35 }
 0x20d   :  { %1603 = vmatmul.msk.f32.gmra.mxu2 %vm208_vm2, %v2323_v33  ;;  %1761 = vrcp.f32 %v303_v36  ;;  %v263_v38 = vpop.f32.mrf.mxu3  ;;  %vm335_vm10 = vcmp.eq.f32.partialorder %v334_v60, 8.507059e+37 }
 0x20e   :  { %v314_v44 = vadd.f32 %v1756_v34, %v313_v40 }
 0x210   :  { %v318_v45 = vsel %vm317_vm5, %v1756_v34, %v314_v44 }
 0x211   :  { %v2334_v46 = vsel %vm320_vm6, %v322_v41, %v318_v45  ;;  %v1592_v41 = vmul.f32 -1.442695, %v263_v38 }
 0x212   :  { %v1760_v34 = vpop.eup %1759 }
 0x213   :  { %v1762_v39 = vpop.eup %1761  ;;  %v304_v40 = vadd.f32 1.0, %v1760_v34 }
 0x214   :  { %v326_v44 = vmul.f32 %v1762_v39, %v303_v36  ;;  %vm331_vm8 = vweird.f32 %v1762_v39 }
 0x215   :  { %1604 = vmatmul.msk.f32.gmra.mxu2 %vm208_vm2, %v2330_v37  ;;  %1763 = vrcp.f32 %v304_v40  ;;  %v266_v61 = vpop.f32.mrf.mxu3  ;;  %vm332_vm9 = vmor %vm330_vm7, %vm331_vm8  ;;  %vm345_vm11 = vweird.f32 %v304_v40 }
 0x216   :  { %v327_v45 = vsub.f32 1.0, %v326_v44  ;;  %1765 = vpow2.f32 %v1592_v41  ;;  %v1593_v35 = vmul.f32 -1.442695, %v266_v61 }
 0x218   :  { %v328_v37 = vmul.f32 %v1762_v39, %v327_v45  ;;  %1767 = vpow2.f32 %v1593_v35 }
 0x21a   :  { %v329_v33 = vadd.f32 %v1762_v39, %v328_v37  ;;  %v351_v37 = vand.u32 2147483648, %v304_v40 }
 0x21b   :  { %v1764_v63 = vpop.eup %1763 }
 0x21c   :  { %v1766_v62 = vpop.eup %1765  ;;  %v333_v59 = vsel %vm332_vm9, %v1762_v39, %v329_v33  ;;  %v341_v34 = vmul.f32 %v1764_v63, %v304_v40  ;;  %vm346_vm12 = vweird.f32 %v1764_v63 }
 0x21d   :  { %1605 = vmatmul.msk.f32.gmra.mxu2 %vm208_vm2, %v2339_v54  ;;  %v336_v54 = vand.u32 2147483648, %v303_v36  ;;  %v305_v58 = vadd.f32 1.0, %v1766_v62  ;;  %v349_v36 = vand.u32 2147483647, %v304_v40  ;;  %v269_v56 = vpop.f32.mrf.mxu3  ;;  %vm347_vm13 = vmor %vm345_vm11, %vm346_vm12 }
 0x21e   :  { %v342_v41 = vsub.f32 1.0, %v341_v34  ;;  %v1768_v53 = vpop.eup %1767  ;;  %v1594_v61 = vmul.f32 -1.442695, %v269_v56 }
 0x21f   :  { %v337_v32 = vor.u32 1.1754944e-38, %v336_v54  ;;  %1769 = vrcp.f32 %v305_v58  ;;  %v352_v54 = vor.u32 1.1754944e-38, %v351_v37  ;;  %vm350_vm14 = vcmp.eq.f32.partialorder %v349_v36, 8.507059e+37 }
 0x220   :  { %v343_v44 = vmul.f32 %v1764_v63, %v342_v41  ;;  %v306_v39 = vadd.f32 1.0, %v1768_v53  ;;  %1771 = vpow2.f32 %v1594_v61  ;;  %v366_v40 = vand.u32 2147483648, %v305_v58 }
 0x221   :  { %v2343_v38 = vsel %vm335_vm10, %v337_v32, %v333_v59  ;;  %vm360_vm15 = vweird.f32 %v305_v58  ;;  %v364_v56 = vand.u32 2147483647, %v305_v58 }
 0x222   :  { %v344_v45 = vadd.f32 %v1764_v63, %v343_v44  ;;  %1773 = vrcp.f32 %v306_v39  ;;  %vm375_vm6 = vweird.f32 %v306_v39 }
 0x223   :  { %vm365_vm5 = vcmp.eq.f32.partialorder %v364_v56, 8.507059e+37 }
 0x224   :  { %v348_v33 = vsel %vm347_vm13, %v1764_v63, %v344_v45  ;;  %v367_v45 = vor.u32 1.1754944e-38, %v366_v40 }
 0x225   :  { %v1770_v59 = vpop.eup %1769  ;;  %v2345_v60 = vsel %vm350_vm14, %v352_v54, %v348_v33  ;;  %v272_v44 = vpop.f32.mrf.mxu3 }
 0x226   :  { %v356_v32 = vmul.f32 %v1770_v59, %v305_v58  ;;  %v1772_v57 = vpop.eup %1771  ;;  %vm361_vm3 = vweird.f32 %v1770_v59  ;;  %v1595_v63 = vmul.f32 -1.442695, %v272_v44  ;;  %v379_v44 = vand.u32 2147483647, %v306_v39 }
 0x227   :  { %vm362_vm4 = vmor %vm360_vm15, %vm361_vm3  ;;  %v307_v36 = vadd.f32 1.0, %v1772_v57 }
 0x228   :  { %v357_v34 = vsub.f32 1.0, %v356_v32  ;;  %v1774_v37 = vpop.eup %1773  ;;  %vm380_vm9 = vcmp.eq.f32.partialorder %v379_v44, 8.507059e+37 }
 0x229   :  { %v371_v54 = vmul.f32 %v1774_v37, %v306_v39  ;;  %vm376_vm7 = vweird.f32 %v1774_v37  ;;  %vm390_vm10 = vweird.f32 %v307_v36 }
 0x22a   :  { %v358_v41 = vmul.f32 %v1770_v59, %v357_v34  ;;  %vm2352_vm8 = vmor %vm375_vm6, %vm376_vm7 }
 0x22b   :  { %v372_v34 = vsub.f32 1.0, %v371_v54 }
 0x22c   :  { %v359_v53 = vadd.f32 %v1770_v59, %v358_v41 }
 0x22d   :  { %v373_v58 = vmul.f32 %v1774_v37, %v372_v34  ;;  %v275_v41 = vpop.f32.mrf.mxu3 }
 0x22e   :  { %v363_v33 = vsel %vm362_vm4, %v1770_v59, %v359_v53 }
 0x22f   :  { %v374_v57 = vadd.f32 %v1774_v37, %v373_v58 }
 0x268   :  { %v475_v62 = vpop.f32.mrf.mxu2 }
 0x269   :  { %v1606_v35 = vmul.f32 -1.442695, %v475_v62 }
 0x26b   :  { %1775 = vpow2.f32 %v1606_v35  ;;  %v2347_v35 = vsel %vm365_vm5, %v367_v45, %v363_v33  ;;  %v378_v45 = vsel %vm2352_vm8, %v1774_v37, %v374_v57 }
 0x26c   :  { %1777 = vpow2.f32 %v1595_v63  ;;  %v381_v63 = vand.u32 2147483648, %v306_v39 }
 0x26d   :  { %1779 = vrcp.f32 %v307_v36 }
 0x270   :  { %v478_v61 = vpop.f32.mrf.mxu2 }
 0x271   :  { %v1776_v62 = vpop.eup %1775  ;;  %v1607_v32 = vmul.f32 -1.442695, %v478_v61  ;;  %v1596_v61 = vmul.f32 -1.442695, %v275_v41 }
 0x272   :  { %v2349_v55 = vadd.f32 1.0, %v1776_v62  ;;  %v1778_v40 = vpop.eup %1777  ;;  %v382_v62 = vor.u32 1.1754944e-38, %v381_v63 }
 0x273   :  { %1781 = vpow2.f32 %v1607_v32  ;;  %v1780_v56 = vpop.eup %1779  ;;  %v2356_v53 = vadd.f32 1.0, %v1778_v40 }
 0x274   :  { %1783 = vrcp.f32 %v2349_v55  ;;  %v386_v54 = vmul.f32 %v1780_v56, %v307_v36  ;;  %v2363_v39 = vsel %vm380_vm9, %v382_v62, %v378_v45  ;;  %vm391_vm11 = vweird.f32 %v1780_v56 }
 0x275   :  { %1785 = vrcp.f32 %v2356_v53  ;;  %v540_v59 = vand.u32 2147483647, %v2349_v55  ;;  %v542_v63 = vand.u32 2147483648, %v2349_v55  ;;  %vm2369_vm12 = vmor %vm390_vm10, %vm391_vm11  ;;  %v394_v45 = vand.u32 2147483647, %v307_v36 }
 0x276   :  { %v387_v58 = vsub.f32 1.0, %v386_v54  ;;  %1787 = vpow2.f32 %v1596_v61  ;;  %v396_v61 = vand.u32 2147483648, %v307_v36  ;;  %vm536_vm15 = vweird.f32 %v2349_v55 }
 0x277   :  { %vm395_vm14 = vcmp.eq.f32.partialorder %v394_v45, 8.507059e+37  ;;  %vm541_vm4 = vcmp.eq.f32.partialorder %v540_v59, 8.507059e+37  ;;  %vm405_vm5 = vweird.f32 %v2356_v53 }
 0x278   :  { %v481_v33 = vpop.f32.mrf.mxu2  ;;  %v388_v37 = vmul.f32 %v1780_v56, %v387_v58 }
 0x279   :  { %v1782_v32 = vpop.eup %1781  ;;  %v1608_v34 = vmul.f32 -1.442695, %v481_v33 }
 0x27a   :  { %v1784_v52 = vpop.eup %1783  ;;  %v2361_v51 = vadd.f32 1.0, %v1782_v32  ;;  %v389_v57 = vadd.f32 %v1780_v56, %v388_v37 }
 0x27b   :  { %v532_v40 = vmul.f32 %v1784_v52, %v2349_v55  ;;  %1789 = vpow2.f32 %v1608_v34  ;;  %v1786_v44 = vpop.eup %1785  ;;  %vm537_vm13 = vweird.f32 %v1784_v52 }
 0x27c   :  { %1791 = vrcp.f32 %v2361_v51  ;;  %v1788_v33 = vpop.eup %1787  ;;  %v393_v32 = vsel %vm2369_vm12, %v1780_v56, %v389_v57  ;;  %v401_v34 = vmul.f32 %v1786_v44, %v2356_v53  ;;  %vm538_vm3 = vmor %vm536_vm15, %vm537_vm13  ;;  %vm406_vm6 = vweird.f32 %v1786_v44 }
 0x27d   :  { %v533_v41 = vsub.f32 1.0, %v532_v40  ;;  %v397_v40 = vor.u32 1.1754944e-38, %v396_v61  ;;  %v2376_v37 = vadd.f32 1.0, %v1788_v33  ;;  %v557_v61 = vand.u32 2147483648, %v2361_v51  ;;  %vm2390_vm8 = vmor %vm405_vm5, %vm406_vm6 }
 0x27e   :  { %v402_v47 = vsub.f32 1.0, %v401_v34  ;;  %vm551_vm9 = vweird.f32 %v2361_v51 }
 0x27f   :  { %v534_v62 = vmul.f32 %v1784_v52, %v533_v41  ;;  %v543_v41 = vor.u32 1.1754944e-38, %v542_v63  ;;  %v2379_v42 = vsel %vm395_vm14, %v397_v40, %v393_v32  ;;  %1793 = vrcp.f32 %v2376_v37 }
 0x280   :  { %v484_v58 = vpop.f32.mrf.mxu2  ;;  %v403_v55 = vmul.f32 %v1786_v44, %v402_v47  ;;  %v411_v63 = vand.u32 2147483648, %v2356_v53  ;;  %vm420_vm14 = vweird.f32 %v2376_v37 }
 0x281   :  { %v1790_v50 = vpop.eup %1789  ;;  %v535_v49 = vadd.f32 %v1784_v52, %v534_v62  ;;  %v1609_v48 = vmul.f32 -1.442695, %v484_v58 }
 0x282   :  { %v1792_v36 = vpop.eup %1791  ;;  %v525_v43 = vadd.f32 1.0, %v1790_v50  ;;  %v409_v50 = vand.u32 2147483647, %v2356_v53  ;;  %v412_v62 = vor.u32 1.1754944e-38, %v411_v63 }
 0x283   :  { %v539_v56 = vsel %vm538_vm3, %v1784_v52, %v535_v49  ;;  %v547_v57 = vmul.f32 %v1792_v36, %v2361_v51  ;;  %1795 = vpow2.f32 %v1609_v48  ;;  %vm552_vm7 = vweird.f32 %v1792_v36 }
 0x284   :  { %v2383_v54 = vsel %vm541_vm4, %v543_v41, %v539_v56  ;;  %1797 = vrcp.f32 %v525_v43  ;;  %v555_v49 = vand.u32 2147483647, %v2361_v51  ;;  %v404_v52 = vadd.f32 %v1786_v44, %v403_v55  ;;  %vm553_vm11 = vmor %vm551_vm9, %vm552_vm7 }
 0x285   :  { %v548_v45 = vsub.f32 1.0, %v547_v57  ;;  %v1794_v59 = vpop.eup %1793  ;;  %vm410_vm10 = vcmp.eq.f32.partialorder %v409_v50, 8.507059e+37  ;;  %v558_v56 = vor.u32 1.1754944e-38, %v557_v61  ;;  %vm566_vm3 = vweird.f32 %v525_v43 }
 0x286   :  { %v408_v53 = vsel %vm2390_vm8, %v1786_v44, %v404_v52  ;;  %v416_v40 = vmul.f32 %v1794_v59, %v2376_v37  ;;  %vm556_vm12 = vcmp.eq.f32.partialorder %v555_v49, 8.507059e+37  ;;  %v572_v44 = vand.u32 2147483648, %v525_v43 }
 0x287   :  { %v549_v33 = vmul.f32 %v1792_v36, %v548_v45  ;;  %v2399_v45 = vsel %vm410_vm10, %v412_v62, %v408_v53  ;;  %v426_v52 = vand.u32 2147483648, %v2376_v37  ;;  %vm421_vm15 = vweird.f32 %v1794_v59 }
 0x288   :  { %v487_v47 = vpop.f32.mrf.mxu2  ;;  %v417_v48 = vsub.f32 1.0, %v416_v40  ;;  %v573_v40 = vor.u32 1.1754944e-38, %v572_v44  ;;  %vm422_vm6 = vmor %vm420_vm14, %vm421_vm15 }
 0x289   :  { %v1796_v32 = vpop.eup %1795  ;;  %v550_v34 = vadd.f32 %v1792_v36, %v549_v33  ;;  %v1610_v58 = vmul.f32 -1.442695, %v487_v47  ;;  %v570_v33 = vand.u32 2147483647, %v525_v43 }
 0x28a   :  { %v1798_v41 = vpop.eup %1797  ;;  %v526_v57 = vadd.f32 1.0, %v1796_v32  ;;  %v418_v47 = vmul.f32 %v1794_v59, %v417_v48 }
 0x28b   :  { %v554_v55 = vsel %vm553_vm11, %v1792_v36, %v550_v34  ;;  %v562_v51 = vmul.f32 %v1798_v41, %v525_v43  ;;  %1799 = vpow2.f32 %v1610_v58  ;;  %vm567_vm13 = vweird.f32 %v1798_v41 }
 0x28c   :  { %v2401_v50 = vsel %vm556_vm12, %v558_v56, %v554_v55  ;;  %1801 = vrcp.f32 %v526_v57  ;;  %v424_v36 = vand.u32 2147483647, %v2376_v37  ;;  %vm568_vm4 = vmor %vm566_vm3, %vm567_vm13  ;;  %v419_v58 = vadd.f32 %v1794_v59, %v418_v47 }
 0x28d   :  { %v563_v63 = vsub.f32 1.0, %v562_v51  ;;  %vm571_vm5 = vcmp.eq.f32.partialorder %v570_v33, 8.507059e+37  ;;  %v427_v55 = vor.u32 1.1754944e-38, %v426_v52  ;;  %v587_v31 = vand.u32 2147483648, %v526_v57 }
 0x28e   :  { %vm425_vm7 = vcmp.eq.f32.partialorder %v424_v36, 8.507059e+37  ;;  %v585_v33 = vand.u32 2147483647, %v526_v57  ;;  %vm581_vm9 = vweird.f32 %v526_v57 }
 0x28f   :  { %v564_v61 = vmul.f32 %v1798_v41, %v563_v63 }
 0x290   :  { %v490_v49 = vpop.f32.mrf.mxu2  ;;  %vm586_vm11 = vcmp.eq.f32.partialorder %v585_v33, 8.507059e+37 }
 0x291   :  { %v1800_v62 = vpop.eup %1799  ;;  %v565_v32 = vadd.f32 %v1798_v41, %v564_v61  ;;  %v1611_v34 = vmul.f32 -1.442695, %v490_v49  ;;  %v423_v61 = vsel %vm422_vm6, %v1794_v59, %v419_v58 }
 0x292   :  { %v1802_v53 = vpop.eup %1801  ;;  %v527_v56 = vadd.f32 1.0, %v1800_v62  ;;  %v2410_v49 = vsel %vm425_vm7, %v427_v55, %v423_v61 }
 0x293   :  { %v569_v51 = vsel %vm568_vm4, %v1798_v41, %v565_v32  ;;  %v577_v63 = vmul.f32 %v1802_v53, %v526_v57  ;;  %1803 = vpow2.f32 %v1611_v34  ;;  %vm582_vm8 = vweird.f32 %v1802_v53 }
 0x294   :  { %v2408_v48 = vsel %vm571_vm5, %v573_v40, %v569_v51  ;;  %1805 = vrcp.f32 %v527_v56  ;;  %vm583_vm10 = vmor %vm581_vm9, %vm582_vm8  ;;  %v588_v32 = vor.u32 1.1754944e-38, %v587_v31  ;;  %v602_v55 = vand.u32 2147483648, %v527_v56 }
 0x295   :  { %v578_v43 = vsub.f32 1.0, %v577_v63  ;;  %v600_v63 = vand.u32 2147483647, %v527_v56  ;;  %vm596_vm13 = vweird.f32 %v527_v56 }
 0x296   :  { %v603_v31 = vor.u32 1.1754944e-38, %v602_v55 }
 0x297   :  { %v579_v47 = vmul.f32 %v1802_v53, %v578_v43  ;;  %vm601_vm15 = vcmp.eq.f32.partialorder %v600_v63, 8.507059e+37 }
 0x298   :  { %v493_v44 = vpop.f32.mrf.mxu2 }
 0x299   :  { %v1804_v62 = vpop.eup %1803  ;;  %v580_v37 = vadd.f32 %v1802_v53, %v579_v47  ;;  %v1612_v52 = vmul.f32 -1.442695, %v493_v44 }
 0x29a   :  { %v1806_v41 = vpop.eup %1805  ;;  %v528_v36 = vadd.f32 1.0, %v1804_v62 }
 0x29b   :  { %v584_v34 = vsel %vm583_vm10, %v1802_v53, %v580_v37  ;;  %v592_v40 = vmul.f32 %v1806_v41, %v527_v56  ;;  %1807 = vpow2.f32 %v1612_v52  ;;  %vm597_vm12 = vweird.f32 %v1806_v41 }
 0x29c   :  { %v2412_v59 = vsel %vm586_vm11, %v588_v32, %v584_v34  ;;  %1809 = vrcp.f32 %v528_v36  ;;  %vm598_vm14 = vmor %vm596_vm13, %vm597_vm12  ;;  %v617_v32 = vand.u32 2147483648, %v528_v36  ;;  %vm611_vm4 = vweird.f32 %v528_v36 }
 0x29d   :  { %v593_v58 = vsub.f32 1.0, %v592_v40  ;;  %v615_v40 = vand.u32 2147483647, %v528_v36 }
 0x29f   :  { %v594_v51 = vmul.f32 %v1806_v41, %v593_v58  ;;  %vm616_vm6 = vcmp.eq.f32.partialorder %v615_v40, 8.507059e+37 }
 0x2a0   :  { %v496_v43 = vpop.f32.mrf.mxu2 }
 0x2a1   :  { %v1808_v61 = vpop.eup %1807  ;;  %v595_v57 = vadd.f32 %v1806_v41, %v594_v51  ;;  %v1613_v47 = vmul.f32 -1.442695, %v496_v43  ;;  %v618_v43 = vor.u32 1.1754944e-38, %v617_v32 }
 0x2a2   :  { %v1810_v44 = vpop.eup %1809  ;;  %v529_v53 = vadd.f32 1.0, %v1808_v61 }
 0x2a3   :  { %v599_v33 = vsel %vm598_vm14, %v1806_v41, %v595_v57  ;;  %v607_v62 = vmul.f32 %v1810_v44, %v528_v36  ;;  %1811 = vpow2.f32 %v1613_v47  ;;  %vm612_vm3 = vweird.f32 %v1810_v44 }
 0x2a4   :  { %v2414_v37 = vsel %vm601_vm15, %v603_v31, %v599_v33  ;;  %1813 = vrcp.f32 %v529_v53  ;;  %vm613_vm5 = vmor %vm611_vm4, %vm612_vm3  ;;  %v632_v47 = vand.u32 2147483648, %v529_v53  ;;  %v630_v33 = vand.u32 2147483647, %v529_v53 }
 0x2a5   :  { %v608_v52 = vsub.f32 1.0, %v607_v62  ;;  %vm626_vm8 = vweird.f32 %v529_v53 }
 0x2a6   :  { %v633_v36 = vor.u32 1.1754944e-38, %v632_v47  ;;  %vm631_vm10 = vcmp.eq.f32.partialorder %v630_v33, 8.507059e+37 }
 0x2a7   :  { %v609_v34 = vmul.f32 %v1810_v44, %v608_v52 }
 0x2a9   :  { %v1812_v58 = vpop.eup %1811  ;;  %v610_v51 = vadd.f32 %v1810_v44, %v609_v34 }
 0x2aa   :  { %v1814_v56 = vpop.eup %1813  ;;  %v530_v55 = vadd.f32 1.0, %v1812_v58 }
 0x2ab   :  { %v614_v61 = vsel %vm613_vm5, %v1810_v44, %v610_v51  ;;  %v622_v41 = vmul.f32 %v1814_v56, %v529_v53  ;;  %vm627_vm7 = vweird.f32 %v1814_v56 }
 0x2ac   :  { %v2416_v63 = vsel %vm616_vm6, %v618_v43, %v614_v61  ;;  %1815 = vrcp.f32 %v530_v55  ;;  %vm628_vm9 = vmor %vm626_vm8, %vm627_vm7  ;;  %v647_v40 = vand.u32 2147483648, %v530_v55  ;;  %v645_v43 = vand.u32 2147483647, %v530_v55 }
 0x2ad   :  { %v623_v57 = vsub.f32 1.0, %v622_v41  ;;  %vm641_vm12 = vweird.f32 %v530_v55 }
 0x2ae   :  { %v648_v41 = vor.u32 1.1754944e-38, %v647_v40  ;;  %vm646_vm14 = vcmp.eq.f32.partialorder %v645_v43, 8.507059e+37 }
 0x2af   :  { %v624_v31 = vmul.f32 %v1814_v56, %v623_v57 }
 0x2b1   :  { %v625_v62 = vadd.f32 %v1814_v56, %v624_v31 }
 0x2b2   :  { %v1816_v52 = vpop.eup %1815 }
 0x2b3   :  { %v629_v34 = vsel %vm628_vm9, %v1814_v56, %v625_v62  ;;  %v637_v32 = vmul.f32 %v1816_v52, %v530_v55  ;;  %vm642_vm11 = vweird.f32 %v1816_v52 }
 0x2b4   :  { %v2418_v58 = vsel %vm631_vm10, %v633_v36, %v629_v34  ;;  %vm643_vm13 = vmor %vm641_vm12, %vm642_vm11 }
 0x2b5   :  { %v638_v44 = vsub.f32 1.0, %v637_v32 }
 0x2b7   :  { %v639_v51 = vmul.f32 %v1816_v52, %v638_v44 }
 0x2b9   :  { %v640_v61 = vadd.f32 %v1816_v52, %v639_v51 }
 0x2bb   :  { %v644_v57 = vsel %vm643_vm13, %v1816_v52, %v640_v61 }
 0x2bc   :  { %v2420_v53 = vsel %vm646_vm14, %v648_v41, %v644_v57 }
 0x2bd LB: > { %s1614_s21 = sshll.u32 %s1917_s5, 7  ;;  %vm664_vm15 = vcmask 130048   ;;  %s656_s5 = sadd.s32 1, %s1917_s5   ;;  %s1917_s5 = sphi %s2422_s5, %s656_s5  }
 0x2be   : > { %s658_s22 = sshra.s32 %s1614_s21, 7  ;;  %p653_p0 = scmp.ge.s32.totalorder %s656_s5, 2  }
 0x2bf   : > { %s2428_s23 = sshll.u32 %s658_s22, 3 }
 0x2c0   : > { %s661_s26 = scalar_lea.vmem %s2782_s6, %s2428_s23  ;;  %s731_s1 = scalar_lea.vmem %s2783_s7, %s2428_s23 }
 0x2c1   : > { %v663_v56 = vld [vmem:[%s661_s26 + $0x10] sm:$0xff]  ;;  %v662_v55 = vld [vmem:[%s661_s26] sm:$0xff]  ;;  %s2474_s9 = scalar_lea.vmem %s2776_s0, %s2428_s23  ;;  %s2478_s10 = scalar_lea.vmem [#allocation2], %s2428_s23 }
 0x2c2   : > { %1723 = vmatpush.msra.mxu2 %v663_v56  ;;  %v733_v47 = vld [vmem:[%s731_s1 + $0x10] sm:$0xff]  ;;  %v732_v31 = vld [vmem:[%s731_s1] sm:$0xff]  ;;  %703 = vmatpush.msra.mxu0 %v663_v56 }
 0x2c3   : > { %1725 = vmatpush.msra.mxu3 %v733_v47  ;;  %772 = vmatpush.msra.mxu1 %v733_v47  ;;  %v809_v52 = vld [vmem:[%s2474_s9] sm:$0xff]  ;;  %v810_v57 = vld [vmem:[%s2474_s9 + $0x10] sm:$0xff] }
 0x2c4   : > { %1724 = vmatpush.msra.mxu2 %v662_v55  ;;  %704 = vmatpush.msra.mxu0 %v662_v55  ;;  %v813_v40 = vld [vmem:[%s2474_s9 + $0x40] sm:$0xff] }
 0x2c5   : > { %1726 = vmatpush.msra.mxu3 %v732_v31  ;;  %1620 = vmatmul.msk.f32.vlgmr.msra.gmra.mxu2 %vm664_vm15, %v2363_v39 }
 0x2c6   : > { %1629 = vmatmul.msk.f32.vlgmr.msra.gmra.mxu3 %vm664_vm15, %v2414_v37  ;;  %773 = vmatpush.msra.mxu1 %v732_v31  ;;  %v2831_v37 = vld [vmem:[#allocation7_spill] sm:$0xff] (%p653_p0) }
 0x2c7   : > { %1616 = vmatmul.msk.f32.vlgmr.msra.gmra.mxu0 %vm664_vm15, %v2334_v46  ;;  %1625 = vmatmul.msk.f32.vlgmr.msra.gmra.mxu1 %vm664_vm15, %v2383_v54 }
 0x2c8   :  { %852 = vmatpush.msra.mxu0 (%p653_p0), %v1976_v0  ;;  %893 = vmatpush.msra.mxu1 (%p653_p0), %v1981_v1  ;;  %v1635_v0 = vld [vmem:[%s2776_s0 + $0x80] sm:$0xff] (%p653_p0)  ;;  %v1636_v1 = vld [vmem:[%s2776_s0 + $0x88] sm:$0xff] (%p653_p0) }
 0x2ca   :  { %853 = vmatpush.msra.mxu0 (%p653_p0), %v1988_v2  ;;  %894 = vmatpush.msra.mxu1 (%p653_p0), %v1993_v3  ;;  %v2829_v2 = vld [vmem:[#allocation5_spill] sm:$0xff] (%p653_p0)  ;;  %v1637_v3 = vld [vmem:[%s2776_s0 + $0x90] sm:$0xff] (%p653_p0) }
 0x2cc   :  { %854 = vmatpush.msra.mxu0 (%p653_p0), %v1998_v4  ;;  %895 = vmatpush.msra.mxu1 (%p653_p0), %v2003_v5  ;;  %v1638_v4 = vld [vmem:[%s2776_s0 + $0x98] sm:$0xff] (%p653_p0)  ;;  %v1639_v5 = vld [vmem:[%s2776_s0 + $0xa0] sm:$0xff] (%p653_p0) }
 0x2cd   : > { %1621 = vmatmul.msk.f32.gmra.mxu2 %vm664_vm15, %v2379_v42 }
 0x2ce   : > { %1630 = vmatmul.msk.f32.gmra.mxu3 %vm664_vm15, %v2416_v63  ;;  %855 = vmatpush.msra.mxu0 (%p653_p0), %v2010_v6  ;;  %v1640_v6 = vld [vmem:[%s2776_s0 + $0xa8] sm:$0xff] (%p653_p0) }
 0x2cf   : > { %1617 = vmatmul.msk.f32.gmra.mxu0 %vm664_vm15, %v2343_v38  ;;  %1626 = vmatmul.msk.f32.gmra.mxu1 %vm664_vm15, %v2401_v50 }
 0x2d0   :  { %896 = vmatpush.msra.mxu1 (%p653_p0), %v2015_v7  ;;  %856 = vmatpush.msra.mxu0 (%p653_p0), %v2022_v8  ;;  %v1641_v7 = vld [vmem:[%s2776_s0 + $0xb0] sm:$0xff] (%p653_p0)  ;;  %v1642_v8 = vld [vmem:[%s2776_s0 + $0xb8] sm:$0xff] (%p653_p0) }
 0x2d2   :  { %897 = vmatpush.msra.mxu1 (%p653_p0), %v2027_v9  ;;  %857 = vmatpush.msra.mxu0 (%p653_p0), %v2034_v10  ;;  %v1643_v9 = vld [vmem:[%s2776_s0 + $0xc0] sm:$0xff] (%p653_p0)  ;;  %v1644_v10 = vld [vmem:[%s2776_s0 + $0xc8] sm:$0xff] (%p653_p0) }
 0x2d4   :  { %898 = vmatpush.msra.mxu1 (%p653_p0), %v2039_v11  ;;  %858 = vmatpush.msra.mxu0 (%p653_p0), %v2046_v12  ;;  %v1645_v11 = vld [vmem:[%s2776_s0 + $0xd0] sm:$0xff] (%p653_p0)  ;;  %v1646_v12 = vld [vmem:[%s2776_s0 + $0xd8] sm:$0xff] (%p653_p0) }
 0x2d5   : > { %1622 = vmatmul.msk.f32.gmra.mxu2 %vm664_vm15, %v2399_v45 }
 0x2d6   : > { %1631 = vmatmul.msk.f32.gmra.mxu3 %vm664_vm15, %v2418_v58  ;;  %899 = vmatpush.msra.mxu1 (%p653_p0), %v2051_v13  ;;  %v1647_v13 = vld [vmem:[%s2776_s0 + $0xe0] sm:$0xff] (%p653_p0) }
 0x2d7   : > { %1618 = vmatmul.msk.f32.gmra.mxu0 %vm664_vm15, %v2345_v60  ;;  %1627 = vmatmul.msk.f32.gmra.mxu1 %vm664_vm15, %v2408_v48 }
 0x2d8   :  { %859 = vmatpush.msra.mxu0 (%p653_p0), %v2058_v14  ;;  %900 = vmatpush.msra.mxu1 (%p653_p0), %v2063_v15  ;;  %v1648_v14 = vld [vmem:[%s2776_s0 + $0xe8] sm:$0xff] (%p653_p0)  ;;  %v1649_v15 = vld [vmem:[%s2776_s0 + $0xf0] sm:$0xff] (%p653_p0) }
 0x2da   :  { %860 = vmatpush.msra.mxu0 (%p653_p0), %v2070_v16  ;;  %901 = vmatpush.msra.mxu1 (%p653_p0), %v2075_v17  ;;  %v1650_v16 = vld [vmem:[%s2776_s0 + $0xf8] sm:$0xff] (%p653_p0) }
 0x2dc   :  { %861 = vmatpush.msra.mxu0 (%p653_p0), %v2082_v18  ;;  %902 = vmatpush.msra.mxu1 (%p653_p0), %v2087_v19 }
 0x2dd   : > { %1623 = vmatmul.msk.f32.gmra.mxu2 %vm664_vm15, %v2410_v49  ;;  %v2830_v49 = vld [vmem:[#allocation6_spill] sm:$0xff] (%p653_p0) }
 0x2de   : > { %1632 = vmatmul.msk.f32.gmra.mxu3 %vm664_vm15, %v2420_v53  ;;  %862 = vmatpush.msra.mxu0 (%p653_p0), %v2094_v20  ;;  %v2832_v53 = vld [vmem:[#allocation8_spill] sm:$0xff] (%p653_p0) }
 0x2df   : > { %1619 = vmatmul.msk.f32.gmra.mxu0 %vm664_vm15, %v2347_v35  ;;  %1628 = vmatmul.msk.f32.gmra.mxu1 %vm664_vm15, %v2412_v59 }
 0x2e0   :  { %903 = vmatpush.msra.mxu1 (%p653_p0), %v2099_v21  ;;  %863 = vmatpush.msra.mxu0 (%p653_p0), %v2106_v22 }
 0x2e2   :  { %904 = vmatpush.msra.mxu1 (%p653_p0), %v2111_v23  ;;  %864 = vmatpush.msra.mxu0 (%p653_p0), %v2118_v24 }
 0x2e4   :  { %905 = vmatpush.msra.mxu1 (%p653_p0), %v2123_v25  ;;  %865 = vmatpush.msra.mxu0 (%p653_p0), %v2130_v26 }
 0x2e6   :  { %906 = vmatpush.msra.mxu1 (%p653_p0), %v2135_v27  ;;  %866 = vmatpush.msra.mxu0 (%p653_p0), %v2142_v28 }
 0x2e8   :  { %907 = vmatpush.msra.mxu1 (%p653_p0), %v2147_v29  ;;  %867 = vmatpush.msra.mxu0 (%p653_p0), %v2154_v30 }
 0x2e9   :  { %868 = vmatmul.f32.vlgmr.msra.gmra.mxu0 (%p653_p0), %v1635_v0  ;;  %v2845_v0 = vld [vmem:[#allocation21_spill] sm:$0xff] (%p653_p0) }
 0x2ea   :  { %908 = vmatpush.msra.mxu1 (%p653_p0), %v2829_v2 }
 0x2eb   :  { %909 = vmatmul.f32.vlgmr.msra.gmra.mxu1 (%p653_p0), %v1636_v1 }
 0x2f1   :  { %871 = vmatmul.f32.gmra.mxu0 (%p653_p0), %v1637_v3 }
 0x2f3   :  { %912 = vmatmul.f32.gmra.mxu1 (%p653_p0), %v1638_v4 }
 0x2f9   :  { %874 = vmatmul.f32.gmra.mxu0 (%p653_p0), %v1639_v5 }
 0x2fb   :  { %915 = vmatmul.f32.gmra.mxu1 (%p653_p0), %v1640_v6 }
 0x301   :  { %877 = vmatmul.f32.gmra.mxu0 (%p653_p0), %v1641_v7  ;;  %v2846_v7 = vld [vmem:[#allocation22_spill] sm:$0xff] (%p653_p0) }
 0x303   :  { %918 = vmatmul.f32.gmra.mxu1 (%p653_p0), %v1642_v8 }
 0x309   :  { %880 = vmatmul.f32.gmra.mxu0 (%p653_p0), %v1643_v9 }
 0x30b   :  { %921 = vmatmul.f32.gmra.mxu1 (%p653_p0), %v1644_v10 }
 0x311   :  { %883 = vmatmul.f32.gmra.mxu0 (%p653_p0), %v1645_v11 }
 0x313   :  { %924 = vmatmul.f32.gmra.mxu1 (%p653_p0), %v1646_v12  ;;  %v2847_v12 = vld [vmem:[#allocation23_spill] sm:$0xff] (%p653_p0) }
 0x319   :  { %886 = vmatmul.f32.gmra.mxu0 (%p653_p0), %v1647_v13 }
 0x31b   :  { %927 = vmatmul.f32.gmra.mxu1 (%p653_p0), %v1648_v14 }
 0x321   :  { %889 = vmatmul.f32.gmra.mxu0 (%p653_p0), %v1649_v15 }
 0x323   :  { %930 = vmatmul.f32.gmra.mxu1 (%p653_p0), %v1650_v16 }
 0x344   : > { %v706_v33 = vpop.f32.mrf.mxu0  ;;  %v775_v62 = vpop.f32.mrf.mxu1 }
 0x345   : > { %v799_v36 = vmul.f32 %v775_v62, %v706_v33  ;;  %v814_v33 = vld [vmem:[%s2474_s9 + $0x50] sm:$0xff] }
 0x347   : > { %v817_v34 = vmul.f32 %v809_v52, %v799_v36 }
 0x348   : > { %v718_v32 = vpop.f32.mrf.mxu2 }
 0x349   : > { %827 = vst [vmem:[%s2478_s10] sm:$0xff] %v817_v34  ;;  %v787_v44 = vpop.f32.mrf.mxu3 }
 0x34a   : > { %v803_v51 = vmul.f32 %v787_v44, %v718_v32  ;;  %v811_v32 = vld [vmem:[%s2474_s9 + $0x20] sm:$0xff] }
 0x34c   : > { %v821_v43 = vmul.f32 %v813_v40, %v803_v51  ;;  %v709_v61 = vpop.f32.mrf.mxu0  ;;  %v778_v41 = vpop.f32.mrf.mxu1 }
 0x34d   : > { %v800_v56 = vmul.f32 %v778_v41, %v709_v61  ;;  %v815_v61 = vld [vmem:[%s2474_s9 + $0x60] sm:$0xff] }
 0x34e   : > { %831 = vst [vmem:[%s2478_s10 + $0x40] sm:$0xff] %v821_v43 }
 0x34f   : > { %v818_v55 = vmul.f32 %v810_v57, %v800_v56 }
 0x350   : > { %v721_v47 = vpop.f32.mrf.mxu2 }
 0x351   : > { %828 = vst [vmem:[%s2478_s10 + $0x10] sm:$0xff] %v818_v55  ;;  %v790_v31 = vpop.f32.mrf.mxu3 }
 0x352   : > { %v804_v62 = vmul.f32 %v790_v31, %v721_v47  ;;  %v812_v47 = vld [vmem:[%s2474_s9 + $0x30] sm:$0xff] }
 0x354   : > { %v822_v52 = vmul.f32 %v814_v33, %v804_v62  ;;  %v712_v36 = vpop.f32.mrf.mxu0  ;;  %v781_v34 = vpop.f32.mrf.mxu1 }
 0x355   : > { %v801_v44 = vmul.f32 %v781_v34, %v712_v36  ;;  %v816_v34 = vld [vmem:[%s2474_s9 + $0x70] sm:$0xff] }
 0x356   : > { %832 = vst [vmem:[%s2478_s10 + $0x50] sm:$0xff] %v822_v52 }
 0x357   : > { %v819_v40 = vmul.f32 %v811_v32, %v801_v44  ;;  %v2833_v44 = vld [vmem:[#allocation9_spill] sm:$0xff] (%p653_p0) }
 0x358   : > { %v724_v51 = vpop.f32.mrf.mxu2 }
 0x359   : > { %829 = vst [vmem:[%s2478_s10 + $0x20] sm:$0xff] %v819_v40  ;;  %v793_v43 = vpop.f32.mrf.mxu3  ;;  %v2834_v40 = vld [vmem:[#allocation10_spill] sm:$0xff] (%p653_p0) }
 0x35a   : > { %v805_v41 = vmul.f32 %v793_v43, %v724_v51  ;;  %v2835_v51 = vld [vmem:[#allocation11_spill] sm:$0xff] (%p653_p0)  ;;  %v2836_v43 = vld [vmem:[#allocation12_spill] sm:$0xff] (%p653_p0) }
 0x35c   : > { %v823_v57 = vmul.f32 %v815_v61, %v805_v41  ;;  %v715_v56 = vpop.f32.mrf.mxu0  ;;  %v784_v55 = vpop.f32.mrf.mxu1  ;;  %v2837_v61 = vld [vmem:[#allocation13_spill] sm:$0xff] (%p653_p0)  ;;  %v2838_v41 = vld [vmem:[#allocation15_spill] sm:$0xff] (%p653_p0) }
 0x35d   : > { %v802_v31 = vmul.f32 %v784_v55, %v715_v56  ;;  %v2840_v55 = vld [vmem:[#allocation14_spill] sm:$0xff] (%p653_p0) }
 0x35e   : > { %833 = vst [vmem:[%s2478_s10 + $0x60] sm:$0xff] %v823_v57  ;;  %v2839_v57 = vld [vmem:[#allocation17_spill] sm:$0xff] (%p653_p0) }
 0x35f   : > { %v820_v33 = vmul.f32 %v812_v47, %v802_v31  ;;  %v2841_v47 = vld [vmem:[#allocation16_spill] sm:$0xff] (%p653_p0)  ;;  %v2842_v31 = vld [vmem:[#allocation18_spill] sm:$0xff] (%p653_p0) }
 0x360   : > { %v727_v62 = vpop.f32.mrf.mxu2 }
 0x361   : > { %830 = vst [vmem:[%s2478_s10 + $0x30] sm:$0xff] %v820_v33  ;;  %v796_v36 = vpop.f32.mrf.mxu3  ;;  %v2843_v33 = vld [vmem:[#allocation19_spill] sm:$0xff] (%p653_p0) }
 0x362   : > { %v806_v52 = vmul.f32 %v796_v36, %v727_v62  ;;  %655 = sbr.rel (!%p653_p0) target bundleno = 701 (0x2bd), region = 75 }
 0x364   : > { %v824_v32 = vmul.f32 %v816_v34, %v806_v52  ;;  %v2844_v34 = vld [vmem:[#allocation20_spill] sm:$0xff] (%p653_p0) }
 0x366   : > { %834 = vst [vmem:[%s2478_s10 + $0x70] sm:$0xff] %v824_v32  ;;  %v869_v17 = vpop.f32.mrf.mxu0 (%p653_p0) }
 0x368   :  { %v910_v18 = vpop.f32.mrf.mxu1 }
 0x369   :  { %v911_v19 = vadd.f32 %v910_v18, %v869_v17 }
 0x36e   :  { %v872_v20 = vpop.f32.mrf.mxu0 }
 0x370   :  { %v913_v21 = vpop.f32.mrf.mxu1 }
 0x371   :  { %v914_v48 = vadd.f32 %v913_v21, %v872_v20 }
 0x376   :  { %v875_v22 = vpop.f32.mrf.mxu0 }
 0x378   :  { %v916_v23 = vpop.f32.mrf.mxu1 }
 0x379   :  { %v917_v50 = vadd.f32 %v916_v23, %v875_v22 }
 0x37e   :  { %v878_v24 = vpop.f32.mrf.mxu0 }
 0x380   :  { %v919_v25 = vpop.f32.mrf.mxu1 }
 0x381   :  { %v920_v45 = vadd.f32 %v919_v25, %v878_v24 }
 0x386   :  { %v881_v26 = vpop.f32.mrf.mxu0 }
 0x388   :  { %v922_v27 = vpop.f32.mrf.mxu1 }
 0x389   :  { %v923_v54 = vadd.f32 %v922_v27, %v881_v26 }
 0x38e   :  { %v884_v28 = vpop.f32.mrf.mxu0 }
 0x390   :  { %v925_v29 = vpop.f32.mrf.mxu1 }
 0x391   :  { %v926_v39 = vadd.f32 %v925_v29, %v884_v28 }
 0x396   :  { %v887_v30 = vpop.f32.mrf.mxu0 }
 0x398   :  { %v928_v42 = vpop.f32.mrf.mxu1 }
 0x399   :  { %v929_v35 = vadd.f32 %v928_v42, %v887_v30 }
 0x39e   :  { %v890_v46 = vpop.f32.mrf.mxu0 }
 0x3a0   :  { %v931_v38 = vpop.f32.mrf.mxu1 }
 0x3a1   :  { %v932_v60 = vadd.f32 %v931_v38, %v890_v46 }
 0x3a3   :  { %942 = vmatpush.msra.mxu2 %v932_v60 }
 0x3a5   :  { %943 = vmatpush.msra.mxu2 %v929_v35 }
 0x3a7   :  { %944 = vmatpush.msra.mxu2 %v926_v39 }
 0x3a9   :  { %945 = vmatpush.msra.mxu2 %v923_v54 }
 0x3ab   :  { %946 = vmatpush.msra.mxu2 %v920_v45 }
 0x3ad   :  { %947 = vmatpush.msra.mxu2 %v917_v50 }
 0x3af   :  { %948 = vmatpush.msra.mxu2 %v914_v48 }
 0x3b1   :  { %949 = vmatpush.msra.mxu2 %v911_v19 }
 0x3b2   :  { %1651 = vmatmul.msk.f32.vlgmr.msra.gmra.mxu2 %vm183_vm0, %v2830_v49 }
 0x435   :  { %v951_v59 = vpop.f32.mrf.mxu2 }
 0x436   :  { %v952_v63 = vadd.f32 %v951_v59, %v2831_v37 }
 0x438   :  { %v954_v58 = vmax.f32 %v952_v63, 0.0 }
 0x43a   :  { %1652 = vmatpush.msk.msra.mxu3 %vm233_vm1, %v954_v58  ;;  %1151 = vrot.lane.b32.xlu0 %v954_v58, %s1924_s2  ;;  %s2697_s2 = smov 0  }
 0x43b   :  { %1653 = vmatmul.msk.f32.vlgmr.msra.gmra.mxu3 %vm208_vm2, %v2832_v53 }
 0x443   :  { %1654 = vmatmul.msk.f32.gmra.mxu3 %vm208_vm2, %v2833_v44 }
 0x44b   :  { %1655 = vmatmul.msk.f32.gmra.mxu3 %vm208_vm2, %v2834_v40 }
 0x453   :  { %1656 = vmatmul.msk.f32.gmra.mxu3 %vm208_vm2, %v2835_v51 }
 0x45b   :  { %1657 = vmatmul.msk.f32.gmra.mxu3 %vm208_vm2, %v2836_v43 }
 0x463   :  { %1658 = vmatmul.msk.f32.gmra.mxu3 %vm208_vm2, %v2837_v61 }
 0x46b   :  { %1659 = vmatmul.msk.f32.gmra.mxu3 %vm208_vm2, %v2838_v41 }
 0x473   :  { %1660 = vmatmul.msk.f32.gmra.mxu3 %vm208_vm2, %v2839_v57 }
 0x4ac   :  { %v1152_v56 = vpop.permute.xlu0 %1151 }
 0x4ad   :  { %1669 = vmatpush.msk.msrb.mxu2 %vm233_vm1, %v1152_v56 }
 0x4ae   :  { %1670 = vmatmul.msk.f32.vlgmr.msrb.gmra.mxu2 %vm208_vm2, %v2840_v55 }
 0x4b6   :  { %1671 = vmatmul.msk.f32.gmra.mxu2 %vm208_vm2, %v2841_v47 }
 0x4be   :  { %1672 = vmatmul.msk.f32.gmra.mxu2 %vm208_vm2, %v2842_v31  ;;  %v975_v62 = vpop.f32.mrf.mxu3 }
 0x4bf   :  { %v1661_v36 = vmul.f32 -1.442695, %v975_v62 }
 0x4c1   :  { %1817 = vpow2.f32 %v1661_v36 }
 0x4c6   :  { %1673 = vmatmul.msk.f32.gmra.mxu2 %vm208_vm2, %v2843_v33  ;;  %v978_v13 = vpop.f32.mrf.mxu3 }
 0x4c7   :  { %v1818_v52 = vpop.eup %1817  ;;  %v1662_v14 = vmul.f32 -1.442695, %v978_v13 }
 0x4c8   :  { %v1023_v32 = vadd.f32 1.0, %v1818_v52 }
 0x4ca   :  { %1819 = vrcp.f32 %v1023_v32  ;;  %v1042_v3 = vand.u32 2147483648, %v1023_v32  ;;  %vm1036_vm0 = vweird.f32 %v1023_v32  ;;  %v1040_v5 = vand.u32 2147483647, %v1023_v32 }
 0x4cb   :  { %1821 = vpow2.f32 %v1662_v14 }
 0x4cc   :  { %v1043_v8 = vor.u32 1.1754944e-38, %v1042_v3  ;;  %vm1041_vm4 = vcmp.eq.f32.partialorder %v1040_v5, 8.507059e+37 }
 0x4ce   :  { %1674 = vmatmul.msk.f32.gmra.mxu2 %vm208_vm2, %v2844_v34  ;;  %v981_v15 = vpop.f32.mrf.mxu3 }
 0x4cf   :  { %v1663_v17 = vmul.f32 -1.442695, %v981_v15 }
 0x4d0   :  { %v1820_v1 = vpop.eup %1819 }
 0x4d1   :  { %v1032_v2 = vmul.f32 %v1820_v1, %v1023_v32  ;;  %vm1037_vm1 = vweird.f32 %v1820_v1  ;;  %v1822_v16 = vpop.eup %1821  ;;  %1823 = vpow2.f32 %v1663_v17 }
 0x4d2   :  { %vm1038_vm3 = vmor %vm1036_vm0, %vm1037_vm1  ;;  %v1024_v18 = vadd.f32 1.0, %v1822_v16 }
 0x4d3   :  { %v1033_v4 = vsub.f32 1.0, %v1032_v2 }
 0x4d4   :  { %1825 = vrcp.f32 %v1024_v18  ;;  %v1057_v27 = vand.u32 2147483648, %v1024_v18  ;;  %v1055_v29 = vand.u32 2147483647, %v1024_v18 }
 0x4d5   :  { %v1034_v6 = vmul.f32 %v1820_v1, %v1033_v4 }
 0x4d6   :  { %1675 = vmatmul.msk.f32.gmra.mxu2 %vm208_vm2, %v2845_v0  ;;  %v984_v20 = vpop.f32.mrf.mxu3  ;;  %v1058_v46 = vor.u32 1.1754944e-38, %v1057_v27  ;;  %vm1056_vm7 = vcmp.eq.f32.partialorder %v1055_v29, 8.507059e+37 }
 0x4d7   :  { %v1035_v9 = vadd.f32 %v1820_v1, %v1034_v6  ;;  %v1824_v19 = vpop.eup %1823  ;;  %v1664_v23 = vmul.f32 -1.442695, %v984_v20 }
 0x4d8   :  { %v1025_v22 = vadd.f32 1.0, %v1824_v19 }
 0x4d9   :  { %v1039_v10 = vsel %vm1038_vm3, %v1820_v1, %v1035_v9 }
 0x4da   :  { %v2614_v11 = vsel %vm1041_vm4, %v1043_v8, %v1039_v10  ;;  %v1826_v21 = vpop.eup %1825  ;;  %1827 = vrcp.f32 %v1025_v22  ;;  %v1072_v49 = vand.u32 2147483648, %v1025_v22  ;;  %vm1066_vm8 = vweird.f32 %v1025_v22 }
 0x4db   :  { %v1047_v24 = vmul.f32 %v1826_v21, %v1024_v18  ;;  %1829 = vpow2.f32 %v1664_v23  ;;  %vm1052_vm5 = vweird.f32 %v1826_v21  ;;  %v1070_v37 = vand.u32 2147483647, %v1025_v22 }
 0x4dc   :  { %v1073_v53 = vor.u32 1.1754944e-38, %v1072_v49 }
 0x4dd   :  { %v1048_v25 = vsub.f32 1.0, %v1047_v24  ;;  %vm1071_vm11 = vcmp.eq.f32.partialorder %v1070_v37, 8.507059e+37 }
 0x4de   :  { %1676 = vmatmul.msk.f32.gmra.mxu2 %vm208_vm2, %v2846_v7  ;;  %v987_v30 = vpop.f32.mrf.mxu3 }
 0x4df   :  { %v1049_v26 = vmul.f32 %v1826_v21, %v1048_v25  ;;  %v1665_v38 = vmul.f32 -1.442695, %v987_v30 }
 0x4e0   :  { %v1828_v42 = vpop.eup %1827 }
 0x4e1   :  { %v1050_v28 = vadd.f32 %v1826_v21, %v1049_v26  ;;  %v1830_v60 = vpop.eup %1829  ;;  %v1062_v39 = vmul.f32 %v1828_v42, %v1025_v22  ;;  %1831 = vpow2.f32 %v1665_v38  ;;  %vm1067_vm9 = vweird.f32 %v1828_v42 }
 0x4e2   :  { %v1026_v45 = vadd.f32 1.0, %v1830_v60  ;;  %vm1068_vm10 = vmor %vm1066_vm8, %vm1067_vm9 }
 0x4e3   :  { %v1063_v50 = vsub.f32 1.0, %v1062_v39 }
 0x4e4   :  { %1833 = vrcp.f32 %v1026_v45  ;;  %v1087_v31 = vand.u32 2147483648, %v1026_v45  ;;  %vm1081_vm12 = vweird.f32 %v1026_v45  ;;  %v1085_v36 = vand.u32 2147483647, %v1026_v45 }
 0x4e5   :  { %v1064_v48 = vmul.f32 %v1828_v42, %v1063_v50 }
 0x4e6   :  { %1677 = vmatmul.msk.f32.gmra.mxu2 %vm208_vm2, %v2847_v12  ;;  %vm1051_vm2 = vweird.f32 %v1024_v18  ;;  %v990_v63 = vpop.f32.mrf.mxu3  ;;  %v1088_v0 = vor.u32 1.1754944e-38, %v1087_v31  ;;  %vm1086_vm0 = vcmp.eq.f32.partialorder %v1085_v36, 8.507059e+37 }
 0x4e7   :  { %vm1053_vm6 = vmor %vm1051_vm2, %vm1052_vm5  ;;  %v1065_v59 = vadd.f32 %v1828_v42, %v1064_v48  ;;  %v1832_v58 = vpop.eup %1831  ;;  %v1666_v44 = vmul.f32 -1.442695, %v990_v63 }
 0x4e8   :  { %v1054_v35 = vsel %vm1053_vm6, %v1826_v21, %v1050_v28  ;;  %v1027_v51 = vadd.f32 1.0, %v1832_v58 }
 0x4e9   :  { %v2618_v54 = vsel %vm1056_vm7, %v1058_v46, %v1054_v35  ;;  %v1069_v40 = vsel %vm1068_vm10, %v1828_v42, %v1065_v59  ;;  %1835 = vpow2.f32 %v1666_v44 }
 0x4ea   :  { %v1834_v43 = vpop.eup %1833  ;;  %v2620_v61 = vsel %vm1071_vm11, %v1073_v53, %v1069_v40  ;;  %1837 = vrcp.f32 %v1027_v51  ;;  %vm1096_vm1 = vweird.f32 %v1027_v51  ;;  %v1100_v15 = vand.u32 2147483647, %v1027_v51 }
 0x4eb   :  { %v1077_v57 = vmul.f32 %v1834_v43, %v1026_v45  ;;  %vm1082_vm13 = vweird.f32 %v1834_v43  ;;  %v1102_v18 = vand.u32 2147483648, %v1027_v51 }
 0x4ec   :  { %vm1083_vm14 = vmor %vm1081_vm12, %vm1082_vm13  ;;  %vm1101_vm2 = vcmp.eq.f32.partialorder %v1100_v15, 8.507059e+37 }
 0x4ed   :  { %v1078_v55 = vsub.f32 1.0, %v1077_v57  ;;  %v1103_v24 = vor.u32 1.1754944e-38, %v1102_v18 }
 0x4ee   :  { %v993_v33 = vpop.f32.mrf.mxu3 }
 0x4ef   :  { %v1079_v47 = vmul.f32 %v1834_v43, %v1078_v55  ;;  %v1836_v62 = vpop.eup %1835  ;;  %v1667_v34 = vmul.f32 -1.442695, %v993_v33 }
 0x4f0   :  { %v1838_v52 = vpop.eup %1837  ;;  %v1028_v1 = vadd.f32 1.0, %v1836_v62 }
 0x4f1   :  { %v1080_v32 = vadd.f32 %v1834_v43, %v1079_v47  ;;  %v1092_v2 = vmul.f32 %v1838_v52, %v1027_v51  ;;  %vm1097_vm3 = vweird.f32 %v1838_v52 }
 0x4f2   :  { %vm2627_vm4 = vmor %vm1096_vm1, %vm1097_vm3  ;;  %vm1111_vm5 = vweird.f32 %v1028_v1  ;;  %v1115_v48 = vand.u32 2147483647, %v1028_v1  ;;  %v1117_v49 = vand.u32 2147483648, %v1028_v1 }
 0x4f3   :  { %v1084_v4 = vsel %vm1083_vm14, %v1834_v43, %v1080_v32  ;;  %v1093_v8 = vsub.f32 1.0, %v1092_v2 }
 0x4f4   :  { %v2622_v7 = vsel %vm1086_vm0, %v1088_v0, %v1084_v4  ;;  %vm1116_vm9 = vcmp.eq.f32.partialorder %v1115_v48, 8.507059e+37  ;;  %v1118_v44 = vor.u32 1.1754944e-38, %v1117_v49 }
 0x4f5   :  { %v1094_v10 = vmul.f32 %v1838_v52, %v1093_v8 }
 0x4f6   :  { %v996_v12 = vpop.f32.mrf.mxu3 }
 0x4f7   :  { %v1095_v14 = vadd.f32 %v1838_v52, %v1094_v10  ;;  %v1668_v22 = vmul.f32 -1.442695, %v996_v12 }
 0x4f9   :  { %v1099_v20 = vsel %vm2627_vm4, %v1838_v52, %v1095_v14 }
 0x4fa   :  { %v2638_v30 = vsel %vm1101_vm2, %v1103_v24, %v1099_v20 }
 0x531   :  { %v1172_v41 = vpop.f32.mrf.mxu2 }
 0x532   :  { %v1678_v56 = vmul.f32 -1.442695, %v1172_v41 }
 0x534   :  { %1839 = vpow2.f32 %v1678_v56 }
 0x535   :  { %1841 = vpow2.f32 %v1667_v34 }
 0x536   :  { %1843 = vrcp.f32 %v1028_v1 }
 0x539   :  { %v1175_v3 = vpop.f32.mrf.mxu2 }
 0x53a   :  { %v1840_v5 = vpop.eup %1839  ;;  %v1679_v6 = vmul.f32 -1.442695, %v1175_v3 }
 0x53b   :  { %v2624_v9 = vadd.f32 1.0, %v1840_v5  ;;  %v1842_v13 = vpop.eup %1841 }
 0x53c   :  { %1845 = vpow2.f32 %v1679_v6  ;;  %v1844_v16 = vpop.eup %1843  ;;  %v2631_v19 = vadd.f32 1.0, %v1842_v13 }
 0x53d   :  { %1847 = vrcp.f32 %v2624_v9  ;;  %v1107_v21 = vmul.f32 %v1844_v16, %v1028_v1  ;;  %vm1112_vm6 = vweird.f32 %v1844_v16  ;;  %v1237_v39 = vand.u32 2147483647, %v2624_v9 }
 0x53e   :  { %1849 = vrcp.f32 %v2631_v19  ;;  %v1239_v45 = vand.u32 2147483648, %v2624_v9  ;;  %vm2644_vm7 = vmor %vm1111_vm5, %vm1112_vm6  ;;  %vm1233_vm10 = vweird.f32 %v2624_v9  ;;  %vm1126_vm13 = vweird.f32 %v2631_v19 }
 0x53f   :  { %v1108_v27 = vsub.f32 1.0, %v1107_v21  ;;  %1851 = vpow2.f32 %v1668_v22  ;;  %vm1238_vm12 = vcmp.eq.f32.partialorder %v1237_v39, 8.507059e+37  ;;  %v1130_v0 = vand.u32 2147483647, %v2631_v19 }
 0x540   :  { %v1240_v55 = vor.u32 1.1754944e-38, %v1239_v45  ;;  %v1132_v1 = vand.u32 2147483648, %v2631_v19 }
 0x541   :  { %v1178_v23 = vpop.f32.mrf.mxu2  ;;  %v1109_v46 = vmul.f32 %v1844_v16, %v1108_v27  ;;  %vm1131_vm4 = vcmp.eq.f32.partialorder %v1130_v0, 8.507059e+37 }
 0x542   :  { %v1846_v25 = vpop.eup %1845  ;;  %v1680_v26 = vmul.f32 -1.442695, %v1178_v23 }
 0x543   :  { %v1848_v28 = vpop.eup %1847  ;;  %v2636_v29 = vadd.f32 1.0, %v1846_v25  ;;  %v1110_v60 = vadd.f32 %v1844_v16, %v1109_v46 }
 0x544   :  { %v1229_v42 = vmul.f32 %v1848_v28, %v2624_v9  ;;  %1853 = vpow2.f32 %v1680_v26  ;;  %v1850_v35 = vpop.eup %1849  ;;  %vm1234_vm8 = vweird.f32 %v1848_v28  ;;  %v1133_v9 = vor.u32 1.1754944e-38, %v1132_v1 }
 0x545   :  { %1855 = vrcp.f32 %v2636_v29  ;;  %v1852_v59 = vpop.eup %1851  ;;  %v1114_v63 = vsel %vm2644_vm7, %v1844_v16, %v1110_v60  ;;  %v1122_v58 = vmul.f32 %v1850_v35, %v2631_v19  ;;  %vm1235_vm11 = vmor %vm1233_vm10, %vm1234_vm8  ;;  %v1254_v32 = vand.u32 2147483648, %v2636_v29 }
 0x546   :  { %v1230_v38 = vsub.f32 1.0, %v1229_v42  ;;  %v2651_v40 = vadd.f32 1.0, %v1852_v59  ;;  %v2654_v31 = vsel %vm1116_vm9, %v1118_v44, %v1114_v63  ;;  %vm1127_vm14 = vweird.f32 %v1850_v35 }
 0x547   :  { %v1123_v57 = vsub.f32 1.0, %v1122_v58  ;;  %v1252_v3 = vand.u32 2147483647, %v2636_v29  ;;  %vm2665_vm1 = vmor %vm1126_vm13, %vm1127_vm14  ;;  %vm1248_vm3 = vweird.f32 %v2636_v29  ;;  %v1255_v17 = vor.u32 1.1754944e-38, %v1254_v32 }
 0x548   :  { %v1231_v37 = vmul.f32 %v1848_v28, %v1230_v38  ;;  %1857 = vrcp.f32 %v2651_v40  ;;  %vm1141_vm7 = vweird.f32 %v2651_v40  ;;  %v1147_v27 = vand.u32 2147483648, %v2651_v40 }
 0x549   :  { %v1181_v53 = vpop.f32.mrf.mxu2  ;;  %v1124_v52 = vmul.f32 %v1850_v35, %v1123_v57  ;;  %vm1253_vm5 = vcmp.eq.f32.partialorder %v1252_v3, 8.507059e+37  ;;  %v1145_v42 = vand.u32 2147483647, %v2651_v40 }
 0x54a   :  { %v1854_v51 = vpop.eup %1853  ;;  %v1232_v43 = vadd.f32 %v1848_v28, %v1231_v37  ;;  %v1681_v41 = vmul.f32 -1.442695, %v1181_v53  ;;  %v1148_v49 = vor.u32 1.1754944e-38, %v1147_v27 }
 0x54b   :  { %v1856_v56 = vpop.eup %1855  ;;  %v1222_v47 = vadd.f32 1.0, %v1854_v51  ;;  %v1125_v4 = vadd.f32 %v1850_v35, %v1124_v52  ;;  %vm1146_vm13 = vcmp.eq.f32.partialorder %v1145_v42, 8.507059e+37 }
 0x54c   :  { %v1236_v33 = vsel %vm1235_vm11, %v1848_v28, %v1232_v43  ;;  %v1244_v62 = vmul.f32 %v1856_v56, %v2636_v29  ;;  %1859 = vpow2.f32 %v1681_v41  ;;  %vm1249_vm0 = vweird.f32 %v1856_v56 }
 0x54d   :  { %v2658_v36 = vsel %vm1238_vm12, %v1240_v55, %v1236_v33  ;;  %1861 = vrcp.f32 %v1222_v47  ;;  %v1129_v14 = vsel %vm2665_vm1, %v1850_v35, %v1125_v4  ;;  %vm1250_vm2 = vmor %vm1248_vm3, %vm1249_vm0  ;;  %v1267_v24 = vand.u32 2147483647, %v1222_v47 }
 0x54e   :  { %v1245_v34 = vsub.f32 1.0, %v1244_v62  ;;  %v1858_v6 = vpop.eup %1857  ;;  %v2674_v19 = vsel %vm1131_vm4, %v1133_v9, %v1129_v14  ;;  %v1269_v26 = vand.u32 2147483648, %v1222_v47  ;;  %vm1263_vm9 = vweird.f32 %v1222_v47 }
 0x54f   :  { %v1137_v15 = vmul.f32 %v1858_v6, %v2651_v40  ;;  %vm1142_vm8 = vweird.f32 %v1858_v6  ;;  %vm1268_vm11 = vcmp.eq.f32.partialorder %v1267_v24, 8.507059e+37 }
 0x550   :  { %v1246_v2 = vmul.f32 %v1856_v56, %v1245_v34  ;;  %v1270_v50 = vor.u32 1.1754944e-38, %v1269_v26  ;;  %vm1143_vm12 = vmor %vm1141_vm7, %vm1142_vm8 }
 0x551   :  { %v1184_v8 = vpop.f32.mrf.mxu2  ;;  %v1138_v25 = vsub.f32 1.0, %v1137_v15 }
 0x552   :  { %v1860_v10 = vpop.eup %1859  ;;  %v1247_v12 = vadd.f32 %v1856_v56, %v1246_v2  ;;  %v1682_v13 = vmul.f32 -1.442695, %v1184_v8 }
 0x553   :  { %v1862_v16 = vpop.eup %1861  ;;  %v1223_v18 = vadd.f32 1.0, %v1860_v10  ;;  %v1139_v29 = vmul.f32 %v1858_v6, %v1138_v25 }
 0x554   :  { %v1251_v20 = vsel %vm1250_vm2, %v1856_v56, %v1247_v12  ;;  %v1259_v21 = vmul.f32 %v1862_v16, %v1222_v47  ;;  %1863 = vpow2.f32 %v1682_v13  ;;  %vm1264_vm6 = vweird.f32 %v1862_v16 }
 0x555   :  { %v2676_v22 = vsel %vm1253_vm5, %v1255_v17, %v1251_v20  ;;  %1865 = vrcp.f32 %v1223_v18  ;;  %vm1265_vm10 = vmor %vm1263_vm9, %vm1264_vm6  ;;  %v1140_v39 = vadd.f32 %v1858_v6, %v1139_v29  ;;  %v1284_v44 = vand.u32 2147483648, %v1223_v18 }
 0x556   :  { %v1260_v23 = vsub.f32 1.0, %v1259_v21  ;;  %v1282_v41 = vand.u32 2147483647, %v1223_v18  ;;  %vm1278_vm0 = vweird.f32 %v1223_v18 }
 0x557   :  { %v1144_v53 = vsel %vm1143_vm12, %v1858_v6, %v1140_v39  ;;  %v1285_v33 = vor.u32 1.1754944e-38, %v1284_v44 }
 0x558   :  { %v1261_v28 = vmul.f32 %v1862_v16, %v1260_v23  ;;  %v2685_v51 = vsel %vm1146_vm13, %v1148_v49, %v1144_v53  ;;  %vm1283_vm3 = vcmp.eq.f32.partialorder %v1282_v41, 8.507059e+37 }
 0x559   :  { %v1187_v46 = vpop.f32.mrf.mxu2 }
 0x55a   :  { %v1864_v38 = vpop.eup %1863  ;;  %v1262_v60 = vadd.f32 %v1862_v16, %v1261_v28  ;;  %v1683_v35 = vmul.f32 -1.442695, %v1187_v46 }
 0x55b   :  { %v1866_v45 = vpop.eup %1865  ;;  %v1224_v48 = vadd.f32 1.0, %v1864_v38 }
 0x55c   :  { %v1266_v59 = vsel %vm1265_vm10, %v1862_v16, %v1262_v60  ;;  %v1274_v37 = vmul.f32 %v1866_v45, %v1223_v18  ;;  %1867 = vpow2.f32 %v1683_v35  ;;  %vm1279_vm14 = vweird.f32 %v1866_v45 }
 0x55d   :  { %v2683_v63 = vsel %vm1268_vm11, %v1270_v50, %v1266_v59  ;;  %1869 = vrcp.f32 %v1224_v48  ;;  %vm1280_vm1 = vmor %vm1278_vm0, %vm1279_vm14  ;;  %v1299_v1 = vand.u32 2147483648, %v1224_v48  ;;  %v1297_v3 = vand.u32 2147483647, %v1224_v48 }
 0x55e   :  { %v1275_v58 = vsub.f32 1.0, %v1274_v37  ;;  %vm1293_vm2 = vweird.f32 %v1224_v48 }
 0x55f   :  { %v1300_v10 = vor.u32 1.1754944e-38, %v1299_v1  ;;  %vm1298_vm6 = vcmp.eq.f32.partialorder %v1297_v3, 8.507059e+37 }
 0x560   :  { %v1276_v43 = vmul.f32 %v1866_v45, %v1275_v58 }
 0x561   :  { %v1190_v57 = vpop.f32.mrf.mxu2 }
 0x562   :  { %v1868_v56 = vpop.eup %1867  ;;  %v1277_v40 = vadd.f32 %v1866_v45, %v1276_v43  ;;  %v1684_v55 = vmul.f32 -1.442695, %v1190_v57 }
 0x563   :  { %v1870_v47 = vpop.eup %1869  ;;  %v1225_v62 = vadd.f32 1.0, %v1868_v56 }
 0x564   :  { %v1281_v34 = vsel %vm1280_vm1, %v1866_v45, %v1277_v40  ;;  %v1289_v52 = vmul.f32 %v1870_v47, %v1224_v48  ;;  %1871 = vpow2.f32 %v1684_v55  ;;  %vm1294_vm4 = vweird.f32 %v1870_v47 }
 0x565   :  { %v2687_v32 = vsel %vm1283_vm3, %v1285_v33, %v1281_v34  ;;  %1873 = vrcp.f32 %v1225_v62  ;;  %vm1295_vm5 = vmor %vm1293_vm2, %vm1294_vm4  ;;  %v1314_v17 = vand.u32 2147483648, %v1225_v62  ;;  %v1312_v20 = vand.u32 2147483647, %v1225_v62 }
 0x566   :  { %v1290_v0 = vsub.f32 1.0, %v1289_v52  ;;  %vm1308_vm8 = vweird.f32 %v1225_v62 }
 0x567   :  { %v1315_v25 = vor.u32 1.1754944e-38, %v1314_v17  ;;  %vm1313_vm10 = vcmp.eq.f32.partialorder %v1312_v20, 8.507059e+37 }
 0x568   :  { %v1291_v2 = vmul.f32 %v1870_v47, %v1290_v0 }
 0x569   :  { %v1193_v4 = vpop.f32.mrf.mxu2 }
 0x56a   :  { %v1872_v5 = vpop.eup %1871  ;;  %v1292_v6 = vadd.f32 %v1870_v47, %v1291_v2  ;;  %v1685_v8 = vmul.f32 -1.442695, %v1193_v4 }
 0x56b   :  { %v1874_v9 = vpop.eup %1873  ;;  %v1226_v12 = vadd.f32 1.0, %v1872_v5 }
 0x56c   :  { %v1296_v13 = vsel %vm1295_vm5, %v1870_v47, %v1292_v6  ;;  %v1304_v14 = vmul.f32 %v1874_v9, %v1225_v62  ;;  %1875 = vpow2.f32 %v1685_v8  ;;  %vm1309_vm7 = vweird.f32 %v1874_v9 }
 0x56d   :  { %v2689_v15 = vsel %vm1298_vm6, %v1300_v10, %v1296_v13  ;;  %1877 = vrcp.f32 %v1226_v12  ;;  %vm1310_vm9 = vmor %vm1308_vm8, %vm1309_vm7  ;;  %v1329_v46 = vand.u32 2147483648, %v1226_v12  ;;  %v1327_v60 = vand.u32 2147483647, %v1226_v12 }
 0x56e   :  { %v1305_v16 = vsub.f32 1.0, %v1304_v14  ;;  %vm1323_vm12 = vweird.f32 %v1226_v12 }
 0x56f   :  { %v1330_v45 = vor.u32 1.1754944e-38, %v1329_v46  ;;  %vm1328_vm14 = vcmp.eq.f32.partialorder %v1327_v60, 8.507059e+37 }
 0x570   :  { %v1306_v18 = vmul.f32 %v1874_v9, %v1305_v16 }
 0x572   :  { %v1876_v21 = vpop.eup %1875  ;;  %v1307_v23 = vadd.f32 %v1874_v9, %v1306_v18 }
 0x573   :  { %v1878_v24 = vpop.eup %1877  ;;  %v1227_v26 = vadd.f32 1.0, %v1876_v21 }
 0x574   :  { %v1311_v27 = vsel %vm1310_vm9, %v1874_v9, %v1307_v23  ;;  %v1319_v28 = vmul.f32 %v1878_v24, %v1226_v12  ;;  %vm1324_vm11 = vweird.f32 %v1878_v24 }
 0x575   :  { %v2691_v29 = vsel %vm1313_vm10, %v1315_v25, %v1311_v27  ;;  %1879 = vrcp.f32 %v1227_v26  ;;  %vm1325_vm13 = vmor %vm1323_vm12, %vm1324_vm11  ;;  %v1344_v37 = vand.u32 2147483648, %v1227_v26  ;;  %v1342_v53 = vand.u32 2147483647, %v1227_v26 }
 0x576   :  { %v1320_v42 = vsub.f32 1.0, %v1319_v28  ;;  %vm1338_vm1 = vweird.f32 %v1227_v26 }
 0x577   :  { %v1345_v43 = vor.u32 1.1754944e-38, %v1344_v37  ;;  %vm1343_vm4 = vcmp.eq.f32.partialorder %v1342_v53, 8.507059e+37 }
 0x578   :  { %v1321_v38 = vmul.f32 %v1878_v24, %v1320_v42 }
 0x57a   :  { %v1322_v35 = vadd.f32 %v1878_v24, %v1321_v38 }
 0x57b   :  { %v1880_v39 = vpop.eup %1879 }
 0x57c   :  { %v1326_v50 = vsel %vm1325_vm13, %v1878_v24, %v1322_v35  ;;  %v1334_v48 = vmul.f32 %v1880_v39, %v1227_v26  ;;  %vm1339_vm0 = vweird.f32 %v1880_v39 }
 0x57d   :  { %v2693_v49 = vsel %vm1328_vm14, %v1330_v45, %v1326_v50  ;;  %vm1340_vm3 = vmor %vm1338_vm1, %vm1339_vm0 }
 0x57e   :  { %v1335_v59 = vsub.f32 1.0, %v1334_v48 }
 0x580   :  { %v1336_v58 = vmul.f32 %v1880_v39, %v1335_v59 }
 0x582   :  { %v1337_v44 = vadd.f32 %v1880_v39, %v1336_v58 }
 0x584   :  { %v1341_v41 = vsel %vm1340_vm3, %v1880_v39, %v1337_v44 }
 0x585   :  { %v2695_v57 = vsel %vm1343_vm4, %v1345_v43, %v1341_v41 }
 0x586 LB: > { %s1686_s15 = sshll.u32 %s1921_s2, 7  ;;  %s1353_s2 = sadd.s32 1, %s1921_s2   ;;  %s1921_s2 = sphi %s2697_s2, %s1353_s2  }
 0x587   : > { %s1355_s16 = sshra.s32 %s1686_s15, 7  ;;  %p1350_p1 = scmp.ge.s32.totalorder %s1353_s2, 2  }
 0x588   : > { %s2703_s17 = sshll.u32 %s1355_s16, 3  ;;  %s1539_s1 = sshll.u32 (%p1350_p1), %s2784_s8, 4  ;;  %s1540_s1 = int_to_ptr.hbm [resolvable:$true] %s1539_s1 }
 0x589   : > { %s1358_s20 = scalar_lea.vmem %s2782_s6, %s2703_s17  ;;  %s1428_s22 = scalar_lea.vmem %s2783_s7, %s2703_s17 }
 0x58a   : > { %v1360_v56 = vld [vmem:[%s1358_s20 + $0x10] sm:$0xff]  ;;  %v1359_v40 = vld [vmem:[%s1358_s20] sm:$0xff]  ;;  %s2749_s25 = scalar_lea.vmem %s2776_s0, %s2703_s17  ;;  %s2753_s26 = scalar_lea.vmem [#allocation2], %s2703_s17 }
 0x58b   : > { %1727 = vmatpush.msra.mxu2 %v1360_v56  ;;  %v1430_v55 = vld [vmem:[%s1428_s22 + $0x10] sm:$0xff]  ;;  %v1429_v47 = vld [vmem:[%s1428_s22] sm:$0xff]  ;;  %1400 = vmatpush.msra.mxu0 %v1360_v56  ;;  %s1925_s29 = smov (%p1350_p1), [#allocation2]   ;;  %s1926_s9 = smov (%p1350_p1), 256  }
 0x58c   : > { %1729 = vmatpush.msra.mxu3 %v1430_v55  ;;  %1469 = vmatpush.msra.mxu1 %v1430_v55  ;;  %v1706_v34 = vld [vmem:[%s2749_s25 + $0x80] sm:$0xff]  ;;  %v1707_v9 = vld [vmem:[%s2749_s25 + $0x90] sm:$0xff]  ;;  %s1537_s30 = sshll.u32 (%p1350_p1), %s1925_s29, 4  ;;  %s1927_s10 = smov (%p1350_p1), 16   ;;  %s1538_s30 = int_to_ptr.vmem [resolvable:$true] %s1537_s30 }
 0x58d   : > { %1728 = vmatpush.msra.mxu2 %v1359_v40  ;;  %1401 = vmatpush.msra.mxu0 %v1359_v40  ;;  %v1710_v3 = vld [vmem:[%s2749_s25 + $0xc0] sm:$0xff]  ;;  %v1711_v16 = vld [vmem:[%s2749_s25 + $0xd0] sm:$0xff] }
 0x58e   : > { %1730 = vmatpush.msra.mxu3 %v1429_v47  ;;  %1692 = vmatmul.msk.f32.vlgmr.msra.gmra.mxu2 %vm664_vm15, %v2638_v30  ;;  %v1708_v23 = vld [vmem:[%s2749_s25 + $0xa0] sm:$0xff]  ;;  %v1709_v35 = vld [vmem:[%s2749_s25 + $0xb0] sm:$0xff] }
 0x58f   : > { %1701 = vmatmul.msk.f32.vlgmr.msra.gmra.mxu3 %vm664_vm15, %v2689_v15  ;;  %1470 = vmatpush.msra.mxu1 %v1429_v47  ;;  %v1712_v28 = vld [vmem:[%s2749_s25 + $0xe0] sm:$0xff]  ;;  %v1713_v59 = vld [vmem:[%s2749_s25 + $0xf0] sm:$0xff] }
 0x590   : > { %1688 = vmatmul.msk.f32.vlgmr.msra.gmra.mxu0 %vm664_vm15, %v2614_v11  ;;  %1697 = vmatmul.msk.f32.vlgmr.msra.gmra.mxu1 %vm664_vm15, %v2658_v36 }
 0x596   : > { %1693 = vmatmul.msk.f32.gmra.mxu2 %vm664_vm15, %v2654_v31 }
 0x597   : > { %1702 = vmatmul.msk.f32.gmra.mxu3 %vm664_vm15, %v2691_v29 }
 0x598   : > { %1689 = vmatmul.msk.f32.gmra.mxu0 %vm664_vm15, %v2618_v54  ;;  %1698 = vmatmul.msk.f32.gmra.mxu1 %vm664_vm15, %v2676_v22 }
 0x59e   : > { %1694 = vmatmul.msk.f32.gmra.mxu2 %vm664_vm15, %v2674_v19 }
 0x59f   : > { %1703 = vmatmul.msk.f32.gmra.mxu3 %vm664_vm15, %v2693_v49 }
 0x5a0   : > { %1690 = vmatmul.msk.f32.gmra.mxu0 %vm664_vm15, %v2620_v61  ;;  %1699 = vmatmul.msk.f32.gmra.mxu1 %vm664_vm15, %v2683_v63 }
 0x5a6   : > { %1695 = vmatmul.msk.f32.gmra.mxu2 %vm664_vm15, %v2685_v51 }
 0x5a7   : > { %1704 = vmatmul.msk.f32.gmra.mxu3 %vm664_vm15, %v2695_v57 }
 0x5a8   : > { %1691 = vmatmul.msk.f32.gmra.mxu0 %vm664_vm15, %v2622_v7  ;;  %1700 = vmatmul.msk.f32.gmra.mxu1 %vm664_vm15, %v2687_v32 }
 0x60d   : > { %v1403_v33 = vpop.f32.mrf.mxu0  ;;  %v1472_v62 = vpop.f32.mrf.mxu1 }
 0x60e   : > { %v1496_v52 = vmul.f32 %v1472_v62, %v1403_v33 }
 0x610   : > { %v1515_v0 = vmul.f32 %v1706_v34, %v1496_v52 }
 0x611   : > { %v1415_v1 = vpop.f32.mrf.mxu2 }
 0x612   : > { %1715 = vst [vmem:[%s2753_s26 + $0x80] sm:$0xff] %v1515_v0  ;;  %v1484_v2 = vpop.f32.mrf.mxu3 }
 0x613   : > { %v1500_v4 = vmul.f32 %v1484_v2, %v1415_v1 }
 0x615   : > { %v1519_v5 = vmul.f32 %v1710_v3, %v1500_v4  ;;  %v1406_v6 = vpop.f32.mrf.mxu0  ;;  %v1475_v8 = vpop.f32.mrf.mxu1 }
 0x616   : > { %v1497_v10 = vmul.f32 %v1475_v8, %v1406_v6 }
 0x617   : > { %1719 = vst [vmem:[%s2753_s26 + $0xc0] sm:$0xff] %v1519_v5 }
 0x618   : > { %v1516_v12 = vmul.f32 %v1707_v9, %v1497_v10 }
 0x619   : > { %v1418_v13 = vpop.f32.mrf.mxu2 }
 0x61a   : > { %1716 = vst [vmem:[%s2753_s26 + $0x90] sm:$0xff] %v1516_v12  ;;  %v1487_v14 = vpop.f32.mrf.mxu3 }
 0x61b   : > { %v1501_v17 = vmul.f32 %v1487_v14, %v1418_v13 }
 0x61d   : > { %v1520_v18 = vmul.f32 %v1711_v16, %v1501_v17  ;;  %v1409_v20 = vpop.f32.mrf.mxu0  ;;  %v1478_v21 = vpop.f32.mrf.mxu1 }
 0x61e   : > { %v1498_v24 = vmul.f32 %v1478_v21, %v1409_v20 }
 0x61f   : > { %1720 = vst [vmem:[%s2753_s26 + $0xd0] sm:$0xff] %v1520_v18 }
 0x620   : > { %v1517_v25 = vmul.f32 %v1708_v23, %v1498_v24 }
 0x621   : > { %v1421_v26 = vpop.f32.mrf.mxu2 }
 0x622   : > { %1717 = vst [vmem:[%s2753_s26 + $0xa0] sm:$0xff] %v1517_v25  ;;  %v1490_v27 = vpop.f32.mrf.mxu3 }
 0x623   : > { %v1502_v42 = vmul.f32 %v1490_v27, %v1421_v26 }
 0x625   : > { %v1521_v46 = vmul.f32 %v1712_v28, %v1502_v42  ;;  %v1412_v38 = vpop.f32.mrf.mxu0  ;;  %v1481_v60 = vpop.f32.mrf.mxu1 }
 0x626   : > { %v1499_v39 = vmul.f32 %v1481_v60, %v1412_v38 }
 0x627   : > { %1721 = vst [vmem:[%s2753_s26 + $0xe0] sm:$0xff] %v1521_v46 }
 0x628   : > { %v1518_v45 = vmul.f32 %v1709_v35, %v1499_v39 }
 0x629   : > { %v1424_v50 = vpop.f32.mrf.mxu2 }
 0x62a   : > { %1718 = vst [vmem:[%s2753_s26 + $0xb0] sm:$0xff] %v1518_v45  ;;  %v1493_v48 = vpop.f32.mrf.mxu3 }
 0x62b   : > { %v1503_v37 = vmul.f32 %v1493_v48, %v1424_v50  ;;  %1352 = sbr.rel (!%p1350_p1) target bundleno = 1414 (0x586), region = 86 }
 0x62d   : > { %v1522_v58 = vmul.f32 %v1713_v59, %v1503_v37 }
 0x62f   : > { %1722 = vst [vmem:[%s2753_s26 + $0xf0] sm:$0xff] %v1522_v58 }
 0x630   :  { %1545 = dma.vmem_to_hbm [thread:$0]  %s1538_s30, 4096, %s1540_s1, [#allocation3], %s1926_s9, %s1926_s9, %s1927_s10  }
 0x631   :  { %1913 = dma.done.wait [#allocation3], 4096  }
 0x632   :  { %1914 = vsyncadd [#allocation3], 4294963200 }
 0x633   :  { %1550 = vsyncpa [#allocation3], 1 }

// kernel: tpu_custom_call.1
= control target key start
LH: loop header
LB: loop body
LE: loop exit
PB: predicated region body
PF: predicated region fallthrough
CT: control target
= control target key end

     0   :  { %13 = vsyncpa [#allocation3], 0  ;;  %v1923_v62 = vmov 0   ;;  %vm183_vm0 = vcmask 523264   ;;  %vm233_vm1 = vcmask 1043456   ;;  %vm208_vm2 = vcmask 31744   ;;  %s2776_s0 = inlined_call_operand.vmem [shape: f32[2,64,256], index: 0, kind: input, shape index: {}]   ;;  %s2777_s1 = inlined_call_operand.vmem [shape: f32[256,32], index: 1, kind: input, shape index: {}]   ;;  %s2778_s2 = inlined_call_operand.vmem [shape: f32[4,64], index: 2, kind: input, shape index: {}]   ;;  %s2779_s3 = inlined_call_operand.vmem [shape: f32[4,1], index: 3, kind: input, shape index: {}]   ;;  %s2780_s4 = inlined_call_operand.vmem [shape: f32[64,4], index: 4, kind: input, shape index: {}]   ;;  %s2781_s5 = inlined_call_operand.vmem [shape: f32[64,4], index: 5, kind: input, shape index: {}]   ;;  %s2782_s6 = inlined_call_operand.vmem [shape: f32[16,256], index: 6, kind: input, shape index: {}]   ;;  %s2783_s7 = inlined_call_operand.vmem [shape: f32[16,256], index: 7, kind: input, shape index: {}]   ;;  %s2784_s8 = inlined_call_operand.hbm [shape: f32[2,64,256], index: 8, kind: output, shape index: {}]  }
   0x1   :  { %v1976_v0 = vld [vmem:[%s2777_s1 + $0x78] sm:$0xff]  ;;  %v1988_v2 = vld [vmem:[%s2777_s1 + $0x70] sm:$0xff]  ;;  %v1998_v4 = vld [vmem:[%s2777_s1 + $0x68] sm:$0xff]  ;;  %1752 = vset.pattern.permute.xlu0 %v1923_v62 }
   0x2   :  { %v1981_v1 = vld [vmem:[%s2777_s1 + $0xf8] sm:$0xff]  ;;  %96 = vmatpush.msra.mxu0 %v1976_v0  ;;  %v1993_v3 = vld [vmem:[%s2777_s1 + $0xf0] sm:$0xff]  ;;  %v2003_v5 = vld [vmem:[%s2777_s1 + $0xe8] sm:$0xff] }
   0x3   :  { %137 = vmatpush.msra.mxu1 %v1981_v1  ;;  %v2010_v6 = vld [vmem:[%s2777_s1 + $0x60] sm:$0xff]  ;;  %v2022_v8 = vld [vmem:[%s2777_s1 + $0x58] sm:$0xff]  ;;  %v2034_v10 = vld [vmem:[%s2777_s1 + $0x50] sm:$0xff] }
   0x4   :  { %97 = vmatpush.msra.mxu0 %v1988_v2  ;;  %v2015_v7 = vld [vmem:[%s2777_s1 + $0xe0] sm:$0xff]  ;;  %v2027_v9 = vld [vmem:[%s2777_s1 + $0xd8] sm:$0xff]  ;;  %v2039_v11 = vld [vmem:[%s2777_s1 + $0xd0] sm:$0xff] }
   0x5   :  { %138 = vmatpush.msra.mxu1 %v1993_v3  ;;  %v2046_v12 = vld [vmem:[%s2777_s1 + $0x48] sm:$0xff]  ;;  %v2058_v14 = vld [vmem:[%s2777_s1 + $0x40] sm:$0xff]  ;;  %v2070_v16 = vld [vmem:[%s2777_s1 + $0x38] sm:$0xff] }
   0x6   :  { %98 = vmatpush.msra.mxu0 %v1998_v4  ;;  %v2051_v13 = vld [vmem:[%s2777_s1 + $0xc8] sm:$0xff]  ;;  %v2063_v15 = vld [vmem:[%s2777_s1 + $0xc0] sm:$0xff]  ;;  %v2075_v17 = vld [vmem:[%s2777_s1 + $0xb8] sm:$0xff] }
   0x7   :  { %139 = vmatpush.msra.mxu1 %v2003_v5  ;;  %v2082_v18 = vld [vmem:[%s2777_s1 + $0x30] sm:$0xff]  ;;  %v2094_v20 = vld [vmem:[%s2777_s1 + $0x28] sm:$0xff]  ;;  %v2106_v22 = vld [vmem:[%s2777_s1 + $0x20] sm:$0xff] }
   0x8   :  { %99 = vmatpush.msra.mxu0 %v2010_v6  ;;  %v2087_v19 = vld [vmem:[%s2777_s1 + $0xb0] sm:$0xff]  ;;  %v2099_v21 = vld [vmem:[%s2777_s1 + $0xa8] sm:$0xff]  ;;  %v2111_v23 = vld [vmem:[%s2777_s1 + $0xa0] sm:$0xff] }
   0x9   :  { %140 = vmatpush.msra.mxu1 %v2015_v7  ;;  %v2118_v24 = vld [vmem:[%s2777_s1 + $0x18] sm:$0xff]  ;;  %v2130_v26 = vld [vmem:[%s2777_s1 + $0x10] sm:$0xff]  ;;  %v2142_v28 = vld [vmem:[%s2777_s1 + $0x8] sm:$0xff] }
   0xa   :  { %100 = vmatpush.msra.mxu0 %v2022_v8  ;;  %v2123_v25 = vld [vmem:[%s2777_s1 + $0x98] sm:$0xff]  ;;  %v2135_v27 = vld [vmem:[%s2777_s1 + $0x90] sm:$0xff]  ;;  %v2147_v29 = vld [vmem:[%s2777_s1 + $0x88] sm:$0xff] }
   0xb   :  { %141 = vmatpush.msra.mxu1 %v2027_v9  ;;  %v2154_v30 = vld [vmem:[%s2777_s1] sm:$0xff]  ;;  %v81_v33 = vld [vmem:[%s2776_s0 + $0x8] sm:$0xff]  ;;  %v82_v34 = vld [vmem:[%s2776_s0 + $0x10] sm:$0xff] }
   0xc   :  { %101 = vmatpush.msra.mxu0 %v2034_v10  ;;  %v2159_v31 = vld [vmem:[%s2777_s1 + $0x80] sm:$0xff]  ;;  %v83_v35 = vld [vmem:[%s2776_s0 + $0x18] sm:$0xff]  ;;  %v85_v37 = vld [vmem:[%s2776_s0 + $0x28] sm:$0xff] }
   0xd   :  { %142 = vmatpush.msra.mxu1 %v2039_v11  ;;  %2804 = vst [vmem:[#allocation5_spill] sm:$0xff] %v2159_v31  ;;  %v80_v32 = vld [vmem:[%s2776_s0] sm:$0xff]  ;;  %v86_v38 = vld [vmem:[%s2776_s0 + $0x30] sm:$0xff]  ;;  %v87_v39 = vld [vmem:[%s2776_s0 + $0x38] sm:$0xff] }
   0xe   :  { %102 = vmatpush.msra.mxu0 %v2046_v12  ;;  %v84_v36 = vld [vmem:[%s2776_s0 + $0x20] sm:$0xff]  ;;  %v89_v41 = vld [vmem:[%s2776_s0 + $0x48] sm:$0xff]  ;;  %v90_v42 = vld [vmem:[%s2776_s0 + $0x50] sm:$0xff] }
   0xf   :  { %143 = vmatpush.msra.mxu1 %v2051_v13  ;;  %v88_v40 = vld [vmem:[%s2776_s0 + $0x40] sm:$0xff]  ;;  %v91_v43 = vld [vmem:[%s2776_s0 + $0x58] sm:$0xff]  ;;  %v93_v45 = vld [vmem:[%s2776_s0 + $0x68] sm:$0xff] }
  0x10   :  { %103 = vmatpush.msra.mxu0 %v2058_v14  ;;  %v92_v44 = vld [vmem:[%s2776_s0 + $0x60] sm:$0xff]  ;;  %v94_v46 = vld [vmem:[%s2776_s0 + $0x70] sm:$0xff]  ;;  %v95_v47 = vld [vmem:[%s2776_s0 + $0x78] sm:$0xff] }
  0x11   :  { %144 = vmatpush.msra.mxu1 %v2063_v15  ;;  %v63_v61 = vld [vmem:[%s2779_s3] sm:$0xf] }
  0x12   :  { %104 = vmatpush.msra.mxu0 %v2070_v16  ;;  %180 = vperm.xlu0 %1752, %v63_v61   ;;  %v2316_v62 = vld [vmem:[%s2781_s5 + $0x20] sm:$0xff] }
  0x13   :  { %145 = vmatpush.msra.mxu1 %v2075_v17  ;;  %2819 = vst [vmem:[#allocation20_spill] sm:$0xff] %v2316_v62 }
  0x14   :  { %105 = vmatpush.msra.mxu0 %v2082_v18 }
  0x15   :  { %146 = vmatpush.msra.mxu1 %v2087_v19 }
  0x16   :  { %106 = vmatpush.msra.mxu0 %v2094_v20 }
  0x17   :  { %147 = vmatpush.msra.mxu1 %v2099_v21 }
  0x18   :  { %107 = vmatpush.msra.mxu0 %v2106_v22 }
  0x19   :  { %148 = vmatpush.msra.mxu1 %v2111_v23 }
  0x1a   :  { %108 = vmatpush.msra.mxu0 %v2118_v24 }
  0x1b   :  { %149 = vmatpush.msra.mxu1 %v2123_v25 }
  0x1c   :  { %109 = vmatpush.msra.mxu0 %v2130_v26 }
  0x1d   :  { %150 = vmatpush.msra.mxu1 %v2135_v27 }
  0x1e   :  { %110 = vmatpush.msra.mxu0 %v2142_v28 }
  0x1f   :  { %151 = vmatpush.msra.mxu1 %v2147_v29 }
  0x20   :  { %111 = vmatpush.msra.mxu0 %v2154_v30 }
  0x21   :  { %152 = vmatpush.msra.mxu1 %v2159_v31  ;;  %112 = vmatmul.f32.vlgmr.msra.gmra.mxu0 %v80_v32 }
  0x22   :  { %153 = vmatmul.f32.vlgmr.msra.gmra.mxu1 %v81_v33 }
  0x29   :  { %115 = vmatmul.f32.gmra.mxu0 %v82_v34 }
  0x2a   :  { %156 = vmatmul.f32.gmra.mxu1 %v83_v35 }
  0x31   :  { %118 = vmatmul.f32.gmra.mxu0 %v84_v36 }
  0x32   :  { %159 = vmatmul.f32.gmra.mxu1 %v85_v37 }
  0x39   :  { %121 = vmatmul.f32.gmra.mxu0 %v86_v38 }
  0x3a   :  { %162 = vmatmul.f32.gmra.mxu1 %v87_v39 }
  0x41   :  { %124 = vmatmul.f32.gmra.mxu0 %v88_v40 }
  0x42   :  { %165 = vmatmul.f32.gmra.mxu1 %v89_v41 }
  0x49   :  { %127 = vmatmul.f32.gmra.mxu0 %v90_v42  ;;  %v2219_v42 = vld [vmem:[%s2778_s2] sm:$0xf]  ;;  %s1924_s2 = smov 112  }
  0x4a   :  { %168 = vmatmul.f32.gmra.mxu1 %v91_v43  ;;  %2805 = vst [vmem:[#allocation6_spill] sm:$0xff] %v2219_v42 }
  0x51   :  { %130 = vmatmul.f32.gmra.mxu0 %v92_v44 }
  0x52   :  { %171 = vmatmul.f32.gmra.mxu1 %v93_v45 }
  0x59   :  { %133 = vmatmul.f32.gmra.mxu0 %v94_v46 }
  0x5a   :  { %174 = vmatmul.f32.gmra.mxu1 %v95_v47  ;;  %v2229_v47 = vld [vmem:[%s2780_s4] sm:$0xff] }
  0x5b   :  { %2807 = vst [vmem:[#allocation8_spill] sm:$0xff] %v2229_v47 }
  0x84   :  { %v2223_v43 = vpop.permute.xlu0 %180 }
  0x85   :  { %2806 = vst [vmem:[#allocation7_spill] sm:$0xff] %v2223_v43 }
  0x9e   :  { %v113_v48 = vpop.f32.mrf.mxu0 }
  0x9f   :  { %v154_v49 = vpop.f32.mrf.mxu1 }
  0xa0   :  { %v155_v50 = vadd.f32 %v154_v49, %v113_v48  ;;  %v2238_v48 = vld [vmem:[%s2780_s4 + $0x8] sm:$0xff]  ;;  %v2245_v49 = vld [vmem:[%s2780_s4 + $0x10] sm:$0xff] }
  0xa1   :  { %2808 = vst [vmem:[#allocation9_spill] sm:$0xff] %v2238_v48 }
  0xa2   :  { %2809 = vst [vmem:[#allocation10_spill] sm:$0xff] %v2245_v49 }
  0xa6   :  { %v116_v51 = vpop.f32.mrf.mxu0 }
  0xa7   :  { %v157_v52 = vpop.f32.mrf.mxu1 }
  0xa8   :  { %v158_v41 = vadd.f32 %v157_v52, %v116_v51  ;;  %v2259_v51 = vld [vmem:[%s2780_s4 + $0x20] sm:$0xff]  ;;  %v2266_v52 = vld [vmem:[%s2780_s4 + $0x28] sm:$0xff] }
  0xa9   :  { %2811 = vst [vmem:[#allocation12_spill] sm:$0xff] %v2259_v51 }
  0xaa   :  { %2812 = vst [vmem:[#allocation13_spill] sm:$0xff] %v2266_v52 }
  0xae   :  { %v119_v53 = vpop.f32.mrf.mxu0 }
  0xaf   :  { %v160_v54 = vpop.f32.mrf.mxu1 }
  0xb0   :  { %v161_v40 = vadd.f32 %v160_v54, %v119_v53  ;;  %v2273_v53 = vld [vmem:[%s2781_s5] sm:$0xff] }
  0xb1   :  { %2813 = vst [vmem:[#allocation14_spill] sm:$0xff] %v2273_v53 }
  0xb6   :  { %v122_v55 = vpop.f32.mrf.mxu0 }
  0xb7   :  { %v163_v56 = vpop.f32.mrf.mxu1 }
  0xb8   :  { %v164_v39 = vadd.f32 %v163_v56, %v122_v55  ;;  %v2281_v55 = vld [vmem:[%s2780_s4 + $0x30] sm:$0xff]  ;;  %v2288_v56 = vld [vmem:[%s2781_s5 + $0x8] sm:$0xff] }
  0xb9   :  { %2814 = vst [vmem:[#allocation15_spill] sm:$0xff] %v2281_v55 }
  0xba   :  { %2815 = vst [vmem:[#allocation16_spill] sm:$0xff] %v2288_v56 }
  0xbe   :  { %v125_v57 = vpop.f32.mrf.mxu0 }
  0xbf   :  { %v166_v58 = vpop.f32.mrf.mxu1 }
  0xc0   :  { %v167_v38 = vadd.f32 %v166_v58, %v125_v57  ;;  %v2295_v57 = vld [vmem:[%s2780_s4 + $0x38] sm:$0xff]  ;;  %v2302_v58 = vld [vmem:[%s2781_s5 + $0x10] sm:$0xff] }
  0xc1   :  { %2816 = vst [vmem:[#allocation17_spill] sm:$0xff] %v2295_v57 }
  0xc2   :  { %2817 = vst [vmem:[#allocation18_spill] sm:$0xff] %v2302_v58 }
  0xc6   :  { %v128_v59 = vpop.f32.mrf.mxu0 }
  0xc7   :  { %v169_v60 = vpop.f32.mrf.mxu1 }
  0xc8   :  { %v170_v37 = vadd.f32 %v169_v60, %v128_v59  ;;  %v2309_v59 = vld [vmem:[%s2781_s5 + $0x18] sm:$0xff] }
  0xc9   :  { %2818 = vst [vmem:[#allocation19_spill] sm:$0xff] %v2309_v59 }
  0xce   :  { %v131_v63 = vpop.f32.mrf.mxu0 }
  0xcf   :  { %v172_v32 = vpop.f32.mrf.mxu1 }
  0xd0   :  { %v173_v36 = vadd.f32 %v172_v32, %v131_v63 }
  0xd6   :  { %v134_v33 = vpop.f32.mrf.mxu0 }
  0xd7   :  { %v175_v34 = vpop.f32.mrf.mxu1 }
  0xd8   :  { %v176_v35 = vadd.f32 %v175_v34, %v134_v33  ;;  %v2323_v33 = vld [vmem:[%s2781_s5 + $0x28] sm:$0xff] }
  0xd9   :  { %2820 = vst [vmem:[#allocation21_spill] sm:$0xff] %v2323_v33 }
  0xda   :  { %195 = vmatpush.msra.mxu2 %v176_v35 }
  0xdc   :  { %196 = vmatpush.msra.mxu2 %v173_v36 }
  0xde   :  { %197 = vmatpush.msra.mxu2 %v170_v37  ;;  %v2330_v37 = vld [vmem:[%s2781_s5 + $0x30] sm:$0xff] }
  0xdf   :  { %2821 = vst [vmem:[#allocation22_spill] sm:$0xff] %v2330_v37 }
  0xe0   :  { %198 = vmatpush.msra.mxu2 %v167_v38 }
  0xe2   :  { %199 = vmatpush.msra.mxu2 %v164_v39 }
  0xe4   :  { %200 = vmatpush.msra.mxu2 %v161_v40 }
  0xe6   :  { %201 = vmatpush.msra.mxu2 %v158_v41 }
  0xe8   :  { %202 = vmatpush.msra.mxu2 %v155_v50  ;;  %v2252_v50 = vld [vmem:[%s2780_s4 + $0x18] sm:$0xff] }
  0xe9   :  { %1579 = vmatmul.msk.f32.vlgmr.msra.gmra.mxu2 %vm183_vm0, %v2219_v42  ;;  %2810 = vst [vmem:[#allocation11_spill] sm:$0xff] %v2252_v50 }
 0x16c   :  { %v204_v44 = vpop.f32.mrf.mxu2 }
 0x16d   :  { %v205_v45 = vadd.f32 %v204_v44, %v2223_v43 }
 0x16f   :  { %v207_v46 = vmax.f32 %v205_v45, 0.0 }
 0x171   :  { %430 = vrot.lane.b32.xlu0 %v207_v46, %s1924_s2  ;;  %1580 = vmatpush.msk.msra.mxu3 %vm233_vm1, %v207_v46 }
 0x172   :  { %1581 = vmatmul.msk.f32.vlgmr.msra.gmra.mxu3 %vm208_vm2, %v2229_v47 }
 0x17a   :  { %1582 = vmatmul.msk.f32.gmra.mxu3 %vm208_vm2, %v2238_v48 }
 0x182   :  { %1583 = vmatmul.msk.f32.gmra.mxu3 %vm208_vm2, %v2245_v49 }
 0x18a   :  { %1584 = vmatmul.msk.f32.gmra.mxu3 %vm208_vm2, %v2252_v50 }
 0x192   :  { %1585 = vmatmul.msk.f32.gmra.mxu3 %vm208_vm2, %v2259_v51 }
 0x19a   :  { %1586 = vmatmul.msk.f32.gmra.mxu3 %vm208_vm2, %v2266_v52 }
 0x1a2   :  { %1587 = vmatmul.msk.f32.gmra.mxu3 %vm208_vm2, %v2281_v55 }
 0x1aa   :  { %1588 = vmatmul.msk.f32.gmra.mxu3 %vm208_vm2, %v2295_v57 }
 0x1e3   :  { %v431_v54 = vpop.permute.xlu0 %430 }
 0x1e4   :  { %1597 = vmatpush.msk.msrb.mxu2 %vm233_vm1, %v431_v54  ;;  %v2339_v54 = vld [vmem:[%s2781_s5 + $0x38] sm:$0xff]  ;;  %s2422_s5 = smov 0  }
 0x1e5   :  { %1598 = vmatmul.msk.f32.vlgmr.msrb.gmra.mxu2 %vm208_vm2, %v2273_v53  ;;  %2822 = vst [vmem:[#allocation23_spill] sm:$0xff] %v2339_v54 }
 0x1ed   :  { %1599 = vmatmul.msk.f32.gmra.mxu2 %vm208_vm2, %v2288_v56 }
 0x1f5   :  { %1600 = vmatmul.msk.f32.gmra.mxu2 %vm208_vm2, %v2302_v58  ;;  %v254_v60 = vpop.f32.mrf.mxu3 }
 0x1f6   :  { %v1589_v61 = vmul.f32 -1.442695, %v254_v60 }
 0x1f8   :  { %1753 = vpow2.f32 %v1589_v61 }
 0x1fd   :  { %1601 = vmatmul.msk.f32.gmra.mxu2 %vm208_vm2, %v2309_v59  ;;  %v257_v60 = vpop.f32.mrf.mxu3 }
 0x1fe   :  { %v1754_v63 = vpop.eup %1753  ;;  %v1590_v61 = vmul.f32 -1.442695, %v257_v60 }
 0x1ff   :  { %v302_v32 = vadd.f32 1.0, %v1754_v63 }
 0x201   :  { %1755 = vrcp.f32 %v302_v32  ;;  %v321_v36 = vand.u32 2147483648, %v302_v32  ;;  %vm315_vm3 = vweird.f32 %v302_v32  ;;  %v319_v39 = vand.u32 2147483647, %v302_v32 }
 0x202   :  { %1757 = vpow2.f32 %v1590_v61 }
 0x203   :  { %v322_v41 = vor.u32 1.1754944e-38, %v321_v36  ;;  %vm320_vm6 = vcmp.eq.f32.partialorder %v319_v39, 8.507059e+37 }
 0x205   :  { %1602 = vmatmul.msk.f32.gmra.mxu2 %vm208_vm2, %v2316_v62  ;;  %v260_v63 = vpop.f32.mrf.mxu3 }
 0x207   :  { %v1756_v34 = vpop.eup %1755 }
 0x208   :  { %v311_v35 = vmul.f32 %v1756_v34, %v302_v32  ;;  %vm316_vm4 = vweird.f32 %v1756_v34  ;;  %v1758_v32 = vpop.eup %1757 }
 0x209   :  { %vm317_vm5 = vmor %vm315_vm3, %vm316_vm4  ;;  %v303_v36 = vadd.f32 1.0, %v1758_v32 }
 0x20a   :  { %v312_v38 = vsub.f32 1.0, %v311_v35  ;;  %v1591_v35 = vmul.f32 -1.442695, %v260_v63 }
 0x20b   :  { %vm330_vm7 = vweird.f32 %v303_v36  ;;  %v334_v60 = vand.u32 2147483647, %v303_v36 }
 0x20c   :  { %v313_v40 = vmul.f32 %v1756_v34, %v312_v38  ;;  %1759 = vpow2.f32 %v1591_v35 }
 0x20d   :  { %1603 = vmatmul.msk.f32.gmra.mxu2 %vm208_vm2, %v2323_v33  ;;  %1761 = vrcp.f32 %v303_v36  ;;  %v263_v38 = vpop.f32.mrf.mxu3  ;;  %vm335_vm10 = vcmp.eq.f32.partialorder %v334_v60, 8.507059e+37 }
 0x20e   :  { %v314_v44 = vadd.f32 %v1756_v34, %v313_v40 }
 0x210   :  { %v318_v45 = vsel %vm317_vm5, %v1756_v34, %v314_v44 }
 0x211   :  { %v2334_v46 = vsel %vm320_vm6, %v322_v41, %v318_v45  ;;  %v1592_v41 = vmul.f32 -1.442695, %v263_v38 }
 0x212   :  { %v1760_v34 = vpop.eup %1759 }
 0x213   :  { %v1762_v39 = vpop.eup %1761  ;;  %v304_v40 = vadd.f32 1.0, %v1760_v34 }
 0x214   :  { %v326_v44 = vmul.f32 %v1762_v39, %v303_v36  ;;  %vm331_vm8 = vweird.f32 %v1762_v39 }
 0x215   :  { %1604 = vmatmul.msk.f32.gmra.mxu2 %vm208_vm2, %v2330_v37  ;;  %1763 = vrcp.f32 %v304_v40  ;;  %v266_v61 = vpop.f32.mrf.mxu3  ;;  %vm332_vm9 = vmor %vm330_vm7, %vm331_vm8  ;;  %vm345_vm11 = vweird.f32 %v304_v40 }
 0x216   :  { %v327_v45 = vsub.f32 1.0, %v326_v44  ;;  %1765 = vpow2.f32 %v1592_v41  ;;  %v1593_v35 = vmul.f32 -1.442695, %v266_v61 }
 0x218   :  { %v328_v37 = vmul.f32 %v1762_v39, %v327_v45  ;;  %1767 = vpow2.f32 %v1593_v35 }
 0x21a   :  { %v329_v33 = vadd.f32 %v1762_v39, %v328_v37  ;;  %v351_v37 = vand.u32 2147483648, %v304_v40 }
 0x21b   :  { %v1764_v63 = vpop.eup %1763 }
 0x21c   :  { %v1766_v62 = vpop.eup %1765  ;;  %v333_v59 = vsel %vm332_vm9, %v1762_v39, %v329_v33  ;;  %v341_v34 = vmul.f32 %v1764_v63, %v304_v40  ;;  %vm346_vm12 = vweird.f32 %v1764_v63 }
 0x21d   :  { %1605 = vmatmul.msk.f32.gmra.mxu2 %vm208_vm2, %v2339_v54  ;;  %v336_v54 = vand.u32 2147483648, %v303_v36  ;;  %v305_v58 = vadd.f32 1.0, %v1766_v62  ;;  %v349_v36 = vand.u32 2147483647, %v304_v40  ;;  %v269_v56 = vpop.f32.mrf.mxu3  ;;  %vm347_vm13 = vmor %vm345_vm11, %vm346_vm12 }
 0x21e   :  { %v342_v41 = vsub.f32 1.0, %v341_v34  ;;  %v1768_v53 = vpop.eup %1767  ;;  %v1594_v61 = vmul.f32 -1.442695, %v269_v56 }
 0x21f   :  { %v337_v32 = vor.u32 1.1754944e-38, %v336_v54  ;;  %1769 = vrcp.f32 %v305_v58  ;;  %v352_v54 = vor.u32 1.1754944e-38, %v351_v37  ;;  %vm350_vm14 = vcmp.eq.f32.partialorder %v349_v36, 8.507059e+37 }
 0x220   :  { %v343_v44 = vmul.f32 %v1764_v63, %v342_v41  ;;  %v306_v39 = vadd.f32 1.0, %v1768_v53  ;;  %1771 = vpow2.f32 %v1594_v61  ;;  %v366_v40 = vand.u32 2147483648, %v305_v58 }
 0x221   :  { %v2343_v38 = vsel %vm335_vm10, %v337_v32, %v333_v59  ;;  %vm360_vm15 = vweird.f32 %v305_v58  ;;  %v364_v56 = vand.u32 2147483647, %v305_v58 }
 0x222   :  { %v344_v45 = vadd.f32 %v1764_v63, %v343_v44  ;;  %1773 = vrcp.f32 %v306_v39  ;;  %vm375_vm6 = vweird.f32 %v306_v39 }
 0x223   :  { %vm365_vm5 = vcmp.eq.f32.partialorder %v364_v56, 8.507059e+37 }
 0x224   :  { %v348_v33 = vsel %vm347_vm13, %v1764_v63, %v344_v45  ;;  %v367_v45 = vor.u32 1.1754944e-38, %v366_v40 }
 0x225   :  { %v1770_v59 = vpop.eup %1769  ;;  %v2345_v60 = vsel %vm350_vm14, %v352_v54, %v348_v33  ;;  %v272_v44 = vpop.f32.mrf.mxu3 }
 0x226   :  { %v356_v32 = vmul.f32 %v1770_v59, %v305_v58  ;;  %v1772_v57 = vpop.eup %1771  ;;  %vm361_vm3 = vweird.f32 %v1770_v59  ;;  %v1595_v63 = vmul.f32 -1.442695, %v272_v44  ;;  %v379_v44 = vand.u32 2147483647, %v306_v39 }
 0x227   :  { %vm362_vm4 = vmor %vm360_vm15, %vm361_vm3  ;;  %v307_v36 = vadd.f32 1.0, %v1772_v57 }
 0x228   :  { %v357_v34 = vsub.f32 1.0, %v356_v32  ;;  %v1774_v37 = vpop.eup %1773  ;;  %vm380_vm9 = vcmp.eq.f32.partialorder %v379_v44, 8.507059e+37 }
 0x229   :  { %v371_v54 = vmul.f32 %v1774_v37, %v306_v39  ;;  %vm376_vm7 = vweird.f32 %v1774_v37  ;;  %vm390_vm10 = vweird.f32 %v307_v36 }
 0x22a   :  { %v358_v41 = vmul.f32 %v1770_v59, %v357_v34  ;;  %vm2352_vm8 = vmor %vm375_vm6, %vm376_vm7 }
 0x22b   :  { %v372_v34 = vsub.f32 1.0, %v371_v54 }
 0x22c   :  { %v359_v53 = vadd.f32 %v1770_v59, %v358_v41 }
 0x22d   :  { %v373_v58 = vmul.f32 %v1774_v37, %v372_v34  ;;  %v275_v41 = vpop.f32.mrf.mxu3 }
 0x22e   :  { %v363_v33 = vsel %vm362_vm4, %v1770_v59, %v359_v53 }
 0x22f   :  { %v374_v57 = vadd.f32 %v1774_v37, %v373_v58 }
 0x268   :  { %v475_v62 = vpop.f32.mrf.mxu2 }
 0x269   :  { %v1606_v35 = vmul.f32 -1.442695, %v475_v62 }
 0x26b   :  { %1775 = vpow2.f32 %v1606_v35  ;;  %v2347_v35 = vsel %vm365_vm5, %v367_v45, %v363_v33  ;;  %v378_v45 = vsel %vm2352_vm8, %v1774_v37, %v374_v57 }
 0x26c   :  { %1777 = vpow2.f32 %v1595_v63  ;;  %v381_v63 = vand.u32 2147483648, %v306_v39 }
 0x26d   :  { %1779 = vrcp.f32 %v307_v36 }
 0x270   :  { %v478_v61 = vpop.f32.mrf.mxu2 }
 0x271   :  { %v1776_v62 = vpop.eup %1775  ;;  %v1607_v32 = vmul.f32 -1.442695, %v478_v61  ;;  %v1596_v61 = vmul.f32 -1.442695, %v275_v41 }
 0x272   :  { %v2349_v55 = vadd.f32 1.0, %v1776_v62  ;;  %v1778_v40 = vpop.eup %1777  ;;  %v382_v62 = vor.u32 1.1754944e-38, %v381_v63 }
 0x273   :  { %1781 = vpow2.f32 %v1607_v32  ;;  %v1780_v56 = vpop.eup %1779  ;;  %v2356_v53 = vadd.f32 1.0, %v1778_v40 }
 0x274   :  { %1783 = vrcp.f32 %v2349_v55  ;;  %v386_v54 = vmul.f32 %v1780_v56, %v307_v36  ;;  %v2363_v39 = vsel %vm380_vm9, %v382_v62, %v378_v45  ;;  %vm391_vm11 = vweird.f32 %v1780_v56 }
 0x275   :  { %1785 = vrcp.f32 %v2356_v53  ;;  %v540_v59 = vand.u32 2147483647, %v2349_v55  ;;  %v542_v63 = vand.u32 2147483648, %v2349_v55  ;;  %vm2369_vm12 = vmor %vm390_vm10, %vm391_vm11  ;;  %v394_v45 = vand.u32 2147483647, %v307_v36 }
 0x276   :  { %v387_v58 = vsub.f32 1.0, %v386_v54  ;;  %1787 = vpow2.f32 %v1596_v61  ;;  %v396_v61 = vand.u32 2147483648, %v307_v36  ;;  %vm536_vm15 = vweird.f32 %v2349_v55 }
 0x277   :  { %vm395_vm14 = vcmp.eq.f32.partialorder %v394_v45, 8.507059e+37  ;;  %vm541_vm4 = vcmp.eq.f32.partialorder %v540_v59, 8.507059e+37  ;;  %vm405_vm5 = vweird.f32 %v2356_v53 }
 0x278   :  { %v481_v33 = vpop.f32.mrf.mxu2  ;;  %v388_v37 = vmul.f32 %v1780_v56, %v387_v58 }
 0x279   :  { %v1782_v32 = vpop.eup %1781  ;;  %v1608_v34 = vmul.f32 -1.442695, %v481_v33 }
 0x27a   :  { %v1784_v52 = vpop.eup %1783  ;;  %v2361_v51 = vadd.f32 1.0, %v1782_v32  ;;  %v389_v57 = vadd.f32 %v1780_v56, %v388_v37 }
 0x27b   :  { %v532_v40 = vmul.f32 %v1784_v52, %v2349_v55  ;;  %1789 = vpow2.f32 %v1608_v34  ;;  %v1786_v44 = vpop.eup %1785  ;;  %vm537_vm13 = vweird.f32 %v1784_v52 }
 0x27c   :  { %1791 = vrcp.f32 %v2361_v51  ;;  %v1788_v33 = vpop.eup %1787  ;;  %v393_v32 = vsel %vm2369_vm12, %v1780_v56, %v389_v57  ;;  %v401_v34 = vmul.f32 %v1786_v44, %v2356_v53  ;;  %vm538_vm3 = vmor %vm536_vm15, %vm537_vm13  ;;  %vm406_vm6 = vweird.f32 %v1786_v44 }
 0x27d   :  { %v533_v41 = vsub.f32 1.0, %v532_v40  ;;  %v397_v40 = vor.u32 1.1754944e-38, %v396_v61  ;;  %v2376_v37 = vadd.f32 1.0, %v1788_v33  ;;  %v557_v61 = vand.u32 2147483648, %v2361_v51  ;;  %vm2390_vm8 = vmor %vm405_vm5, %vm406_vm6 }
 0x27e   :  { %v402_v47 = vsub.f32 1.0, %v401_v34  ;;  %vm551_vm9 = vweird.f32 %v2361_v51 }
 0x27f   :  { %v534_v62 = vmul.f32 %v1784_v52, %v533_v41  ;;  %v543_v41 = vor.u32 1.1754944e-38, %v542_v63  ;;  %v2379_v42 = vsel %vm395_vm14, %v397_v40, %v393_v32  ;;  %1793 = vrcp.f32 %v2376_v37 }
 0x280   :  { %v484_v58 = vpop.f32.mrf.mxu2  ;;  %v403_v55 = vmul.f32 %v1786_v44, %v402_v47  ;;  %v411_v63 = vand.u32 2147483648, %v2356_v53  ;;  %vm420_vm14 = vweird.f32 %v2376_v37 }
 0x281   :  { %v1790_v50 = vpop.eup %1789  ;;  %v535_v49 = vadd.f32 %v1784_v52, %v534_v62  ;;  %v1609_v48 = vmul.f32 -1.442695, %v484_v58 }
 0x282   :  { %v1792_v36 = vpop.eup %1791  ;;  %v525_v43 = vadd.f32 1.0, %v1790_v50  ;;  %v409_v50 = vand.u32 2147483647, %v2356_v53  ;;  %v412_v62 = vor.u32 1.1754944e-38, %v411_v63 }
 0x283   :  { %v539_v56 = vsel %vm538_vm3, %v1784_v52, %v535_v49  ;;  %v547_v57 = vmul.f32 %v1792_v36, %v2361_v51  ;;  %1795 = vpow2.f32 %v1609_v48  ;;  %vm552_vm7 = vweird.f32 %v1792_v36 }
 0x284   :  { %v2383_v54 = vsel %vm541_vm4, %v543_v41, %v539_v56  ;;  %1797 = vrcp.f32 %v525_v43  ;;  %v555_v49 = vand.u32 2147483647, %v2361_v51  ;;  %v404_v52 = vadd.f32 %v1786_v44, %v403_v55  ;;  %vm553_vm11 = vmor %vm551_vm9, %vm552_vm7 }
 0x285   :  { %v548_v45 = vsub.f32 1.0, %v547_v57  ;;  %v1794_v59 = vpop.eup %1793  ;;  %vm410_vm10 = vcmp.eq.f32.partialorder %v409_v50, 8.507059e+37  ;;  %v558_v56 = vor.u32 1.1754944e-38, %v557_v61  ;;  %vm566_vm3 = vweird.f32 %v525_v43 }
 0x286   :  { %v408_v53 = vsel %vm2390_vm8, %v1786_v44, %v404_v52  ;;  %v416_v40 = vmul.f32 %v1794_v59, %v2376_v37  ;;  %vm556_vm12 = vcmp.eq.f32.partialorder %v555_v49, 8.507059e+37  ;;  %v572_v44 = vand.u32 2147483648, %v525_v43 }
 0x287   :  { %v549_v33 = vmul.f32 %v1792_v36, %v548_v45  ;;  %v2399_v45 = vsel %vm410_vm10, %v412_v62, %v408_v53  ;;  %v426_v52 = vand.u32 2147483648, %v2376_v37  ;;  %vm421_vm15 = vweird.f32 %v1794_v59 }
 0x288   :  { %v487_v47 = vpop.f32.mrf.mxu2  ;;  %v417_v48 = vsub.f32 1.0, %v416_v40  ;;  %v573_v40 = vor.u32 1.1754944e-38, %v572_v44  ;;  %vm422_vm6 = vmor %vm420_vm14, %vm421_vm15 }
 0x289   :  { %v1796_v32 = vpop.eup %1795  ;;  %v550_v34 = vadd.f32 %v1792_v36, %v549_v33  ;;  %v1610_v58 = vmul.f32 -1.442695, %v487_v47  ;;  %v570_v33 = vand.u32 2147483647, %v525_v43 }
 0x28a   :  { %v1798_v41 = vpop.eup %1797  ;;  %v526_v57 = vadd.f32 1.0, %v1796_v32  ;;  %v418_v47 = vmul.f32 %v1794_v59, %v417_v48 }
 0x28b   :  { %v554_v55 = vsel %vm553_vm11, %v1792_v36, %v550_v34  ;;  %v562_v51 = vmul.f32 %v1798_v41, %v525_v43  ;;  %1799 = vpow2.f32 %v1610_v58  ;;  %vm567_vm13 = vweird.f32 %v1798_v41 }
 0x28c   :  { %v2401_v50 = vsel %vm556_vm12, %v558_v56, %v554_v55  ;;  %1801 = vrcp.f32 %v526_v57  ;;  %v424_v36 = vand.u32 2147483647, %v2376_v37  ;;  %vm568_vm4 = vmor %vm566_vm3, %vm567_vm13  ;;  %v419_v58 = vadd.f32 %v1794_v59, %v418_v47 }
 0x28d   :  { %v563_v63 = vsub.f32 1.0, %v562_v51  ;;  %vm571_vm5 = vcmp.eq.f32.partialorder %v570_v33, 8.507059e+37  ;;  %v427_v55 = vor.u32 1.1754944e-38, %v426_v52  ;;  %v587_v31 = vand.u32 2147483648, %v526_v57 }
 0x28e   :  { %vm425_vm7 = vcmp.eq.f32.partialorder %v424_v36, 8.507059e+37  ;;  %v585_v33 = vand.u32 2147483647, %v526_v57  ;;  %vm581_vm9 = vweird.f32 %v526_v57 }
 0x28f   :  { %v564_v61 = vmul.f32 %v1798_v41, %v563_v63 }
 0x290   :  { %v490_v49 = vpop.f32.mrf.mxu2  ;;  %vm586_vm11 = vcmp.eq.f32.partialorder %v585_v33, 8.507059e+37 }
 0x291   :  { %v1800_v62 = vpop.eup %1799  ;;  %v565_v32 = vadd.f32 %v1798_v41, %v564_v61  ;;  %v1611_v34 = vmul.f32 -1.442695, %v490_v49  ;;  %v423_v61 = vsel %vm422_vm6, %v1794_v59, %v419_v58 }
 0x292   :  { %v1802_v53 = vpop.eup %1801  ;;  %v527_v56 = vadd.f32 1.0, %v1800_v62  ;;  %v2410_v49 = vsel %vm425_vm7, %v427_v55, %v423_v61 }
 0x293   :  { %v569_v51 = vsel %vm568_vm4, %v1798_v41, %v565_v32  ;;  %v577_v63 = vmul.f32 %v1802_v53, %v526_v57  ;;  %1803 = vpow2.f32 %v1611_v34  ;;  %vm582_vm8 = vweird.f32 %v1802_v53 }
 0x294   :  { %v2408_v48 = vsel %vm571_vm5, %v573_v40, %v569_v51  ;;  %1805 = vrcp.f32 %v527_v56  ;;  %vm583_vm10 = vmor %vm581_vm9, %vm582_vm8  ;;  %v588_v32 = vor.u32 1.1754944e-38, %v587_v31  ;;  %v602_v55 = vand.u32 2147483648, %v527_v56 }
 0x295   :  { %v578_v43 = vsub.f32 1.0, %v577_v63  ;;  %v600_v63 = vand.u32 2147483647, %v527_v56  ;;  %vm596_vm13 = vweird.f32 %v527_v56 }
 0x296   :  { %v603_v31 = vor.u32 1.1754944e-38, %v602_v55 }
 0x297   :  { %v579_v47 = vmul.f32 %v1802_v53, %v578_v43  ;;  %vm601_vm15 = vcmp.eq.f32.partialorder %v600_v63, 8.507059e+37 }
 0x298   :  { %v493_v44 = vpop.f32.mrf.mxu2 }
 0x299   :  { %v1804_v62 = vpop.eup %1803  ;;  %v580_v37 = vadd.f32 %v1802_v53, %v579_v47  ;;  %v1612_v52 = vmul.f32 -1.442695, %v493_v44 }
 0x29a   :  { %v1806_v41 = vpop.eup %1805  ;;  %v528_v36 = vadd.f32 1.0, %v1804_v62 }
 0x29b   :  { %v584_v34 = vsel %vm583_vm10, %v1802_v53, %v580_v37  ;;  %v592_v40 = vmul.f32 %v1806_v41, %v527_v56  ;;  %1807 = vpow2.f32 %v1612_v52  ;;  %vm597_vm12 = vweird.f32 %v1806_v41 }
 0x29c   :  { %v2412_v59 = vsel %vm586_vm11, %v588_v32, %v584_v34  ;;  %1809 = vrcp.f32 %v528_v36  ;;  %vm598_vm14 = vmor %vm596_vm13, %vm597_vm12  ;;  %v617_v32 = vand.u32 2147483648, %v528_v36  ;;  %vm611_vm4 = vweird.f32 %v528_v36 }
 0x29d   :  { %v593_v58 = vsub.f32 1.0, %v592_v40  ;;  %v615_v40 = vand.u32 2147483647, %v528_v36 }
 0x29f   :  { %v594_v51 = vmul.f32 %v1806_v41, %v593_v58  ;;  %vm616_vm6 = vcmp.eq.f32.partialorder %v615_v40, 8.507059e+37 }
 0x2a0   :  { %v496_v43 = vpop.f32.mrf.mxu2 }
 0x2a1   :  { %v1808_v61 = vpop.eup %1807  ;;  %v595_v57 = vadd.f32 %v1806_v41, %v594_v51  ;;  %v1613_v47 = vmul.f32 -1.442695, %v496_v43  ;;  %v618_v43 = vor.u32 1.1754944e-38, %v617_v32 }
 0x2a2   :  { %v1810_v44 = vpop.eup %1809  ;;  %v529_v53 = vadd.f32 1.0, %v1808_v61 }
 0x2a3   :  { %v599_v33 = vsel %vm598_vm14, %v1806_v41, %v595_v57  ;;  %v607_v62 = vmul.f32 %v1810_v44, %v528_v36  ;;  %1811 = vpow2.f32 %v1613_v47  ;;  %vm612_vm3 = vweird.f32 %v1810_v44 }
 0x2a4   :  { %v2414_v37 = vsel %vm601_vm15, %v603_v31, %v599_v33  ;;  %1813 = vrcp.f32 %v529_v53  ;;  %vm613_vm5 = vmor %vm611_vm4, %vm612_vm3  ;;  %v632_v47 = vand.u32 2147483648, %v529_v53  ;;  %v630_v33 = vand.u32 2147483647, %v529_v53 }
 0x2a5   :  { %v608_v52 = vsub.f32 1.0, %v607_v62  ;;  %vm626_vm8 = vweird.f32 %v529_v53 }
 0x2a6   :  { %v633_v36 = vor.u32 1.1754944e-38, %v632_v47  ;;  %vm631_vm10 = vcmp.eq.f32.partialorder %v630_v33, 8.507059e+37 }
 0x2a7   :  { %v609_v34 = vmul.f32 %v1810_v44, %v608_v52 }
 0x2a9   :  { %v1812_v58 = vpop.eup %1811  ;;  %v610_v51 = vadd.f32 %v1810_v44, %v609_v34 }
 0x2aa   :  { %v1814_v56 = vpop.eup %1813  ;;  %v530_v55 = vadd.f32 1.0, %v1812_v58 }
 0x2ab   :  { %v614_v61 = vsel %vm613_vm5, %v1810_v44, %v610_v51  ;;  %v622_v41 = vmul.f32 %v1814_v56, %v529_v53  ;;  %vm627_vm7 = vweird.f32 %v1814_v56 }
 0x2ac   :  { %v2416_v63 = vsel %vm616_vm6, %v618_v43, %v614_v61  ;;  %1815 = vrcp.f32 %v530_v55  ;;  %vm628_vm9 = vmor %vm626_vm8, %vm627_vm7  ;;  %v647_v40 = vand.u32 2147483648, %v530_v55  ;;  %v645_v43 = vand.u32 2147483647, %v530_v55 }
 0x2ad   :  { %v623_v57 = vsub.f32 1.0, %v622_v41  ;;  %vm641_vm12 = vweird.f32 %v530_v55 }
 0x2ae   :  { %v648_v41 = vor.u32 1.1754944e-38, %v647_v40  ;;  %vm646_vm14 = vcmp.eq.f32.partialorder %v645_v43, 8.507059e+37 }
 0x2af   :  { %v624_v31 = vmul.f32 %v1814_v56, %v623_v57 }
 0x2b1   :  { %v625_v62 = vadd.f32 %v1814_v56, %v624_v31 }
 0x2b2   :  { %v1816_v52 = vpop.eup %1815 }
 0x2b3   :  { %v629_v34 = vsel %vm628_vm9, %v1814_v56, %v625_v62  ;;  %v637_v32 = vmul.f32 %v1816_v52, %v530_v55  ;;  %vm642_vm11 = vweird.f32 %v1816_v52 }
 0x2b4   :  { %v2418_v58 = vsel %vm631_vm10, %v633_v36, %v629_v34  ;;  %vm643_vm13 = vmor %vm641_vm12, %vm642_vm11 }
 0x2b5   :  { %v638_v44 = vsub.f32 1.0, %v637_v32 }
 0x2b7   :  { %v639_v51 = vmul.f32 %v1816_v52, %v638_v44 }
 0x2b9   :  { %v640_v61 = vadd.f32 %v1816_v52, %v639_v51 }
 0x2bb   :  { %v644_v57 = vsel %vm643_vm13, %v1816_v52, %v640_v61 }
 0x2bc   :  { %v2420_v53 = vsel %vm646_vm14, %v648_v41, %v644_v57 }
 0x2bd LB: > { %s1614_s21 = sshll.u32 %s1917_s5, 7  ;;  %vm664_vm15 = vcmask 130048   ;;  %s656_s5 = sadd.s32 1, %s1917_s5   ;;  %s1917_s5 = sphi %s2422_s5, %s656_s5  }
 0x2be   : > { %s658_s22 = sshra.s32 %s1614_s21, 7  ;;  %p653_p0 = scmp.ge.s32.totalorder %s656_s5, 2  }
 0x2bf   : > { %s2428_s23 = sshll.u32 %s658_s22, 3 }
 0x2c0   : > { %s661_s26 = scalar_lea.vmem %s2782_s6, %s2428_s23  ;;  %s731_s1 = scalar_lea.vmem %s2783_s7, %s2428_s23 }
 0x2c1   : > { %v663_v56 = vld [vmem:[%s661_s26 + $0x10] sm:$0xff]  ;;  %v662_v55 = vld [vmem:[%s661_s26] sm:$0xff]  ;;  %s2474_s9 = scalar_lea.vmem %s2776_s0, %s2428_s23  ;;  %s2478_s10 = scalar_lea.vmem [#allocation2], %s2428_s23 }
 0x2c2   : > { %1723 = vmatpush.msra.mxu2 %v663_v56  ;;  %v733_v47 = vld [vmem:[%s731_s1 + $0x10] sm:$0xff]  ;;  %v732_v31 = vld [vmem:[%s731_s1] sm:$0xff]  ;;  %703 = vmatpush.msra.mxu0 %v663_v56 }
 0x2c3   : > { %1725 = vmatpush.msra.mxu3 %v733_v47  ;;  %772 = vmatpush.msra.mxu1 %v733_v47  ;;  %v809_v52 = vld [vmem:[%s2474_s9] sm:$0xff]  ;;  %v810_v57 = vld [vmem:[%s2474_s9 + $0x10] sm:$0xff] }
 0x2c4   : > { %1724 = vmatpush.msra.mxu2 %v662_v55  ;;  %704 = vmatpush.msra.mxu0 %v662_v55  ;;  %v813_v40 = vld [vmem:[%s2474_s9 + $0x40] sm:$0xff] }
 0x2c5   : > { %1726 = vmatpush.msra.mxu3 %v732_v31  ;;  %1620 = vmatmul.msk.f32.vlgmr.msra.gmra.mxu2 %vm664_vm15, %v2363_v39 }
 0x2c6   : > { %1629 = vmatmul.msk.f32.vlgmr.msra.gmra.mxu3 %vm664_vm15, %v2414_v37  ;;  %773 = vmatpush.msra.mxu1 %v732_v31  ;;  %v2831_v37 = vld [vmem:[#allocation7_spill] sm:$0xff] (%p653_p0) }
 0x2c7   : > { %1616 = vmatmul.msk.f32.vlgmr.msra.gmra.mxu0 %vm664_vm15, %v2334_v46  ;;  %1625 = vmatmul.msk.f32.vlgmr.msra.gmra.mxu1 %vm664_vm15, %v2383_v54 }
 0x2c8   :  { %852 = vmatpush.msra.mxu0 (%p653_p0), %v1976_v0  ;;  %893 = vmatpush.msra.mxu1 (%p653_p0), %v1981_v1  ;;  %v1635_v0 = vld [vmem:[%s2776_s0 + $0x80] sm:$0xff] (%p653_p0)  ;;  %v1636_v1 = vld [vmem:[%s2776_s0 + $0x88] sm:$0xff] (%p653_p0) }
 0x2ca   :  { %853 = vmatpush.msra.mxu0 (%p653_p0), %v1988_v2  ;;  %894 = vmatpush.msra.mxu1 (%p653_p0), %v1993_v3  ;;  %v2829_v2 = vld [vmem:[#allocation5_spill] sm:$0xff] (%p653_p0)  ;;  %v1637_v3 = vld [vmem:[%s2776_s0 + $0x90] sm:$0xff] (%p653_p0) }
 0x2cc   :  { %854 = vmatpush.msra.mxu0 (%p653_p0), %v1998_v4  ;;  %895 = vmatpush.msra.mxu1 (%p653_p0), %v2003_v5  ;;  %v1638_v4 = vld [vmem:[%s2776_s0 + $0x98] sm:$0xff] (%p653_p0)  ;;  %v1639_v5 = vld [vmem:[%s2776_s0 + $0xa0] sm:$0xff] (%p653_p0) }
 0x2cd   : > { %1621 = vmatmul.msk.f32.gmra.mxu2 %vm664_vm15, %v2379_v42 }
 0x2ce   : > { %1630 = vmatmul.msk.f32.gmra.mxu3 %vm664_vm15, %v2416_v63  ;;  %855 = vmatpush.msra.mxu0 (%p653_p0), %v2010_v6  ;;  %v1640_v6 = vld [vmem:[%s2776_s0 + $0xa8] sm:$0xff] (%p653_p0) }
 0x2cf   : > { %1617 = vmatmul.msk.f32.gmra.mxu0 %vm664_vm15, %v2343_v38  ;;  %1626 = vmatmul.msk.f32.gmra.mxu1 %vm664_vm15, %v2401_v50 }
 0x2d0   :  { %896 = vmatpush.msra.mxu1 (%p653_p0), %v2015_v7  ;;  %856 = vmatpush.msra.mxu0 (%p653_p0), %v2022_v8  ;;  %v1641_v7 = vld [vmem:[%s2776_s0 + $0xb0] sm:$0xff] (%p653_p0)  ;;  %v1642_v8 = vld [vmem:[%s2776_s0 + $0xb8] sm:$0xff] (%p653_p0) }
 0x2d2   :  { %897 = vmatpush.msra.mxu1 (%p653_p0), %v2027_v9  ;;  %857 = vmatpush.msra.mxu0 (%p653_p0), %v2034_v10  ;;  %v1643_v9 = vld [vmem:[%s2776_s0 + $0xc0] sm:$0xff] (%p653_p0)  ;;  %v1644_v10 = vld [vmem:[%s2776_s0 + $0xc8] sm:$0xff] (%p653_p0) }
 0x2d4   :  { %898 = vmatpush.msra.mxu1 (%p653_p0), %v2039_v11  ;;  %858 = vmatpush.msra.mxu0 (%p653_p0), %v2046_v12  ;;  %v1645_v11 = vld [vmem:[%s2776_s0 + $0xd0] sm:$0xff] (%p653_p0)  ;;  %v1646_v12 = vld [vmem:[%s2776_s0 + $0xd8] sm:$0xff] (%p653_p0) }
 0x2d5   : > { %1622 = vmatmul.msk.f32.gmra.mxu2 %vm664_vm15, %v2399_v45 }
 0x2d6   : > { %1631 = vmatmul.msk.f32.gmra.mxu3 %vm664_vm15, %v2418_v58  ;;  %899 = vmatpush.msra.mxu1 (%p653_p0), %v2051_v13  ;;  %v1647_v13 = vld [vmem:[%s2776_s0 + $0xe0] sm:$0xff] (%p653_p0) }
 0x2d7   : > { %1618 = vmatmul.msk.f32.gmra.mxu0 %vm664_vm15, %v2345_v60  ;;  %1627 = vmatmul.msk.f32.gmra.mxu1 %vm664_vm15, %v2408_v48 }
 0x2d8   :  { %859 = vmatpush.msra.mxu0 (%p653_p0), %v2058_v14  ;;  %900 = vmatpush.msra.mxu1 (%p653_p0), %v2063_v15  ;;  %v1648_v14 = vld [vmem:[%s2776_s0 + $0xe8] sm:$0xff] (%p653_p0)  ;;  %v1649_v15 = vld [vmem:[%s2776_s0 + $0xf0] sm:$0xff] (%p653_p0) }
 0x2da   :  { %860 = vmatpush.msra.mxu0 (%p653_p0), %v2070_v16  ;;  %901 = vmatpush.msra.mxu1 (%p653_p0), %v2075_v17  ;;  %v1650_v16 = vld [vmem:[%s2776_s0 + $0xf8] sm:$0xff] (%p653_p0) }
 0x2dc   :  { %861 = vmatpush.msra.mxu0 (%p653_p0), %v2082_v18  ;;  %902 = vmatpush.msra.mxu1 (%p653_p0), %v2087_v19 }
 0x2dd   : > { %1623 = vmatmul.msk.f32.gmra.mxu2 %vm664_vm15, %v2410_v49  ;;  %v2830_v49 = vld [vmem:[#allocation6_spill] sm:$0xff] (%p653_p0) }
 0x2de   : > { %1632 = vmatmul.msk.f32.gmra.mxu3 %vm664_vm15, %v2420_v53  ;;  %862 = vmatpush.msra.mxu0 (%p653_p0), %v2094_v20  ;;  %v2832_v53 = vld [vmem:[#allocation8_spill] sm:$0xff] (%p653_p0) }
 0x2df   : > { %1619 = vmatmul.msk.f32.gmra.mxu0 %vm664_vm15, %v2347_v35  ;;  %1628 = vmatmul.msk.f32.gmra.mxu1 %vm664_vm15, %v2412_v59 }
 0x2e0   :  { %903 = vmatpush.msra.mxu1 (%p653_p0), %v2099_v21  ;;  %863 = vmatpush.msra.mxu0 (%p653_p0), %v2106_v22 }
 0x2e2   :  { %904 = vmatpush.msra.mxu1 (%p653_p0), %v2111_v23  ;;  %864 = vmatpush.msra.mxu0 (%p653_p0), %v2118_v24 }
 0x2e4   :  { %905 = vmatpush.msra.mxu1 (%p653_p0), %v2123_v25  ;;  %865 = vmatpush.msra.mxu0 (%p653_p0), %v2130_v26 }
 0x2e6   :  { %906 = vmatpush.msra.mxu1 (%p653_p0), %v2135_v27  ;;  %866 = vmatpush.msra.mxu0 (%p653_p0), %v2142_v28 }
 0x2e8   :  { %907 = vmatpush.msra.mxu1 (%p653_p0), %v2147_v29  ;;  %867 = vmatpush.msra.mxu0 (%p653_p0), %v2154_v30 }
 0x2e9   :  { %868 = vmatmul.f32.vlgmr.msra.gmra.mxu0 (%p653_p0), %v1635_v0  ;;  %v2845_v0 = vld [vmem:[#allocation21_spill] sm:$0xff] (%p653_p0) }
 0x2ea   :  { %908 = vmatpush.msra.mxu1 (%p653_p0), %v2829_v2 }
 0x2eb   :  { %909 = vmatmul.f32.vlgmr.msra.gmra.mxu1 (%p653_p0), %v1636_v1 }
 0x2f1   :  { %871 = vmatmul.f32.gmra.mxu0 (%p653_p0), %v1637_v3 }
 0x2f3   :  { %912 = vmatmul.f32.gmra.mxu1 (%p653_p0), %v1638_v4 }
 0x2f9   :  { %874 = vmatmul.f32.gmra.mxu0 (%p653_p0), %v1639_v5 }
 0x2fb   :  { %915 = vmatmul.f32.gmra.mxu1 (%p653_p0), %v1640_v6 }
 0x301   :  { %877 = vmatmul.f32.gmra.mxu0 (%p653_p0), %v1641_v7  ;;  %v2846_v7 = vld [vmem:[#allocation22_spill] sm:$0xff] (%p653_p0) }
 0x303   :  { %918 = vmatmul.f32.gmra.mxu1 (%p653_p0), %v1642_v8 }
 0x309   :  { %880 = vmatmul.f32.gmra.mxu0 (%p653_p0), %v1643_v9 }
 0x30b   :  { %921 = vmatmul.f32.gmra.mxu1 (%p653_p0), %v1644_v10 }
 0x311   :  { %883 = vmatmul.f32.gmra.mxu0 (%p653_p0), %v1645_v11 }
 0x313   :  { %924 = vmatmul.f32.gmra.mxu1 (%p653_p0), %v1646_v12  ;;  %v2847_v12 = vld [vmem:[#allocation23_spill] sm:$0xff] (%p653_p0) }
 0x319   :  { %886 = vmatmul.f32.gmra.mxu0 (%p653_p0), %v1647_v13 }
 0x31b   :  { %927 = vmatmul.f32.gmra.mxu1 (%p653_p0), %v1648_v14 }
 0x321   :  { %889 = vmatmul.f32.gmra.mxu0 (%p653_p0), %v1649_v15 }
 0x323   :  { %930 = vmatmul.f32.gmra.mxu1 (%p653_p0), %v1650_v16 }
 0x344   : > { %v706_v33 = vpop.f32.mrf.mxu0  ;;  %v775_v62 = vpop.f32.mrf.mxu1 }
 0x345   : > { %v799_v36 = vmul.f32 %v775_v62, %v706_v33  ;;  %v814_v33 = vld [vmem:[%s2474_s9 + $0x50] sm:$0xff] }
 0x347   : > { %v817_v34 = vmul.f32 %v809_v52, %v799_v36 }
 0x348   : > { %v718_v32 = vpop.f32.mrf.mxu2 }
 0x349   : > { %827 = vst [vmem:[%s2478_s10] sm:$0xff] %v817_v34  ;;  %v787_v44 = vpop.f32.mrf.mxu3 }
 0x34a   : > { %v803_v51 = vmul.f32 %v787_v44, %v718_v32  ;;  %v811_v32 = vld [vmem:[%s2474_s9 + $0x20] sm:$0xff] }
 0x34c   : > { %v821_v43 = vmul.f32 %v813_v40, %v803_v51  ;;  %v709_v61 = vpop.f32.mrf.mxu0  ;;  %v778_v41 = vpop.f32.mrf.mxu1 }
 0x34d   : > { %v800_v56 = vmul.f32 %v778_v41, %v709_v61  ;;  %v815_v61 = vld [vmem:[%s2474_s9 + $0x60] sm:$0xff] }
 0x34e   : > { %831 = vst [vmem:[%s2478_s10 + $0x40] sm:$0xff] %v821_v43 }
 0x34f   : > { %v818_v55 = vmul.f32 %v810_v57, %v800_v56 }
 0x350   : > { %v721_v47 = vpop.f32.mrf.mxu2 }
 0x351   : > { %828 = vst [vmem:[%s2478_s10 + $0x10] sm:$0xff] %v818_v55  ;;  %v790_v31 = vpop.f32.mrf.mxu3 }
 0x352   : > { %v804_v62 = vmul.f32 %v790_v31, %v721_v47  ;;  %v812_v47 = vld [vmem:[%s2474_s9 + $0x30] sm:$0xff] }
 0x354   : > { %v822_v52 = vmul.f32 %v814_v33, %v804_v62  ;;  %v712_v36 = vpop.f32.mrf.mxu0  ;;  %v781_v34 = vpop.f32.mrf.mxu1 }
 0x355   : > { %v801_v44 = vmul.f32 %v781_v34, %v712_v36  ;;  %v816_v34 = vld [vmem:[%s2474_s9 + $0x70] sm:$0xff] }
 0x356   : > { %832 = vst [vmem:[%s2478_s10 + $0x50] sm:$0xff] %v822_v52 }
 0x357   : > { %v819_v40 = vmul.f32 %v811_v32, %v801_v44  ;;  %v2833_v44 = vld [vmem:[#allocation9_spill] sm:$0xff] (%p653_p0) }
 0x358   : > { %v724_v51 = vpop.f32.mrf.mxu2 }
 0x359   : > { %829 = vst [vmem:[%s2478_s10 + $0x20] sm:$0xff] %v819_v40  ;;  %v793_v43 = vpop.f32.mrf.mxu3  ;;  %v2834_v40 = vld [vmem:[#allocation10_spill] sm:$0xff] (%p653_p0) }
 0x35a   : > { %v805_v41 = vmul.f32 %v793_v43, %v724_v51  ;;  %v2835_v51 = vld [vmem:[#allocation11_spill] sm:$0xff] (%p653_p0)  ;;  %v2836_v43 = vld [vmem:[#allocation12_spill] sm:$0xff] (%p653_p0) }
 0x35c   : > { %v823_v57 = vmul.f32 %v815_v61, %v805_v41  ;;  %v715_v56 = vpop.f32.mrf.mxu0  ;;  %v784_v55 = vpop.f32.mrf.mxu1  ;;  %v2837_v61 = vld [vmem:[#allocation13_spill] sm:$0xff] (%p653_p0)  ;;  %v2838_v41 = vld [vmem:[#allocation15_spill] sm:$0xff] (%p653_p0) }
 0x35d   : > { %v802_v31 = vmul.f32 %v784_v55, %v715_v56  ;;  %v2840_v55 = vld [vmem:[#allocation14_spill] sm:$0xff] (%p653_p0) }
 0x35e   : > { %833 = vst [vmem:[%s2478_s10 + $0x60] sm:$0xff] %v823_v57  ;;  %v2839_v57 = vld [vmem:[#allocation17_spill] sm:$0xff] (%p653_p0) }
 0x35f   : > { %v820_v33 = vmul.f32 %v812_v47, %v802_v31  ;;  %v2841_v47 = vld [vmem:[#allocation16_spill] sm:$0xff] (%p653_p0)  ;;  %v2842_v31 = vld [vmem:[#allocation18_spill] sm:$0xff] (%p653_p0) }
 0x360   : > { %v727_v62 = vpop.f32.mrf.mxu2 }
 0x361   : > { %830 = vst [vmem:[%s2478_s10 + $0x30] sm:$0xff] %v820_v33  ;;  %v796_v36 = vpop.f32.mrf.mxu3  ;;  %v2843_v33 = vld [vmem:[#allocation19_spill] sm:$0xff] (%p653_p0) }
 0x362   : > { %v806_v52 = vmul.f32 %v796_v36, %v727_v62  ;;  %655 = sbr.rel (!%p653_p0) target bundleno = 701 (0x2bd), region = 75 }
 0x364   : > { %v824_v32 = vmul.f32 %v816_v34, %v806_v52  ;;  %v2844_v34 = vld [vmem:[#allocation20_spill] sm:$0xff] (%p653_p0) }
 0x366   : > { %834 = vst [vmem:[%s2478_s10 + $0x70] sm:$0xff] %v824_v32  ;;  %v869_v17 = vpop.f32.mrf.mxu0 (%p653_p0) }
 0x368   :  { %v910_v18 = vpop.f32.mrf.mxu1 }
 0x369   :  { %v911_v19 = vadd.f32 %v910_v18, %v869_v17 }
 0x36e   :  { %v872_v20 = vpop.f32.mrf.mxu0 }
 0x370   :  { %v913_v21 = vpop.f32.mrf.mxu1 }
 0x371   :  { %v914_v48 = vadd.f32 %v913_v21, %v872_v20 }
 0x376   :  { %v875_v22 = vpop.f32.mrf.mxu0 }
 0x378   :  { %v916_v23 = vpop.f32.mrf.mxu1 }
 0x379   :  { %v917_v50 = vadd.f32 %v916_v23, %v875_v22 }
 0x37e   :  { %v878_v24 = vpop.f32.mrf.mxu0 }
 0x380   :  { %v919_v25 = vpop.f32.mrf.mxu1 }
 0x381   :  { %v920_v45 = vadd.f32 %v919_v25, %v878_v24 }
 0x386   :  { %v881_v26 = vpop.f32.mrf.mxu0 }
 0x388   :  { %v922_v27 = vpop.f32.mrf.mxu1 }
 0x389   :  { %v923_v54 = vadd.f32 %v922_v27, %v881_v26 }
 0x38e   :  { %v884_v28 = vpop.f32.mrf.mxu0 }
 0x390   :  { %v925_v29 = vpop.f32.mrf.mxu1 }
 0x391   :  { %v926_v39 = vadd.f32 %v925_v29, %v884_v28 }
 0x396   :  { %v887_v30 = vpop.f32.mrf.mxu0 }
 0x398   :  { %v928_v42 = vpop.f32.mrf.mxu1 }
 0x399   :  { %v929_v35 = vadd.f32 %v928_v42, %v887_v30 }
 0x39e   :  { %v890_v46 = vpop.f32.mrf.mxu0 }
 0x3a0   :  { %v931_v38 = vpop.f32.mrf.mxu1 }
 0x3a1   :  { %v932_v60 = vadd.f32 %v931_v38, %v890_v46 }
 0x3a3   :  { %942 = vmatpush.msra.mxu2 %v932_v60 }
 0x3a5   :  { %943 = vmatpush.msra.mxu2 %v929_v35 }
 0x3a7   :  { %944 = vmatpush.msra.mxu2 %v926_v39 }
 0x3a9   :  { %945 = vmatpush.msra.mxu2 %v923_v54 }
 0x3ab   :  { %946 = vmatpush.msra.mxu2 %v920_v45 }
 0x3ad   :  { %947 = vmatpush.msra.mxu2 %v917_v50 }
 0x3af   :  { %948 = vmatpush.msra.mxu2 %v914_v48 }
 0x3b1   :  { %949 = vmatpush.msra.mxu2 %v911_v19 }
 0x3b2   :  { %1651 = vmatmul.msk.f32.vlgmr.msra.gmra.mxu2 %vm183_vm0, %v2830_v49 }
 0x435   :  { %v951_v59 = vpop.f32.mrf.mxu2 }
 0x436   :  { %v952_v63 = vadd.f32 %v951_v59, %v2831_v37 }
 0x438   :  { %v954_v58 = vmax.f32 %v952_v63, 0.0 }
 0x43a   :  { %1652 = vmatpush.msk.msra.mxu3 %vm233_vm1, %v954_v58  ;;  %1151 = vrot.lane.b32.xlu0 %v954_v58, %s1924_s2  ;;  %s2697_s2 = smov 0  }
 0x43b   :  { %1653 = vmatmul.msk.f32.vlgmr.msra.gmra.mxu3 %vm208_vm2, %v2832_v53 }
 0x443   :  { %1654 = vmatmul.msk.f32.gmra.mxu3 %vm208_vm2, %v2833_v44 }
 0x44b   :  { %1655 = vmatmul.msk.f32.gmra.mxu3 %vm208_vm2, %v2834_v40 }
 0x453   :  { %1656 = vmatmul.msk.f32.gmra.mxu3 %vm208_vm2, %v2835_v51 }
 0x45b   :  { %1657 = vmatmul.msk.f32.gmra.mxu3 %vm208_vm2, %v2836_v43 }
 0x463   :  { %1658 = vmatmul.msk.f32.gmra.mxu3 %vm208_vm2, %v2837_v61 }
 0x46b   :  { %1659 = vmatmul.msk.f32.gmra.mxu3 %vm208_vm2, %v2838_v41 }
 0x473   :  { %1660 = vmatmul.msk.f32.gmra.mxu3 %vm208_vm2, %v2839_v57 }
 0x4ac   :  { %v1152_v56 = vpop.permute.xlu0 %1151 }
 0x4ad   :  { %1669 = vmatpush.msk.msrb.mxu2 %vm233_vm1, %v1152_v56 }
 0x4ae   :  { %1670 = vmatmul.msk.f32.vlgmr.msrb.gmra.mxu2 %vm208_vm2, %v2840_v55 }
 0x4b6   :  { %1671 = vmatmul.msk.f32.gmra.mxu2 %vm208_vm2, %v2841_v47 }
 0x4be   :  { %1672 = vmatmul.msk.f32.gmra.mxu2 %vm208_vm2, %v2842_v31  ;;  %v975_v62 = vpop.f32.mrf.mxu3 }
 0x4bf   :  { %v1661_v36 = vmul.f32 -1.442695, %v975_v62 }
 0x4c1   :  { %1817 = vpow2.f32 %v1661_v36 }
 0x4c6   :  { %1673 = vmatmul.msk.f32.gmra.mxu2 %vm208_vm2, %v2843_v33  ;;  %v978_v13 = vpop.f32.mrf.mxu3 }
 0x4c7   :  { %v1818_v52 = vpop.eup %1817  ;;  %v1662_v14 = vmul.f32 -1.442695, %v978_v13 }
 0x4c8   :  { %v1023_v32 = vadd.f32 1.0, %v1818_v52 }
 0x4ca   :  { %1819 = vrcp.f32 %v1023_v32  ;;  %v1042_v3 = vand.u32 2147483648, %v1023_v32  ;;  %vm1036_vm0 = vweird.f32 %v1023_v32  ;;  %v1040_v5 = vand.u32 2147483647, %v1023_v32 }
 0x4cb   :  { %1821 = vpow2.f32 %v1662_v14 }
 0x4cc   :  { %v1043_v8 = vor.u32 1.1754944e-38, %v1042_v3  ;;  %vm1041_vm4 = vcmp.eq.f32.partialorder %v1040_v5, 8.507059e+37 }
 0x4ce   :  { %1674 = vmatmul.msk.f32.gmra.mxu2 %vm208_vm2, %v2844_v34  ;;  %v981_v15 = vpop.f32.mrf.mxu3 }
 0x4cf   :  { %v1663_v17 = vmul.f32 -1.442695, %v981_v15 }
 0x4d0   :  { %v1820_v1 = vpop.eup %1819 }
 0x4d1   :  { %v1032_v2 = vmul.f32 %v1820_v1, %v1023_v32  ;;  %vm1037_vm1 = vweird.f32 %v1820_v1  ;;  %v1822_v16 = vpop.eup %1821  ;;  %1823 = vpow2.f32 %v1663_v17 }
 0x4d2   :  { %vm1038_vm3 = vmor %vm1036_vm0, %vm1037_vm1  ;;  %v1024_v18 = vadd.f32 1.0, %v1822_v16 }
 0x4d3   :  { %v1033_v4 = vsub.f32 1.0, %v1032_v2 }
 0x4d4   :  { %1825 = vrcp.f32 %v1024_v18  ;;  %v1057_v27 = vand.u32 2147483648, %v1024_v18  ;;  %v1055_v29 = vand.u32 2147483647, %v1024_v18 }
 0x4d5   :  { %v1034_v6 = vmul.f32 %v1820_v1, %v1033_v4 }
 0x4d6   :  { %1675 = vmatmul.msk.f32.gmra.mxu2 %vm208_vm2, %v2845_v0  ;;  %v984_v20 = vpop.f32.mrf.mxu3  ;;  %v1058_v46 = vor.u32 1.1754944e-38, %v1057_v27  ;;  %vm1056_vm7 = vcmp.eq.f32.partialorder %v1055_v29, 8.507059e+37 }
 0x4d7   :  { %v1035_v9 = vadd.f32 %v1820_v1, %v1034_v6  ;;  %v1824_v19 = vpop.eup %1823  ;;  %v1664_v23 = vmul.f32 -1.442695, %v984_v20 }
 0x4d8   :  { %v1025_v22 = vadd.f32 1.0, %v1824_v19 }
 0x4d9   :  { %v1039_v10 = vsel %vm1038_vm3, %v1820_v1, %v1035_v9 }
 0x4da   :  { %v2614_v11 = vsel %vm1041_vm4, %v1043_v8, %v1039_v10  ;;  %v1826_v21 = vpop.eup %1825  ;;  %1827 = vrcp.f32 %v1025_v22  ;;  %v1072_v49 = vand.u32 2147483648, %v1025_v22  ;;  %vm1066_vm8 = vweird.f32 %v1025_v22 }
 0x4db   :  { %v1047_v24 = vmul.f32 %v1826_v21, %v1024_v18  ;;  %1829 = vpow2.f32 %v1664_v23  ;;  %vm1052_vm5 = vweird.f32 %v1826_v21  ;;  %v1070_v37 = vand.u32 2147483647, %v1025_v22 }
 0x4dc   :  { %v1073_v53 = vor.u32 1.1754944e-38, %v1072_v49 }
 0x4dd   :  { %v1048_v25 = vsub.f32 1.0, %v1047_v24  ;;  %vm1071_vm11 = vcmp.eq.f32.partialorder %v1070_v37, 8.507059e+37 }
 0x4de   :  { %1676 = vmatmul.msk.f32.gmra.mxu2 %vm208_vm2, %v2846_v7  ;;  %v987_v30 = vpop.f32.mrf.mxu3 }
 0x4df   :  { %v1049_v26 = vmul.f32 %v1826_v21, %v1048_v25  ;;  %v1665_v38 = vmul.f32 -1.442695, %v987_v30 }
 0x4e0   :  { %v1828_v42 = vpop.eup %1827 }
 0x4e1   :  { %v1050_v28 = vadd.f32 %v1826_v21, %v1049_v26  ;;  %v1830_v60 = vpop.eup %1829  ;;  %v1062_v39 = vmul.f32 %v1828_v42, %v1025_v22  ;;  %1831 = vpow2.f32 %v1665_v38  ;;  %vm1067_vm9 = vweird.f32 %v1828_v42 }
 0x4e2   :  { %v1026_v45 = vadd.f32 1.0, %v1830_v60  ;;  %vm1068_vm10 = vmor %vm1066_vm8, %vm1067_vm9 }
 0x4e3   :  { %v1063_v50 = vsub.f32 1.0, %v1062_v39 }
 0x4e4   :  { %1833 = vrcp.f32 %v1026_v45  ;;  %v1087_v31 = vand.u32 2147483648, %v1026_v45  ;;  %vm1081_vm12 = vweird.f32 %v1026_v45  ;;  %v1085_v36 = vand.u32 2147483647, %v1026_v45 }
 0x4e5   :  { %v1064_v48 = vmul.f32 %v1828_v42, %v1063_v50 }
 0x4e6   :  { %1677 = vmatmul.msk.f32.gmra.mxu2 %vm208_vm2, %v2847_v12  ;;  %vm1051_vm2 = vweird.f32 %v1024_v18  ;;  %v990_v63 = vpop.f32.mrf.mxu3  ;;  %v1088_v0 = vor.u32 1.1754944e-38, %v1087_v31  ;;  %vm1086_vm0 = vcmp.eq.f32.partialorder %v1085_v36, 8.507059e+37 }
 0x4e7   :  { %vm1053_vm6 = vmor %vm1051_vm2, %vm1052_vm5  ;;  %v1065_v59 = vadd.f32 %v1828_v42, %v1064_v48  ;;  %v1832_v58 = vpop.eup %1831  ;;  %v1666_v44 = vmul.f32 -1.442695, %v990_v63 }
 0x4e8   :  { %v1054_v35 = vsel %vm1053_vm6, %v1826_v21, %v1050_v28  ;;  %v1027_v51 = vadd.f32 1.0, %v1832_v58 }
 0x4e9   :  { %v2618_v54 = vsel %vm1056_vm7, %v1058_v46, %v1054_v35  ;;  %v1069_v40 = vsel %vm1068_vm10, %v1828_v42, %v1065_v59  ;;  %1835 = vpow2.f32 %v1666_v44 }
 0x4ea   :  { %v1834_v43 = vpop.eup %1833  ;;  %v2620_v61 = vsel %vm1071_vm11, %v1073_v53, %v1069_v40  ;;  %1837 = vrcp.f32 %v1027_v51  ;;  %vm1096_vm1 = vweird.f32 %v1027_v51  ;;  %v1100_v15 = vand.u32 2147483647, %v1027_v51 }
 0x4eb   :  { %v1077_v57 = vmul.f32 %v1834_v43, %v1026_v45  ;;  %vm1082_vm13 = vweird.f32 %v1834_v43  ;;  %v1102_v18 = vand.u32 2147483648, %v1027_v51 }
 0x4ec   :  { %vm1083_vm14 = vmor %vm1081_vm12, %vm1082_vm13  ;;  %vm1101_vm2 = vcmp.eq.f32.partialorder %v1100_v15, 8.507059e+37 }
 0x4ed   :  { %v1078_v55 = vsub.f32 1.0, %v1077_v57  ;;  %v1103_v24 = vor.u32 1.1754944e-38, %v1102_v18 }
 0x4ee   :  { %v993_v33 = vpop.f32.mrf.mxu3 }
 0x4ef   :  { %v1079_v47 = vmul.f32 %v1834_v43, %v1078_v55  ;;  %v1836_v62 = vpop.eup %1835  ;;  %v1667_v34 = vmul.f32 -1.442695, %v993_v33 }
 0x4f0   :  { %v1838_v52 = vpop.eup %1837  ;;  %v1028_v1 = vadd.f32 1.0, %v1836_v62 }
 0x4f1   :  { %v1080_v32 = vadd.f32 %v1834_v43, %v1079_v47  ;;  %v1092_v2 = vmul.f32 %v1838_v52, %v1027_v51  ;;  %vm1097_vm3 = vweird.f32 %v1838_v52 }
 0x4f2   :  { %vm2627_vm4 = vmor %vm1096_vm1, %vm1097_vm3  ;;  %vm1111_vm5 = vweird.f32 %v1028_v1  ;;  %v1115_v48 = vand.u32 2147483647, %v1028_v1  ;;  %v1117_v49 = vand.u32 2147483648, %v1028_v1 }
 0x4f3   :  { %v1084_v4 = vsel %vm1083_vm14, %v1834_v43, %v1080_v32  ;;  %v1093_v8 = vsub.f32 1.0, %v1092_v2 }
 0x4f4   :  { %v2622_v7 = vsel %vm1086_vm0, %v1088_v0, %v1084_v4  ;;  %vm1116_vm9 = vcmp.eq.f32.partialorder %v1115_v48, 8.507059e+37  ;;  %v1118_v44 = vor.u32 1.1754944e-38, %v1117_v49 }
 0x4f5   :  { %v1094_v10 = vmul.f32 %v1838_v52, %v1093_v8 }
 0x4f6   :  { %v996_v12 = vpop.f32.mrf.mxu3 }
 0x4f7   :  { %v1095_v14 = vadd.f32 %v1838_v52, %v1094_v10  ;;  %v1668_v22 = vmul.f32 -1.442695, %v996_v12 }
 0x4f9   :  { %v1099_v20 = vsel %vm2627_vm4, %v1838_v52, %v1095_v14 }
 0x4fa   :  { %v2638_v30 = vsel %vm1101_vm2, %v1103_v24, %v1099_v20 }
 0x531   :  { %v1172_v41 = vpop.f32.mrf.mxu2 }
 0x532   :  { %v1678_v56 = vmul.f32 -1.442695, %v1172_v41 }
 0x534   :  { %1839 = vpow2.f32 %v1678_v56 }
 0x535   :  { %1841 = vpow2.f32 %v1667_v34 }
 0x536   :  { %1843 = vrcp.f32 %v1028_v1 }
 0x539   :  { %v1175_v3 = vpop.f32.mrf.mxu2 }
 0x53a   :  { %v1840_v5 = vpop.eup %1839  ;;  %v1679_v6 = vmul.f32 -1.442695, %v1175_v3 }
 0x53b   :  { %v2624_v9 = vadd.f32 1.0, %v1840_v5  ;;  %v1842_v13 = vpop.eup %1841 }
 0x53c   :  { %1845 = vpow2.f32 %v1679_v6  ;;  %v1844_v16 = vpop.eup %1843  ;;  %v2631_v19 = vadd.f32 1.0, %v1842_v13 }
 0x53d   :  { %1847 = vrcp.f32 %v2624_v9  ;;  %v1107_v21 = vmul.f32 %v1844_v16, %v1028_v1  ;;  %vm1112_vm6 = vweird.f32 %v1844_v16  ;;  %v1237_v39 = vand.u32 2147483647, %v2624_v9 }
 0x53e   :  { %1849 = vrcp.f32 %v2631_v19  ;;  %v1239_v45 = vand.u32 2147483648, %v2624_v9  ;;  %vm2644_vm7 = vmor %vm1111_vm5, %vm1112_vm6  ;;  %vm1233_vm10 = vweird.f32 %v2624_v9  ;;  %vm1126_vm13 = vweird.f32 %v2631_v19 }
 0x53f   :  { %v1108_v27 = vsub.f32 1.0, %v1107_v21  ;;  %1851 = vpow2.f32 %v1668_v22  ;;  %vm1238_vm12 = vcmp.eq.f32.partialorder %v1237_v39, 8.507059e+37  ;;  %v1130_v0 = vand.u32 2147483647, %v2631_v19 }
 0x540   :  { %v1240_v55 = vor.u32 1.1754944e-38, %v1239_v45  ;;  %v1132_v1 = vand.u32 2147483648, %v2631_v19 }
 0x541   :  { %v1178_v23 = vpop.f32.mrf.mxu2  ;;  %v1109_v46 = vmul.f32 %v1844_v16, %v1108_v27  ;;  %vm1131_vm4 = vcmp.eq.f32.partialorder %v1130_v0, 8.507059e+37 }
 0x542   :  { %v1846_v25 = vpop.eup %1845  ;;  %v1680_v26 = vmul.f32 -1.442695, %v1178_v23 }
 0x543   :  { %v1848_v28 = vpop.eup %1847  ;;  %v2636_v29 = vadd.f32 1.0, %v1846_v25  ;;  %v1110_v60 = vadd.f32 %v1844_v16, %v1109_v46 }
 0x544   :  { %v1229_v42 = vmul.f32 %v1848_v28, %v2624_v9  ;;  %1853 = vpow2.f32 %v1680_v26  ;;  %v1850_v35 = vpop.eup %1849  ;;  %vm1234_vm8 = vweird.f32 %v1848_v28  ;;  %v1133_v9 = vor.u32 1.1754944e-38, %v1132_v1 }
 0x545   :  { %1855 = vrcp.f32 %v2636_v29  ;;  %v1852_v59 = vpop.eup %1851  ;;  %v1114_v63 = vsel %vm2644_vm7, %v1844_v16, %v1110_v60  ;;  %v1122_v58 = vmul.f32 %v1850_v35, %v2631_v19  ;;  %vm1235_vm11 = vmor %vm1233_vm10, %vm1234_vm8  ;;  %v1254_v32 = vand.u32 2147483648, %v2636_v29 }
 0x546   :  { %v1230_v38 = vsub.f32 1.0, %v1229_v42  ;;  %v2651_v40 = vadd.f32 1.0, %v1852_v59  ;;  %v2654_v31 = vsel %vm1116_vm9, %v1118_v44, %v1114_v63  ;;  %vm1127_vm14 = vweird.f32 %v1850_v35 }
 0x547   :  { %v1123_v57 = vsub.f32 1.0, %v1122_v58  ;;  %v1252_v3 = vand.u32 2147483647, %v2636_v29  ;;  %vm2665_vm1 = vmor %vm1126_vm13, %vm1127_vm14  ;;  %vm1248_vm3 = vweird.f32 %v2636_v29  ;;  %v1255_v17 = vor.u32 1.1754944e-38, %v1254_v32 }
 0x548   :  { %v1231_v37 = vmul.f32 %v1848_v28, %v1230_v38  ;;  %1857 = vrcp.f32 %v2651_v40  ;;  %vm1141_vm7 = vweird.f32 %v2651_v40  ;;  %v1147_v27 = vand.u32 2147483648, %v2651_v40 }
 0x549   :  { %v1181_v53 = vpop.f32.mrf.mxu2  ;;  %v1124_v52 = vmul.f32 %v1850_v35, %v1123_v57  ;;  %vm1253_vm5 = vcmp.eq.f32.partialorder %v1252_v3, 8.507059e+37  ;;  %v1145_v42 = vand.u32 2147483647, %v2651_v40 }
 0x54a   :  { %v1854_v51 = vpop.eup %1853  ;;  %v1232_v43 = vadd.f32 %v1848_v28, %v1231_v37  ;;  %v1681_v41 = vmul.f32 -1.442695, %v1181_v53  ;;  %v1148_v49 = vor.u32 1.1754944e-38, %v1147_v27 }
 0x54b   :  { %v1856_v56 = vpop.eup %1855  ;;  %v1222_v47 = vadd.f32 1.0, %v1854_v51  ;;  %v1125_v4 = vadd.f32 %v1850_v35, %v1124_v52  ;;  %vm1146_vm13 = vcmp.eq.f32.partialorder %v1145_v42, 8.507059e+37 }
 0x54c   :  { %v1236_v33 = vsel %vm1235_vm11, %v1848_v28, %v1232_v43  ;;  %v1244_v62 = vmul.f32 %v1856_v56, %v2636_v29  ;;  %1859 = vpow2.f32 %v1681_v41  ;;  %vm1249_vm0 = vweird.f32 %v1856_v56 }
 0x54d   :  { %v2658_v36 = vsel %vm1238_vm12, %v1240_v55, %v1236_v33  ;;  %1861 = vrcp.f32 %v1222_v47  ;;  %v1129_v14 = vsel %vm2665_vm1, %v1850_v35, %v1125_v4  ;;  %vm1250_vm2 = vmor %vm1248_vm3, %vm1249_vm0  ;;  %v1267_v24 = vand.u32 2147483647, %v1222_v47 }
 0x54e   :  { %v1245_v34 = vsub.f32 1.0, %v1244_v62  ;;  %v1858_v6 = vpop.eup %1857  ;;  %v2674_v19 = vsel %vm1131_vm4, %v1133_v9, %v1129_v14  ;;  %v1269_v26 = vand.u32 2147483648, %v1222_v47  ;;  %vm1263_vm9 = vweird.f32 %v1222_v47 }
 0x54f   :  { %v1137_v15 = vmul.f32 %v1858_v6, %v2651_v40  ;;  %vm1142_vm8 = vweird.f32 %v1858_v6  ;;  %vm1268_vm11 = vcmp.eq.f32.partialorder %v1267_v24, 8.507059e+37 }
 0x550   :  { %v1246_v2 = vmul.f32 %v1856_v56, %v1245_v34  ;;  %v1270_v50 = vor.u32 1.1754944e-38, %v1269_v26  ;;  %vm1143_vm12 = vmor %vm1141_vm7, %vm1142_vm8 }
 0x551   :  { %v1184_v8 = vpop.f32.mrf.mxu2  ;;  %v1138_v25 = vsub.f32 1.0, %v1137_v15 }
 0x552   :  { %v1860_v10 = vpop.eup %1859  ;;  %v1247_v12 = vadd.f32 %v1856_v56, %v1246_v2  ;;  %v1682_v13 = vmul.f32 -1.442695, %v1184_v8 }
 0x553   :  { %v1862_v16 = vpop.eup %1861  ;;  %v1223_v18 = vadd.f32 1.0, %v1860_v10  ;;  %v1139_v29 = vmul.f32 %v1858_v6, %v1138_v25 }
 0x554   :  { %v1251_v20 = vsel %vm1250_vm2, %v1856_v56, %v1247_v12  ;;  %v1259_v21 = vmul.f32 %v1862_v16, %v1222_v47  ;;  %1863 = vpow2.f32 %v1682_v13  ;;  %vm1264_vm6 = vweird.f32 %v1862_v16 }
 0x555   :  { %v2676_v22 = vsel %vm1253_vm5, %v1255_v17, %v1251_v20  ;;  %1865 = vrcp.f32 %v1223_v18  ;;  %vm1265_vm10 = vmor %vm1263_vm9, %vm1264_vm6  ;;  %v1140_v39 = vadd.f32 %v1858_v6, %v1139_v29  ;;  %v1284_v44 = vand.u32 2147483648, %v1223_v18 }
 0x556   :  { %v1260_v23 = vsub.f32 1.0, %v1259_v21  ;;  %v1282_v41 = vand.u32 2147483647, %v1223_v18  ;;  %vm1278_vm0 = vweird.f32 %v1223_v18 }
 0x557   :  { %v1144_v53 = vsel %vm1143_vm12, %v1858_v6, %v1140_v39  ;;  %v1285_v33 = vor.u32 1.1754944e-38, %v1284_v44 }
 0x558   :  { %v1261_v28 = vmul.f32 %v1862_v16, %v1260_v23  ;;  %v2685_v51 = vsel %vm1146_vm13, %v1148_v49, %v1144_v53  ;;  %vm1283_vm3 = vcmp.eq.f32.partialorder %v1282_v41, 8.507059e+37 }
 0x559   :  { %v1187_v46 = vpop.f32.mrf.mxu2 }
 0x55a   :  { %v1864_v38 = vpop.eup %1863  ;;  %v1262_v60 = vadd.f32 %v1862_v16, %v1261_v28  ;;  %v1683_v35 = vmul.f32 -1.442695, %v1187_v46 }
 0x55b   :  { %v1866_v45 = vpop.eup %1865  ;;  %v1224_v48 = vadd.f32 1.0, %v1864_v38 }
 0x55c   :  { %v1266_v59 = vsel %vm1265_vm10, %v1862_v16, %v1262_v60  ;;  %v1274_v37 = vmul.f32 %v1866_v45, %v1223_v18  ;;  %1867 = vpow2.f32 %v1683_v35  ;;  %vm1279_vm14 = vweird.f32 %v1866_v45 }
 0x55d   :  { %v2683_v63 = vsel %vm1268_vm11, %v1270_v50, %v1266_v59  ;;  %1869 = vrcp.f32 %v1224_v48  ;;  %vm1280_vm1 = vmor %vm1278_vm0, %vm1279_vm14  ;;  %v1299_v1 = vand.u32 2147483648, %v1224_v48  ;;  %v1297_v3 = vand.u32 2147483647, %v1224_v48 }
 0x55e   :  { %v1275_v58 = vsub.f32 1.0, %v1274_v37  ;;  %vm1293_vm2 = vweird.f32 %v1224_v48 }
 0x55f   :  { %v1300_v10 = vor.u32 1.1754944e-38, %v1299_v1  ;;  %vm1298_vm6 = vcmp.eq.f32.partialorder %v1297_v3, 8.507059e+37 }
 0x560   :  { %v1276_v43 = vmul.f32 %v1866_v45, %v1275_v58 }
 0x561   :  { %v1190_v57 = vpop.f32.mrf.mxu2 }
 0x562   :  { %v1868_v56 = vpop.eup %1867  ;;  %v1277_v40 = vadd.f32 %v1866_v45, %v1276_v43  ;;  %v1684_v55 = vmul.f32 -1.442695, %v1190_v57 }
 0x563   :  { %v1870_v47 = vpop.eup %1869  ;;  %v1225_v62 = vadd.f32 1.0, %v1868_v56 }
 0x564   :  { %v1281_v34 = vsel %vm1280_vm1, %v1866_v45, %v1277_v40  ;;  %v1289_v52 = vmul.f32 %v1870_v47, %v1224_v48  ;;  %1871 = vpow2.f32 %v1684_v55  ;;  %vm1294_vm4 = vweird.f32 %v1870_v47 }
 0x565   :  { %v2687_v32 = vsel %vm1283_vm3, %v1285_v33, %v1281_v34  ;;  %1873 = vrcp.f32 %v1225_v62  ;;  %vm1295_vm5 = vmor %vm1293_vm2, %vm1294_vm4  ;;  %v1314_v17 = vand.u32 2147483648, %v1225_v62  ;;  %v1312_v20 = vand.u32 2147483647, %v1225_v62 }
 0x566   :  { %v1290_v0 = vsub.f32 1.0, %v1289_v52  ;;  %vm1308_vm8 = vweird.f32 %v1225_v62 }
 0x567   :  { %v1315_v25 = vor.u32 1.1754944e-38, %v1314_v17  ;;  %vm1313_vm10 = vcmp.eq.f32.partialorder %v1312_v20, 8.507059e+37 }
 0x568   :  { %v1291_v2 = vmul.f32 %v1870_v47, %v1290_v0 }
 0x569   :  { %v1193_v4 = vpop.f32.mrf.mxu2 }
 0x56a   :  { %v1872_v5 = vpop.eup %1871  ;;  %v1292_v6 = vadd.f32 %v1870_v47, %v1291_v2  ;;  %v1685_v8 = vmul.f32 -1.442695, %v1193_v4 }
 0x56b   :  { %v1874_v9 = vpop.eup %1873  ;;  %v1226_v12 = vadd.f32 1.0, %v1872_v5 }
 0x56c   :  { %v1296_v13 = vsel %vm1295_vm5, %v1870_v47, %v1292_v6  ;;  %v1304_v14 = vmul.f32 %v1874_v9, %v1225_v62  ;;  %1875 = vpow2.f32 %v1685_v8  ;;  %vm1309_vm7 = vweird.f32 %v1874_v9 }
 0x56d   :  { %v2689_v15 = vsel %vm1298_vm6, %v1300_v10, %v1296_v13  ;;  %1877 = vrcp.f32 %v1226_v12  ;;  %vm1310_vm9 = vmor %vm1308_vm8, %vm1309_vm7  ;;  %v1329_v46 = vand.u32 2147483648, %v1226_v12  ;;  %v1327_v60 = vand.u32 2147483647, %v1226_v12 }
 0x56e   :  { %v1305_v16 = vsub.f32 1.0, %v1304_v14  ;;  %vm1323_vm12 = vweird.f32 %v1226_v12 }
 0x56f   :  { %v1330_v45 = vor.u32 1.1754944e-38, %v1329_v46  ;;  %vm1328_vm14 = vcmp.eq.f32.partialorder %v1327_v60, 8.507059e+37 }
 0x570   :  { %v1306_v18 = vmul.f32 %v1874_v9, %v1305_v16 }
 0x572   :  { %v1876_v21 = vpop.eup %1875  ;;  %v1307_v23 = vadd.f32 %v1874_v9, %v1306_v18 }
 0x573   :  { %v1878_v24 = vpop.eup %1877  ;;  %v1227_v26 = vadd.f32 1.0, %v1876_v21 }
 0x574   :  { %v1311_v27 = vsel %vm1310_vm9, %v1874_v9, %v1307_v23  ;;  %v1319_v28 = vmul.f32 %v1878_v24, %v1226_v12  ;;  %vm1324_vm11 = vweird.f32 %v1878_v24 }
 0x575   :  { %v2691_v29 = vsel %vm1313_vm10, %v1315_v25, %v1311_v27  ;;  %1879 = vrcp.f32 %v1227_v26  ;;  %vm1325_vm13 = vmor %vm1323_vm12, %vm1324_vm11  ;;  %v1344_v37 = vand.u32 2147483648, %v1227_v26  ;;  %v1342_v53 = vand.u32 2147483647, %v1227_v26 }
 0x576   :  { %v1320_v42 = vsub.f32 1.0, %v1319_v28  ;;  %vm1338_vm1 = vweird.f32 %v1227_v26 }
 0x577   :  { %v1345_v43 = vor.u32 1.1754944e-38, %v1344_v37  ;;  %vm1343_vm4 = vcmp.eq.f32.partialorder %v1342_v53, 8.507059e+37 }
 0x578   :  { %v1321_v38 = vmul.f32 %v1878_v24, %v1320_v42 }
 0x57a   :  { %v1322_v35 = vadd.f32 %v1878_v24, %v1321_v38 }
 0x57b   :  { %v1880_v39 = vpop.eup %1879 }
 0x57c   :  { %v1326_v50 = vsel %vm1325_vm13, %v1878_v24, %v1322_v35  ;;  %v1334_v48 = vmul.f32 %v1880_v39, %v1227_v26  ;;  %vm1339_vm0 = vweird.f32 %v1880_v39 }
 0x57d   :  { %v2693_v49 = vsel %vm1328_vm14, %v1330_v45, %v1326_v50  ;;  %vm1340_vm3 = vmor %vm1338_vm1, %vm1339_vm0 }
 0x57e   :  { %v1335_v59 = vsub.f32 1.0, %v1334_v48 }
 0x580   :  { %v1336_v58 = vmul.f32 %v1880_v39, %v1335_v59 }
 0x582   :  { %v1337_v44 = vadd.f32 %v1880_v39, %v1336_v58 }
 0x584   :  { %v1341_v41 = vsel %vm1340_vm3, %v1880_v39, %v1337_v44 }
 0x585   :  { %v2695_v57 = vsel %vm1343_vm4, %v1345_v43, %v1341_v41 }
 0x586 LB: > { %s1686_s15 = sshll.u32 %s1921_s2, 7  ;;  %s1353_s2 = sadd.s32 1, %s1921_s2   ;;  %s1921_s2 = sphi %s2697_s2, %s1353_s2  }
 0x587   : > { %s1355_s16 = sshra.s32 %s1686_s15, 7  ;;  %p1350_p1 = scmp.ge.s32.totalorder %s1353_s2, 2  }
 0x588   : > { %s2703_s17 = sshll.u32 %s1355_s16, 3  ;;  %s1539_s1 = sshll.u32 (%p1350_p1), %s2784_s8, 4  ;;  %s1540_s1 = int_to_ptr.hbm [resolvable:$true] %s1539_s1 }
 0x589   : > { %s1358_s20 = scalar_lea.vmem %s2782_s6, %s2703_s17  ;;  %s1428_s22 = scalar_lea.vmem %s2783_s7, %s2703_s17 }
 0x58a   : > { %v1360_v56 = vld [vmem:[%s1358_s20 + $0x10] sm:$0xff]  ;;  %v1359_v40 = vld [vmem:[%s1358_s20] sm:$0xff]  ;;  %s2749_s25 = scalar_lea.vmem %s2776_s0, %s2703_s17  ;;  %s2753_s26 = scalar_lea.vmem [#allocation2], %s2703_s17 }
 0x58b   : > { %1727 = vmatpush.msra.mxu2 %v1360_v56  ;;  %v1430_v55 = vld [vmem:[%s1428_s22 + $0x10] sm:$0xff]  ;;  %v1429_v47 = vld [vmem:[%s1428_s22] sm:$0xff]  ;;  %1400 = vmatpush.msra.mxu0 %v1360_v56  ;;  %s1925_s29 = smov (%p1350_p1), [#allocation2]   ;;  %s1926_s9 = smov (%p1350_p1), 256  }
 0x58c   : > { %1729 = vmatpush.msra.mxu3 %v1430_v55  ;;  %1469 = vmatpush.msra.mxu1 %v1430_v55  ;;  %v1706_v34 = vld [vmem:[%s2749_s25 + $0x80] sm:$0xff]  ;;  %v1707_v9 = vld [vmem:[%s2749_s25 + $0x90] sm:$0xff]  ;;  %s1537_s30 = sshll.u32 (%p1350_p1), %s1925_s29, 4  ;;  %s1927_s10 = smov (%p1350_p1), 16   ;;  %s1538_s30 = int_to_ptr.vmem [resolvable:$true] %s1537_s30 }
 0x58d   : > { %1728 = vmatpush.msra.mxu2 %v1359_v40  ;;  %1401 = vmatpush.msra.mxu0 %v1359_v40  ;;  %v1710_v3 = vld [vmem:[%s2749_s25 + $0xc0] sm:$0xff]  ;;  %v1711_v16 = vld [vmem:[%s2749_s25 + $0xd0] sm:$0xff] }
 0x58e   : > { %1730 = vmatpush.msra.mxu3 %v1429_v47  ;;  %1692 = vmatmul.msk.f32.vlgmr.msra.gmra.mxu2 %vm664_vm15, %v2638_v30  ;;  %v1708_v23 = vld [vmem:[%s2749_s25 + $0xa0] sm:$0xff]  ;;  %v1709_v35 = vld [vmem:[%s2749_s25 + $0xb0] sm:$0xff] }
 0x58f   : > { %1701 = vmatmul.msk.f32.vlgmr.msra.gmra.mxu3 %vm664_vm15, %v2689_v15  ;;  %1470 = vmatpush.msra.mxu1 %v1429_v47  ;;  %v1712_v28 = vld [vmem:[%s2749_s25 + $0xe0] sm:$0xff]  ;;  %v1713_v59 = vld [vmem:[%s2749_s25 + $0xf0] sm:$0xff] }
 0x590   : > { %1688 = vmatmul.msk.f32.vlgmr.msra.gmra.mxu0 %vm664_vm15, %v2614_v11  ;;  %1697 = vmatmul.msk.f32.vlgmr.msra.gmra.mxu1 %vm664_vm15, %v2658_v36 }
 0x596   : > { %1693 = vmatmul.msk.f32.gmra.mxu2 %vm664_vm15, %v2654_v31 }
 0x597   : > { %1702 = vmatmul.msk.f32.gmra.mxu3 %vm664_vm15, %v2691_v29 }
 0x598   : > { %1689 = vmatmul.msk.f32.gmra.mxu0 %vm664_vm15, %v2618_v54  ;;  %1698 = vmatmul.msk.f32.gmra.mxu1 %vm664_vm15, %v2676_v22 }
 0x59e   : > { %1694 = vmatmul.msk.f32.gmra.mxu2 %vm664_vm15, %v2674_v19 }
 0x59f   : > { %1703 = vmatmul.msk.f32.gmra.mxu3 %vm664_vm15, %v2693_v49 }
 0x5a0   : > { %1690 = vmatmul.msk.f32.gmra.mxu0 %vm664_vm15, %v2620_v61  ;;  %1699 = vmatmul.msk.f32.gmra.mxu1 %vm664_vm15, %v2683_v63 }
 0x5a6   : > { %1695 = vmatmul.msk.f32.gmra.mxu2 %vm664_vm15, %v2685_v51 }
 0x5a7   : > { %1704 = vmatmul.msk.f32.gmra.mxu3 %vm664_vm15, %v2695_v57 }
 0x5a8   : > { %1691 = vmatmul.msk.f32.gmra.mxu0 %vm664_vm15, %v2622_v7  ;;  %1700 = vmatmul.msk.f32.gmra.mxu1 %vm664_vm15, %v2687_v32 }
 0x60d   : > { %v1403_v33 = vpop.f32.mrf.mxu0  ;;  %v1472_v62 = vpop.f32.mrf.mxu1 }
 0x60e   : > { %v1496_v52 = vmul.f32 %v1472_v62, %v1403_v33 }
 0x610   : > { %v1515_v0 = vmul.f32 %v1706_v34, %v1496_v52 }
 0x611   : > { %v1415_v1 = vpop.f32.mrf.mxu2 }
 0x612   : > { %1715 = vst [vmem:[%s2753_s26 + $0x80] sm:$0xff] %v1515_v0  ;;  %v1484_v2 = vpop.f32.mrf.mxu3 }
 0x613   : > { %v1500_v4 = vmul.f32 %v1484_v2, %v1415_v1 }
 0x615   : > { %v1519_v5 = vmul.f32 %v1710_v3, %v1500_v4  ;;  %v1406_v6 = vpop.f32.mrf.mxu0  ;;  %v1475_v8 = vpop.f32.mrf.mxu1 }
 0x616   : > { %v1497_v10 = vmul.f32 %v1475_v8, %v1406_v6 }
 0x617   : > { %1719 = vst [vmem:[%s2753_s26 + $0xc0] sm:$0xff] %v1519_v5 }
 0x618   : > { %v1516_v12 = vmul.f32 %v1707_v9, %v1497_v10 }
 0x619   : > { %v1418_v13 = vpop.f32.mrf.mxu2 }
 0x61a   : > { %1716 = vst [vmem:[%s2753_s26 + $0x90] sm:$0xff] %v1516_v12  ;;  %v1487_v14 = vpop.f32.mrf.mxu3 }
 0x61b   : > { %v1501_v17 = vmul.f32 %v1487_v14, %v1418_v13 }
 0x61d   : > { %v1520_v18 = vmul.f32 %v1711_v16, %v1501_v17  ;;  %v1409_v20 = vpop.f32.mrf.mxu0  ;;  %v1478_v21 = vpop.f32.mrf.mxu1 }
 0x61e   : > { %v1498_v24 = vmul.f32 %v1478_v21, %v1409_v20 }
 0x61f   : > { %1720 = vst [vmem:[%s2753_s26 + $0xd0] sm:$0xff] %v1520_v18 }
 0x620   : > { %v1517_v25 = vmul.f32 %v1708_v23, %v1498_v24 }
 0x621   : > { %v1421_v26 = vpop.f32.mrf.mxu2 }
 0x622   : > { %1717 = vst [vmem:[%s2753_s26 + $0xa0] sm:$0xff] %v1517_v25  ;;  %v1490_v27 = vpop.f32.mrf.mxu3 }
 0x623   : > { %v1502_v42 = vmul.f32 %v1490_v27, %v1421_v26 }
 0x625   : > { %v1521_v46 = vmul.f32 %v1712_v28, %v1502_v42  ;;  %v1412_v38 = vpop.f32.mrf.mxu0  ;;  %v1481_v60 = vpop.f32.mrf.mxu1 }
 0x626   : > { %v1499_v39 = vmul.f32 %v1481_v60, %v1412_v38 }
 0x627   : > { %1721 = vst [vmem:[%s2753_s26 + $0xe0] sm:$0xff] %v1521_v46 }
 0x628   : > { %v1518_v45 = vmul.f32 %v1709_v35, %v1499_v39 }
 0x629   : > { %v1424_v50 = vpop.f32.mrf.mxu2 }
 0x62a   : > { %1718 = vst [vmem:[%s2753_s26 + $0xb0] sm:$0xff] %v1518_v45  ;;  %v1493_v48 = vpop.f32.mrf.mxu3 }
 0x62b   : > { %v1503_v37 = vmul.f32 %v1493_v48, %v1424_v50  ;;  %1352 = sbr.rel (!%p1350_p1) target bundleno = 1414 (0x586), region = 86 }
 0x62d   : > { %v1522_v58 = vmul.f32 %v1713_v59, %v1503_v37 }
 0x62f   : > { %1722 = vst [vmem:[%s2753_s26 + $0xf0] sm:$0xff] %v1522_v58 }
 0x630   :  { %1545 = dma.vmem_to_hbm [thread:$0]  %s1538_s30, 4096, %s1540_s1, [#allocation3], %s1926_s9, %s1926_s9, %s1927_s10  }
 0x631   :  { %1913 = dma.done.wait [#allocation3], 4096  }
 0x632   :  { %1914 = vsyncadd [#allocation3], 4294963200 }
 0x633   :  { %1550 = vsyncpa [#allocation3], 1 }

</bundles_post_ra>
